<compile_context>
chip_gen: v7x
topology: tpu7x:2x2x1
jax: 0.10.0
libtpu: 0.0.40
codegen_flags: <defaults>
</compile_context>

<pallas_src>
import jax
import jax.numpy as jnp
from jax import lax
from jax.experimental import pallas as pl
from jax.experimental.pallas import tpu as pltpu


# ----------------------------------------------------------------------------
# Fused forward kernel (default architecture: filters=[F0,F1,F2], first layer
# pool=False, next two pool=True, fcs=[nh]).  One grid step = one batch tile.
# ----------------------------------------------------------------------------
def _fused_dqn_kernel(img_ref, vec_ref,
                      cw0_ref, cb0_ref, cw1_ref, cb1_ref, cw2_ref, cb2_ref,
                      w1i_ref, w1v_ref, fb1_ref, fw2_ref, fb2_ref,
                      o_ref,
                      pad0, pad1, pad2, col0, col1, col2):
    bt, H, W, _ = img_ref.shape
    H2, W2 = H // 2, W // 2
    H3, W3 = H2 // 2, W2 // 2

    def zero_border(pbuf):
        # Zero only the 1-px border, every grid step (interior is always fully
        # overwritten).  No cross-step state -> safe under megacore 'parallel'.
        b, hp, wp, c = pbuf.shape
        pbuf[:, 0:1, :, :] = jnp.zeros((b, 1, wp, c), pbuf.dtype)
        pbuf[:, hp - 1:hp, :, :] = jnp.zeros((b, 1, wp, c), pbuf.dtype)
        pbuf[:, :, 0:1, :] = jnp.zeros((b, hp, 1, c), pbuf.dtype)
        pbuf[:, :, wp - 1:wp, :] = jnp.zeros((b, hp, 1, c), pbuf.dtype)

    def conv3x3_bias_relu(pbuf, col, w_ref, b_ref, hh, ww):
        # im2col: 9 shifted windows -> one (M, 9*Cin) bf16 buffer (aligned,
        # full-row stores), then ONE bf16 x bf16 -> f32 MXU matmul (K=9*Cin).
        cin = pbuf.shape[-1]
        m = bt * hh * ww
        for t in range(9):
            dy, dx = t // 3, t % 3
            win = pbuf[:, dy:dy + hh, dx:dx + ww, :].reshape(m, cin)
            col[:, t * cin:(t + 1) * cin] = win.astype(col.dtype)
        y = jnp.dot(col[...], w_ref[...], preferred_element_type=jnp.float32)
        return jnp.maximum(y + b_ref[...], 0.0)             # (m, Cout) f32

    def maxpool2x2(y_flat, hh, ww):
        # Direct stride-2 2x2 max-pool: H pair-max over a leading axis, then
        # W pair-max over the second-minor axis.  No selection matrices.
        c = y_flat.shape[-1]
        a = jnp.max(y_flat.reshape(bt, hh // 2, 2, ww, c), axis=2)
        return jnp.max(a.reshape(bt, hh // 2, ww // 2, 2, c), axis=3)

    # ---- layer 0: conv(Cin -> F0) + BN + ReLU, no pool ---------------------
    zero_border(pad0)
    pad0[:, 1:H + 1, 1:W + 1, :] = img_ref[...].astype(pad0.dtype)
    y0 = conv3x3_bias_relu(pad0, col0, cw0_ref, cb0_ref, H, W)   # (bt*H*W, F0)

    # ---- layer 1: conv(F0 -> F1) + BN + ReLU + MaxPool2d(2) ----------------
    f0 = cw0_ref.shape[-1]
    zero_border(pad1)
    pad1[:, 1:H + 1, 1:W + 1, :] = y0.reshape(bt, H, W, f0)
    y1 = conv3x3_bias_relu(pad1, col1, cw1_ref, cb1_ref, H, W)
    p1 = maxpool2x2(y1, H, W)                                    # (bt,H2,W2,F1)

    # ---- layer 2: conv(F1 -> F2) + BN + ReLU + MaxPool2d(2) ----------------
    zero_border(pad2)
    pad2[:, 1:H2 + 1, 1:W2 + 1, :] = p1
    y2 = conv3x3_bias_relu(pad2, col2, cw2_ref, cb2_ref, H2, W2)
    p2 = maxpool2x2(y2, H2, W2)                                  # (bt,H3,W3,F2)

    # ---- head: AdaptiveMaxPool2d((1,1)) + implicit concat + Linear/ReLU/Linear
    g = jnp.max(jnp.max(p2, axis=2), axis=1)                     # (bt, F2) f32
    vec = vec_ref[...].reshape(bt, vec_ref.shape[-1])
    h = (jnp.dot(g.astype(jnp.bfloat16), w1i_ref[...],
                 preferred_element_type=jnp.float32)
         + jnp.dot(vec.astype(jnp.bfloat16), w1v_ref[...],
                   preferred_element_type=jnp.float32)
         + fb1_ref[...])
    h = jnp.maximum(h, 0.0)
    out = (jnp.dot(h.astype(jnp.bfloat16), fw2_ref[...],
                   preferred_element_type=jnp.float32) + fb2_ref[...])
    o_ref[...] = out.reshape(bt, 1, out.shape[-1]).astype(o_ref.dtype)


# ----------------------------------------------------------------------------
# Wrapper: parameter prep (BN fold, bf16 quantization) + pallas_call.
# ----------------------------------------------------------------------------
def _pinned_spec(shape):
    nd = len(shape)
    return pl.BlockSpec(shape, lambda i, _nd=nd: (0,) * _nd)


def _pick_batch_tile(batch):
    # Prefer >=2 grid steps (pipelining / megacore sharding) with a small tile.
    for bt in (8, 4, 2, 1):
        if batch % bt == 0 and batch // bt >= 2:
            return bt
    return batch


def _nbytes(shape, dtype):
    n = 1
    for d in shape:
        n *= int(d)
    return n * jnp.dtype(dtype).itemsize


def combine_dqn_forward(state, params, *, batch_tile=None):
    """Pallas implementation of Combine_DQN.forward (image in NHWC)."""
    image = state["image"].astype(jnp.float32)
    vector = state["vector"].astype(jnp.float32)
    B, H, W, Cin = image.shape
    assert H % 4 == 0 and W % 4 == 0, "two 2x2 max-pools need H, W % 4 == 0"
    assert len(params["convs"]) == 3, "fused kernel written for 3 conv layers"

    (w0, s0, cb0), (w1, s1, cb1), (w2, s2, cb2) = params["convs"]
    f0, f1, f2 = w0.shape[-1], w1.shape[-1], w2.shape[-1]
    n_vec = vector.shape[-1]
    n_hid = params["w1_img"].shape[1]
    n_act = params["w2"].shape[1]
    H2, W2 = H // 2, W // 2

    # Fold eval-mode BatchNorm scale into the conv weights, flatten the 3x3
    # taps into the contraction dim (K = 9*Cin), quantize matmul operands to
    # bf16 (accumulation stays f32 on the MXU).
    cw0 = (w0 * s0).reshape(9 * Cin, f0).astype(jnp.bfloat16)
    cw1 = (w1 * s1).reshape(9 * f0, f1).astype(jnp.bfloat16)
    cw2 = (w2 * s2).reshape(9 * f1, f2).astype(jnp.bfloat16)
    w1i = params["w1_img"].astype(jnp.bfloat16)
    w1v = params["w1_vec"].astype(jnp.bfloat16)
    fw2 = params["w2"].astype(jnp.bfloat16)

    bt = _pick_batch_tile(B) if batch_tile is None else batch_tile
    assert B % bt == 0
    grid = (B // bt,)

    # Batch lives in a leading (untiled) dim everywhere so any bt is legal:
    # vector / output carry an explicit middle unit dim.
    vec3 = vector.reshape(B, 1, n_vec)

    inputs = (
        image, vec3,
        cw0, cb0.reshape(1, f0), cw1, cb1.reshape(1, f1), cw2, cb2.reshape(1, f2),
        w1i, w1v, params["b1"].reshape(1, n_hid),
        fw2, params["b2"].reshape(1, n_act),
    )

    in_specs = [
        pl.BlockSpec((bt, H, W, Cin), lambda i: (i, 0, 0, 0)),
        pl.BlockSpec((bt, 1, n_vec), lambda i: (i, 0, 0)),
    ] + [_pinned_spec(x.shape) for x in inputs[2:]]
    out_specs = pl.BlockSpec((bt, 1, n_act), lambda i: (i, 0, 0))

    scratch_defs = [
        ((bt, H + 2, W + 2, Cin), jnp.float32),    # pad0
        ((bt, H + 2, W + 2, f0), jnp.float32),     # pad1
        ((bt, H2 + 2, W2 + 2, f1), jnp.float32),   # pad2
        ((bt * H * W, 9 * Cin), jnp.bfloat16),     # col0
        ((bt * H * W, 9 * f0), jnp.bfloat16),      # col1
        ((bt * H2 * W2, 9 * f1), jnp.bfloat16),    # col2
    ]
    scratch_shapes = [pltpu.VMEM(s, d) for s, d in scratch_defs]

    # Explicit per-tile VMEM budget (double-buffered I/O blocks + scratch +
    # slack), clamped to what v5e/v6e/v7x can all provide.
    scratch_bytes = sum(_nbytes(s, d) for s, d in scratch_defs)
    block_bytes = (_nbytes((bt, H, W, Cin), jnp.float32)
                   + _nbytes((bt, 1, n_vec), jnp.float32)
                   + _nbytes((bt, 1, n_act), jnp.float32)
                   + sum(_nbytes(x.shape, x.dtype) for x in inputs[2:]))
    vmem_limit = int(min(64 << 20,
                         max(32 << 20, scratch_bytes + 4 * block_bytes + (16 << 20))))

    m0, m2 = B * H * W, B * H2 * W2
    flops = 2 * (m0 * (9 * Cin) * f0 + m0 * (9 * f0) * f1 + m2 * (9 * f1) * f2
                 + B * (f2 * n_hid + n_vec * n_hid + n_hid * n_act))
    bytes_accessed = (_nbytes(image.shape, jnp.float32)
                      + _nbytes(vec3.shape, jnp.float32)
                      + _nbytes((B, 1, n_act), jnp.float32)
                      + sum(_nbytes(x.shape, x.dtype) for x in inputs[2:]))

    out = pl.pallas_call(
        _fused_dqn_kernel,
        out_shape=jax.ShapeDtypeStruct((B, 1, n_act), jnp.float32),
        grid=grid,
        in_specs=in_specs,
        out_specs=out_specs,
        scratch_shapes=scratch_shapes,
        compiler_params=pltpu.CompilerParams(
            dimension_semantics=("parallel",),
            vmem_limit_bytes=vmem_limit),
        cost_estimate=pl.CostEstimate(
            flops=int(flops), transcendentals=0,
            bytes_accessed=int(bytes_accessed)),
    )(*inputs)
    return out.reshape(B, n_act)


# ----------------------------------------------------------------------------
# Parameters (deterministic, synthetic) and a pure-JAX reference that matches
# the kernel's bf16 quantization points.
# ----------------------------------------------------------------------------
def init_params(key, in_channels, n_vector, n_actions,
                filters=(32, 64, 128), fcs=(256,)):
    keys = iter(jax.random.split(key, 64))
    chans = [in_channels] + list(filters)
    convs = []
    for i in range(len(filters)):
        cin, cout = chans[i], chans[i + 1]
        w = jax.random.normal(next(keys), (3, 3, cin, cout), jnp.float32) \
            * (1.0 / jnp.sqrt(9.0 * cin))
        gamma = jax.random.uniform(next(keys), (cout,), jnp.float32, 0.5, 1.5)
        beta = jax.random.normal(next(keys), (cout,), jnp.float32) * 0.1
        mean = jax.random.normal(next(keys), (cout,), jnp.float32) * 0.1
        var = jax.random.uniform(next(keys), (cout,), jnp.float32, 0.5, 1.5)
        scale = gamma / jnp.sqrt(var + 1e-5)
        bias = beta - mean * scale
        convs.append((w, scale, bias))

    fc_in = filters[-1] + n_vector
    w1 = jax.random.normal(next(keys), (fc_in, fcs[0]), jnp.float32) \
        * (1.0 / jnp.sqrt(fc_in))
    b1 = jax.random.normal(next(keys), (fcs[0],), jnp.float32) * 0.05
    w2 = jax.random.normal(next(keys), (fcs[0], n_actions), jnp.float32) \
        * (1.0 / jnp.sqrt(fcs[0]))
    b2 = jax.random.normal(next(keys), (n_actions,), jnp.float32) * 0.05
    return {
        "convs": convs,
        "w1_img": w1[:filters[-1]], "w1_vec": w1[filters[-1]:],
        "b1": b1, "w2": w2, "b2": b2,
    }


def _ref_maxpool2x2(x):
    B, H, W, C = x.shape
    return jnp.max(x.reshape(B, H // 2, 2, W // 2, 2, C), axis=(2, 4))


def reference_forward(image, vector, params):
    """Pure-JAX reference (no Pallas) with the same bf16 matmul operands."""
    y = image.astype(jnp.float32)
    for idx, (w, scale, bias) in enumerate(params["convs"]):
        wq = (w * scale).astype(jnp.bfloat16)
        y = lax.conv_general_dilated(
            y.astype(jnp.bfloat16), wq, (1, 1), "SAME",
            dimension_numbers=("NHWC", "HWIO", "NHWC"),
            preferred_element_type=jnp.float32)
        y = jnp.maximum(y + bias, 0.0)
        if idx > 0:
            y = _ref_maxpool2x2(y)
    g = jnp.max(y, axis=(1, 2))
    h = (jnp.dot(g.astype(jnp.bfloat16), params["w1_img"].astype(jnp.bfloat16),
                 preferred_element_type=jnp.float32)
         + jnp.dot(vector.astype(jnp.bfloat16),
                   params["w1_vec"].astype(jnp.bfloat16),
                   preferred_element_type=jnp.float32)
         + params["b1"])
    h = jnp.maximum(h, 0.0)
    return (jnp.dot(h.astype(jnp.bfloat16), params["w2"].astype(jnp.bfloat16),
                    preferred_element_type=jnp.float32) + params["b2"])


if __name__ == "__main__":
    B, C_in, H, W = 2, 4, 16, 16
    n_vector, n_actions = 8, 6

    key = jax.random.PRNGKey(0)
    kp, ki, kv = jax.random.split(key, 3)
    params = init_params(kp, C_in, n_vector, n_actions)

    # PyTorch-style NCHW input, transposed once to the kernel's NHWC layout.
    image_nchw = jax.random.normal(ki, (B, C_in, H, W), jnp.float32)
    vector = jax.random.normal(kv, (B, n_vector), jnp.float32)
    image = jnp.transpose(image_nchw, (0, 2, 3, 1))

    out = combine_dqn_forward({"image": image, "vector": vector}, params)
    out = jax.block_until_ready(out)
    assert out.shape == (B, n_actions)

    ref = reference_forward(image, vector, params)
    if not bool(jnp.allclose(out, ref, atol=1e-2, rtol=1e-2)):
        raise AssertionError("Pallas output does not match JAX reference")

    print("KERNEL_OK")
</pallas_src>

<mosaic_0001>
module attributes {stable_mosaic.version = 11 : i64} {
  func.func @_fused_dqn_kernel(%arg0: i32, %arg1: memref<1x16x16x4xf32, #tpu.memory_space<vmem>>, %arg2: memref<1x1x8xf32, #tpu.memory_space<vmem>>, %arg3: memref<36x32xbf16, #tpu.memory_space<vmem>>, %arg4: memref<1x32xf32, #tpu.memory_space<vmem>>, %arg5: memref<288x64xbf16, #tpu.memory_space<vmem>>, %arg6: memref<1x64xf32, #tpu.memory_space<vmem>>, %arg7: memref<576x128xbf16, #tpu.memory_space<vmem>>, %arg8: memref<1x128xf32, #tpu.memory_space<vmem>>, %arg9: memref<128x256xbf16, #tpu.memory_space<vmem>>, %arg10: memref<8x256xbf16, #tpu.memory_space<vmem>>, %arg11: memref<1x256xf32, #tpu.memory_space<vmem>>, %arg12: memref<256x6xbf16, #tpu.memory_space<vmem>>, %arg13: memref<1x6xf32, #tpu.memory_space<vmem>>, %arg14: memref<1x1x6xf32, #tpu.memory_space<vmem>>, %arg15: memref<1x18x18x4xf32, #tpu.memory_space<vmem>>, %arg16: memref<1x18x18x32xf32, #tpu.memory_space<vmem>>, %arg17: memref<1x10x10x64xf32, #tpu.memory_space<vmem>>, %arg18: memref<256x36xbf16, #tpu.memory_space<vmem>>, %arg19: memref<256x288xbf16, #tpu.memory_space<vmem>>, %arg20: memref<64x576xbf16, #tpu.memory_space<vmem>>) attributes {dimension_semantics = [#tpu.dimension_semantics<parallel>], iteration_bounds = array<i64: 2>, scalar_prefetch = 0 : i64, scratch_operands = 6 : i64, tpu.core_type = #tpu.core_type<tc>, window_params = [{transform_indices = @transform_0, window_bounds = array<i64: 1, 16, 16, 4>}, {transform_indices = @transform_1, window_bounds = array<i64: 1, 1, 8>}, {pipeline_mode = #tpu.pipeline_mode<synchronous>, transform_indices = @transform_2, window_bounds = array<i64: 36, 32>}, {pipeline_mode = #tpu.pipeline_mode<synchronous>, transform_indices = @transform_3, window_bounds = array<i64: 1, 32>}, {pipeline_mode = #tpu.pipeline_mode<synchronous>, transform_indices = @transform_4, window_bounds = array<i64: 288, 64>}, {pipeline_mode = #tpu.pipeline_mode<synchronous>, transform_indices = @transform_5, window_bounds = array<i64: 1, 64>}, {pipeline_mode = #tpu.pipeline_mode<synchronous>, transform_indices = @transform_6, window_bounds = array<i64: 576, 128>}, {pipeline_mode = #tpu.pipeline_mode<synchronous>, transform_indices = @transform_7, window_bounds = array<i64: 1, 128>}, {pipeline_mode = #tpu.pipeline_mode<synchronous>, transform_indices = @transform_8, window_bounds = array<i64: 128, 256>}, {pipeline_mode = #tpu.pipeline_mode<synchronous>, transform_indices = @transform_9, window_bounds = array<i64: 8, 256>}, {pipeline_mode = #tpu.pipeline_mode<synchronous>, transform_indices = @transform_10, window_bounds = array<i64: 1, 256>}, {pipeline_mode = #tpu.pipeline_mode<synchronous>, transform_indices = @transform_11, window_bounds = array<i64: 256, 6>}, {pipeline_mode = #tpu.pipeline_mode<synchronous>, transform_indices = @transform_12, window_bounds = array<i64: 1, 6>}, {transform_indices = @transform_13, window_bounds = array<i64: 1, 1, 6>}]} {
    %cst = arith.constant 0.000000e+00 : f32
    %0 = vector.broadcast %cst : f32 to vector<1x1x18x4xf32>
    %c0 = arith.constant 0 : index
    %c0_0 = arith.constant 0 : index
    %c0_1 = arith.constant 0 : index
    %c0_2 = arith.constant 0 : index
    %1 = vector.load %arg15[%c0, %c0_0, %c0_1, %c0_2] : memref<1x18x18x4xf32, #tpu.memory_space<vmem>>, vector<1x1x18x4xf32>
    tpu.vector_store %arg15[%c0, %c0_0, %c0_1, %c0_2], %0 {strides = array<i32>} : memref<1x18x18x4xf32, #tpu.memory_space<vmem>>, vector<1x1x18x4xf32>,
    %cst_3 = arith.constant 0.000000e+00 : f32
    %2 = vector.broadcast %cst_3 : f32 to vector<1x1x18x4xf32>
    %c0_4 = arith.constant 0 : index
    %c17 = arith.constant 17 : index
    %c0_5 = arith.constant 0 : index
    %c0_6 = arith.constant 0 : index
    %3 = vector.load %arg15[%c0_4, %c17, %c0_5, %c0_6] : memref<1x18x18x4xf32, #tpu.memory_space<vmem>>, vector<1x1x18x4xf32>
    tpu.vector_store %arg15[%c0_4, %c17, %c0_5, %c0_6], %2 {strides = array<i32>} : memref<1x18x18x4xf32, #tpu.memory_space<vmem>>, vector<1x1x18x4xf32>,
    %cst_7 = arith.constant 0.000000e+00 : f32
    %4 = vector.broadcast %cst_7 : f32 to vector<1x18x1x4xf32>
    %c0_8 = arith.constant 0 : index
    %c0_9 = arith.constant 0 : index
    %c0_10 = arith.constant 0 : index
    %c0_11 = arith.constant 0 : index
    %5 = vector.load %arg15[%c0_8, %c0_9, %c0_10, %c0_11] : memref<1x18x18x4xf32, #tpu.memory_space<vmem>>, vector<1x18x1x4xf32>
    tpu.vector_store %arg15[%c0_8, %c0_9, %c0_10, %c0_11], %4 {strides = array<i32>} : memref<1x18x18x4xf32, #tpu.memory_space<vmem>>, vector<1x18x1x4xf32>,
    %cst_12 = arith.constant 0.000000e+00 : f32
    %6 = vector.broadcast %cst_12 : f32 to vector<1x18x1x4xf32>
    %c0_13 = arith.constant 0 : index
    %c0_14 = arith.constant 0 : index
    %c17_15 = arith.constant 17 : index
    %c0_16 = arith.constant 0 : index
    %7 = vector.load %arg15[%c0_13, %c0_14, %c17_15, %c0_16] : memref<1x18x18x4xf32, #tpu.memory_space<vmem>>, vector<1x18x1x4xf32>
    tpu.vector_store %arg15[%c0_13, %c0_14, %c17_15, %c0_16], %6 {strides = array<i32>} : memref<1x18x18x4xf32, #tpu.memory_space<vmem>>, vector<1x18x1x4xf32>,
    %c0_17 = arith.constant 0 : index
    %c0_18 = arith.constant 0 : index
    %c0_19 = arith.constant 0 : index
    %c0_20 = arith.constant 0 : index
    %8 = vector.load %arg1[%c0_17, %c0_18, %c0_19, %c0_20] : memref<1x16x16x4xf32, #tpu.memory_space<vmem>>, vector<1x16x16x4xf32>
    %c0_21 = arith.constant 0 : index
    %c1 = arith.constant 1 : index
    %c1_22 = arith.constant 1 : index
    %c0_23 = arith.constant 0 : index
    %9 = vector.load %arg15[%c0_21, %c1, %c1_22, %c0_23] : memref<1x18x18x4xf32, #tpu.memory_space<vmem>>, vector<1x16x16x4xf32>
    tpu.vector_store %arg15[%c0_21, %c1, %c1_22, %c0_23], %8 {strides = array<i32>} : memref<1x18x18x4xf32, #tpu.memory_space<vmem>>, vector<1x16x16x4xf32>,
    %c0_24 = arith.constant 0 : index
    %c0_25 = arith.constant 0 : index
    %c0_26 = arith.constant 0 : index
    %c0_27 = arith.constant 0 : index
    %10 = vector.load %arg15[%c0_24, %c0_25, %c0_26, %c0_27] : memref<1x18x18x4xf32, #tpu.memory_space<vmem>>, vector<1x16x16x4xf32>
    %11 = vector.shape_cast %10 : vector<1x16x16x4xf32> to vector<256x4xf32>
    %12 = arith.truncf %11 : vector<256x4xf32> to vector<256x4xbf16>
    %c0_28 = arith.constant 0 : index
    %c0_29 = arith.constant 0 : index
    %13 = vector.load %arg18[%c0_28, %c0_29] : memref<256x36xbf16, #tpu.memory_space<vmem>>, vector<256x4xbf16>
    tpu.vector_store %arg18[%c0_28, %c0_29], %12 {strides = array<i32>} : memref<256x36xbf16, #tpu.memory_space<vmem>>, vector<256x4xbf16>,
    %c0_30 = arith.constant 0 : index
    %c0_31 = arith.constant 0 : index
    %c1_32 = arith.constant 1 : index
    %c0_33 = arith.constant 0 : index
    %14 = vector.load %arg15[%c0_30, %c0_31, %c1_32, %c0_33] : memref<1x18x18x4xf32, #tpu.memory_space<vmem>>, vector<1x16x16x4xf32>
    %15 = vector.shape_cast %14 : vector<1x16x16x4xf32> to vector<256x4xf32>
    %16 = arith.truncf %15 : vector<256x4xf32> to vector<256x4xbf16>
    %c0_34 = arith.constant 0 : index
    %c4 = arith.constant 4 : index
    %17 = vector.load %arg18[%c0_34, %c4] : memref<256x36xbf16, #tpu.memory_space<vmem>>, vector<256x4xbf16>
    tpu.vector_store %arg18[%c0_34, %c4], %16 {strides = array<i32>} : memref<256x36xbf16, #tpu.memory_space<vmem>>, vector<256x4xbf16>,
    %c0_35 = arith.constant 0 : index
    %c0_36 = arith.constant 0 : index
    %c2 = arith.constant 2 : index
    %c0_37 = arith.constant 0 : index
    %18 = vector.load %arg15[%c0_35, %c0_36, %c2, %c0_37] : memref<1x18x18x4xf32, #tpu.memory_space<vmem>>, vector<1x16x16x4xf32>
    %19 = vector.shape_cast %18 : vector<1x16x16x4xf32> to vector<256x4xf32>
    %20 = arith.truncf %19 : vector<256x4xf32> to vector<256x4xbf16>
    %c0_38 = arith.constant 0 : index
    %c8 = arith.constant 8 : index
    %21 = vector.load %arg18[%c0_38, %c8] : memref<256x36xbf16, #tpu.memory_space<vmem>>, vector<256x4xbf16>
    tpu.vector_store %arg18[%c0_38, %c8], %20 {strides = array<i32>} : memref<256x36xbf16, #tpu.memory_space<vmem>>, vector<256x4xbf16>,
    %c0_39 = arith.constant 0 : index
    %c1_40 = arith.constant 1 : index
    %c0_41 = arith.constant 0 : index
    %c0_42 = arith.constant 0 : index
    %22 = vector.load %arg15[%c0_39, %c1_40, %c0_41, %c0_42] : memref<1x18x18x4xf32, #tpu.memory_space<vmem>>, vector<1x16x16x4xf32>
    %23 = vector.shape_cast %22 : vector<1x16x16x4xf32> to vector<256x4xf32>
    %24 = arith.truncf %23 : vector<256x4xf32> to vector<256x4xbf16>
    %c0_43 = arith.constant 0 : index
    %c12 = arith.constant 12 : index
    %25 = vector.load %arg18[%c0_43, %c12] : memref<256x36xbf16, #tpu.memory_space<vmem>>, vector<256x4xbf16>
    tpu.vector_store %arg18[%c0_43, %c12], %24 {strides = array<i32>} : memref<256x36xbf16, #tpu.memory_space<vmem>>, vector<256x4xbf16>,
    %c0_44 = arith.constant 0 : index
    %c1_45 = arith.constant 1 : index
    %c1_46 = arith.constant 1 : index
    %c0_47 = arith.constant 0 : index
    %26 = vector.load %arg15[%c0_44, %c1_45, %c1_46, %c0_47] : memref<1x18x18x4xf32, #tpu.memory_space<vmem>>, vector<1x16x16x4xf32>
    %27 = vector.shape_cast %26 : vector<1x16x16x4xf32> to vector<256x4xf32>
    %28 = arith.truncf %27 : vector<256x4xf32> to vector<256x4xbf16>
    %c0_48 = arith.constant 0 : index
    %c16 = arith.constant 16 : index
    %29 = vector.load %arg18[%c0_48, %c16] : memref<256x36xbf16, #tpu.memory_space<vmem>>, vector<256x4xbf16>
    tpu.vector_store %arg18[%c0_48, %c16], %28 {strides = array<i32>} : memref<256x36xbf16, #tpu.memory_space<vmem>>, vector<256x4xbf16>,
    %c0_49 = arith.constant 0 : index
    %c1_50 = arith.constant 1 : index
    %c2_51 = arith.constant 2 : index
    %c0_52 = arith.constant 0 : index
    %30 = vector.load %arg15[%c0_49, %c1_50, %c2_51, %c0_52] : memref<1x18x18x4xf32, #tpu.memory_space<vmem>>, vector<1x16x16x4xf32>
    %31 = vector.shape_cast %30 : vector<1x16x16x4xf32> to vector<256x4xf32>
    %32 = arith.truncf %31 : vector<256x4xf32> to vector<256x4xbf16>
    %c0_53 = arith.constant 0 : index
    %c20 = arith.constant 20 : index
    %33 = vector.load %arg18[%c0_53, %c20] : memref<256x36xbf16, #tpu.memory_space<vmem>>, vector<256x4xbf16>
    tpu.vector_store %arg18[%c0_53, %c20], %32 {strides = array<i32>} : memref<256x36xbf16, #tpu.memory_space<vmem>>, vector<256x4xbf16>,
    %c0_54 = arith.constant 0 : index
    %c2_55 = arith.constant 2 : index
    %c0_56 = arith.constant 0 : index
    %c0_57 = arith.constant 0 : index
    %34 = vector.load %arg15[%c0_54, %c2_55, %c0_56, %c0_57] : memref<1x18x18x4xf32, #tpu.memory_space<vmem>>, vector<1x16x16x4xf32>
    %35 = vector.shape_cast %34 : vector<1x16x16x4xf32> to vector<256x4xf32>
    %36 = arith.truncf %35 : vector<256x4xf32> to vector<256x4xbf16>
    %c0_58 = arith.constant 0 : index
    %c24 = arith.constant 24 : index
    %37 = vector.load %arg18[%c0_58, %c24] : memref<256x36xbf16, #tpu.memory_space<vmem>>, vector<256x4xbf16>
    tpu.vector_store %arg18[%c0_58, %c24], %36 {strides = array<i32>} : memref<256x36xbf16, #tpu.memory_space<vmem>>, vector<256x4xbf16>,
    %c0_59 = arith.constant 0 : index
    %c2_60 = arith.constant 2 : index
    %c1_61 = arith.constant 1 : index
    %c0_62 = arith.constant 0 : index
    %38 = vector.load %arg15[%c0_59, %c2_60, %c1_61, %c0_62] : memref<1x18x18x4xf32, #tpu.memory_space<vmem>>, vector<1x16x16x4xf32>
    %39 = vector.shape_cast %38 : vector<1x16x16x4xf32> to vector<256x4xf32>
    %40 = arith.truncf %39 : vector<256x4xf32> to vector<256x4xbf16>
    %c0_63 = arith.constant 0 : index
    %c28 = arith.constant 28 : index
    %41 = vector.load %arg18[%c0_63, %c28] : memref<256x36xbf16, #tpu.memory_space<vmem>>, vector<256x4xbf16>
    tpu.vector_store %arg18[%c0_63, %c28], %40 {strides = array<i32>} : memref<256x36xbf16, #tpu.memory_space<vmem>>, vector<256x4xbf16>,
    %c0_64 = arith.constant 0 : index
    %c2_65 = arith.constant 2 : index
    %c2_66 = arith.constant 2 : index
    %c0_67 = arith.constant 0 : index
    %42 = vector.load %arg15[%c0_64, %c2_65, %c2_66, %c0_67] : memref<1x18x18x4xf32, #tpu.memory_space<vmem>>, vector<1x16x16x4xf32>
    %43 = vector.shape_cast %42 : vector<1x16x16x4xf32> to vector<256x4xf32>
    %44 = arith.truncf %43 : vector<256x4xf32> to vector<256x4xbf16>
    %c0_68 = arith.constant 0 : index
    %c32 = arith.constant 32 : index
    %45 = vector.load %arg18[%c0_68, %c32] : memref<256x36xbf16, #tpu.memory_space<vmem>>, vector<256x4xbf16>
    tpu.vector_store %arg18[%c0_68, %c32], %44 {strides = array<i32>} : memref<256x36xbf16, #tpu.memory_space<vmem>>, vector<256x4xbf16>,
    %c0_69 = arith.constant 0 : index
    %c0_70 = arith.constant 0 : index
    %46 = vector.load %arg18[%c0_69, %c0_70] : memref<256x36xbf16, #tpu.memory_space<vmem>>, vector<256x36xbf16>
    %c0_71 = arith.constant 0 : index
    %c0_72 = arith.constant 0 : index
    %47 = vector.load %arg3[%c0_71, %c0_72] : memref<36x32xbf16, #tpu.memory_space<vmem>>, vector<36x32xbf16>
    %cst_73 = arith.constant dense<0.000000e+00> : vector<256x32xf32>
    %48 = tpu.matmul %46, %47, %cst_73 {dimension_numbers = #tpu.dot_dimension_numbers<[1], [0], [0], [1], [0, 0, 1, 1], [], []>} : vector<256x36xbf16>, vector<36x32xbf16>, vector<256x32xf32> -> vector<256x32xf32>
    %c0_74 = arith.constant 0 : index
    %c0_75 = arith.constant 0 : index
    %49 = vector.load %arg4[%c0_74, %c0_75] : memref<1x32xf32, #tpu.memory_space<vmem>>, vector<1x32xf32>
    %50 = vector.broadcast %49 : vector<1x32xf32> to vector<256x32xf32>
    %51 = arith.addf %48, %50 : vector<256x32xf32>
    %cst_76 = arith.constant 0.000000e+00 : f32
    %52 = vector.broadcast %cst_76 : f32 to vector<256x32xf32>
    %53 = arith.maximumf %51, %52 : vector<256x32xf32>
    %cst_77 = arith.constant 0.000000e+00 : f32
    %54 = vector.broadcast %cst_77 : f32 to vector<1x1x18x32xf32>
    %c0_78 = arith.constant 0 : index
    %c0_79 = arith.constant 0 : index
    %c0_80 = arith.constant 0 : index
    %c0_81 = arith.constant 0 : index
    %55 = vector.load %arg16[%c0_78, %c0_79, %c0_80, %c0_81] : memref<1x18x18x32xf32, #tpu.memory_space<vmem>>, vector<1x1x18x32xf32>
    tpu.vector_store %arg16[%c0_78, %c0_79, %c0_80, %c0_81], %54 {strides = array<i32>} : memref<1x18x18x32xf32, #tpu.memory_space<vmem>>, vector<1x1x18x32xf32>,
    %cst_82 = arith.constant 0.000000e+00 : f32
    %56 = vector.broadcast %cst_82 : f32 to vector<1x1x18x32xf32>
    %c0_83 = arith.constant 0 : index
    %c17_84 = arith.constant 17 : index
    %c0_85 = arith.constant 0 : index
    %c0_86 = arith.constant 0 : index
    %57 = vector.load %arg16[%c0_83, %c17_84, %c0_85, %c0_86] : memref<1x18x18x32xf32, #tpu.memory_space<vmem>>, vector<1x1x18x32xf32>
    tpu.vector_store %arg16[%c0_83, %c17_84, %c0_85, %c0_86], %56 {strides = array<i32>} : memref<1x18x18x32xf32, #tpu.memory_space<vmem>>, vector<1x1x18x32xf32>,
    %cst_87 = arith.constant 0.000000e+00 : f32
    %58 = vector.broadcast %cst_87 : f32 to vector<1x18x1x32xf32>
    %c0_88 = arith.constant 0 : index
    %c0_89 = arith.constant 0 : index
    %c0_90 = arith.constant 0 : index
    %c0_91 = arith.constant 0 : index
    %59 = vector.load %arg16[%c0_88, %c0_89, %c0_90, %c0_91] : memref<1x18x18x32xf32, #tpu.memory_space<vmem>>, vector<1x18x1x32xf32>
    tpu.vector_store %arg16[%c0_88, %c0_89, %c0_90, %c0_91], %58 {strides = array<i32>} : memref<1x18x18x32xf32, #tpu.memory_space<vmem>>, vector<1x18x1x32xf32>,
    %cst_92 = arith.constant 0.000000e+00 : f32
    %60 = vector.broadcast %cst_92 : f32 to vector<1x18x1x32xf32>
    %c0_93 = arith.constant 0 : index
    %c0_94 = arith.constant 0 : index
    %c17_95 = arith.constant 17 : index
    %c0_96 = arith.constant 0 : index
    %61 = vector.load %arg16[%c0_93, %c0_94, %c17_95, %c0_96] : memref<1x18x18x32xf32, #tpu.memory_space<vmem>>, vector<1x18x1x32xf32>
    tpu.vector_store %arg16[%c0_93, %c0_94, %c17_95, %c0_96], %60 {strides = array<i32>} : memref<1x18x18x32xf32, #tpu.memory_space<vmem>>, vector<1x18x1x32xf32>,
    %62 = vector.shape_cast %53 : vector<256x32xf32> to vector<1x16x16x32xf32>
    %c0_97 = arith.constant 0 : index
    %c1_98 = arith.constant 1 : index
    %c1_99 = arith.constant 1 : index
    %c0_100 = arith.constant 0 : index
    %63 = vector.load %arg16[%c0_97, %c1_98, %c1_99, %c0_100] : memref<1x18x18x32xf32, #tpu.memory_space<vmem>>, vector<1x16x16x32xf32>
    tpu.vector_store %arg16[%c0_97, %c1_98, %c1_99, %c0_100], %62 {strides = array<i32>} : memref<1x18x18x32xf32, #tpu.memory_space<vmem>>, vector<1x16x16x32xf32>,
    %c0_101 = arith.constant 0 : index
    %c0_102 = arith.constant 0 : index
    %c0_103 = arith.constant 0 : index
    %c0_104 = arith.constant 0 : index
    %64 = vector.load %arg16[%c0_101, %c0_102, %c0_103, %c0_104] : memref<1x18x18x32xf32, #tpu.memory_space<vmem>>, vector<1x16x16x32xf32>
    %65 = vector.shape_cast %64 : vector<1x16x16x32xf32> to vector<256x32xf32>
    %66 = arith.truncf %65 : vector<256x32xf32> to vector<256x32xbf16>
    %c0_105 = arith.constant 0 : index
    %c0_106 = arith.constant 0 : index
    %67 = vector.load %arg19[%c0_105, %c0_106] : memref<256x288xbf16, #tpu.memory_space<vmem>>, vector<256x32xbf16>
    tpu.vector_store %arg19[%c0_105, %c0_106], %66 {strides = array<i32>} : memref<256x288xbf16, #tpu.memory_space<vmem>>, vector<256x32xbf16>,
    %c0_107 = arith.constant 0 : index
    %c0_108 = arith.constant 0 : index
    %c1_109 = arith.constant 1 : index
    %c0_110 = arith.constant 0 : index
    %68 = vector.load %arg16[%c0_107, %c0_108, %c1_109, %c0_110] : memref<1x18x18x32xf32, #tpu.memory_space<vmem>>, vector<1x16x16x32xf32>
    %69 = vector.shape_cast %68 : vector<1x16x16x32xf32> to vector<256x32xf32>
    %70 = arith.truncf %69 : vector<256x32xf32> to vector<256x32xbf16>
    %c0_111 = arith.constant 0 : index
    %c32_112 = arith.constant 32 : index
    %71 = vector.load %arg19[%c0_111, %c32_112] : memref<256x288xbf16, #tpu.memory_space<vmem>>, vector<256x32xbf16>
    tpu.vector_store %arg19[%c0_111, %c32_112], %70 {strides = array<i32>} : memref<256x288xbf16, #tpu.memory_space<vmem>>, vector<256x32xbf16>,
    %c0_113 = arith.constant 0 : index
    %c0_114 = arith.constant 0 : index
    %c2_115 = arith.constant 2 : index
    %c0_116 = arith.constant 0 : index
    %72 = vector.load %arg16[%c0_113, %c0_114, %c2_115, %c0_116] : memref<1x18x18x32xf32, #tpu.memory_space<vmem>>, vector<1x16x16x32xf32>
    %73 = vector.shape_cast %72 : vector<1x16x16x32xf32> to vector<256x32xf32>
    %74 = arith.truncf %73 : vector<256x32xf32> to vector<256x32xbf16>
    %c0_117 = arith.constant 0 : index
    %c64 = arith.constant 64 : index
    %75 = vector.load %arg19[%c0_117, %c64] : memref<256x288xbf16, #tpu.memory_space<vmem>>, vector<256x32xbf16>
    tpu.vector_store %arg19[%c0_117, %c64], %74 {strides = array<i32>} : memref<256x288xbf16, #tpu.memory_space<vmem>>, vector<256x32xbf16>,
    %c0_118 = arith.constant 0 : index
    %c1_119 = arith.constant 1 : index
    %c0_120 = arith.constant 0 : index
    %c0_121 = arith.constant 0 : index
    %76 = vector.load %arg16[%c0_118, %c1_119, %c0_120, %c0_121] : memref<1x18x18x32xf32, #tpu.memory_space<vmem>>, vector<1x16x16x32xf32>
    %77 = vector.shape_cast %76 : vector<1x16x16x32xf32> to vector<256x32xf32>
    %78 = arith.truncf %77 : vector<256x32xf32> to vector<256x32xbf16>
    %c0_122 = arith.constant 0 : index
    %c96 = arith.constant 96 : index
    %79 = vector.load %arg19[%c0_122, %c96] : memref<256x288xbf16, #tpu.memory_space<vmem>>, vector<256x32xbf16>
    tpu.vector_store %arg19[%c0_122, %c96], %78 {strides = array<i32>} : memref<256x288xbf16, #tpu.memory_space<vmem>>, vector<256x32xbf16>,
    %c0_123 = arith.constant 0 : index
    %c1_124 = arith.constant 1 : index
    %c1_125 = arith.constant 1 : index
    %c0_126 = arith.constant 0 : index
    %80 = vector.load %arg16[%c0_123, %c1_124, %c1_125, %c0_126] : memref<1x18x18x32xf32, #tpu.memory_space<vmem>>, vector<1x16x16x32xf32>
    %81 = vector.shape_cast %80 : vector<1x16x16x32xf32> to vector<256x32xf32>
    %82 = arith.truncf %81 : vector<256x32xf32> to vector<256x32xbf16>
    %c0_127 = arith.constant 0 : index
    %c128 = arith.constant 128 : index
    %83 = vector.load %arg19[%c0_127, %c128] : memref<256x288xbf16, #tpu.memory_space<vmem>>, vector<256x32xbf16>
    tpu.vector_store %arg19[%c0_127, %c128], %82 {strides = array<i32>} : memref<256x288xbf16, #tpu.memory_space<vmem>>, vector<256x32xbf16>,
    %c0_128 = arith.constant 0 : index
    %c1_129 = arith.constant 1 : index
    %c2_130 = arith.constant 2 : index
    %c0_131 = arith.constant 0 : index
    %84 = vector.load %arg16[%c0_128, %c1_129, %c2_130, %c0_131] : memref<1x18x18x32xf32, #tpu.memory_space<vmem>>, vector<1x16x16x32xf32>
    %85 = vector.shape_cast %84 : vector<1x16x16x32xf32> to vector<256x32xf32>
    %86 = arith.truncf %85 : vector<256x32xf32> to vector<256x32xbf16>
    %c0_132 = arith.constant 0 : index
    %c160 = arith.constant 160 : index
    %87 = vector.load %arg19[%c0_132, %c160] : memref<256x288xbf16, #tpu.memory_space<vmem>>, vector<256x32xbf16>
    tpu.vector_store %arg19[%c0_132, %c160], %86 {strides = array<i32>} : memref<256x288xbf16, #tpu.memory_space<vmem>>, vector<256x32xbf16>,
    %c0_133 = arith.constant 0 : index
    %c2_134 = arith.constant 2 : index
    %c0_135 = arith.constant 0 : index
    %c0_136 = arith.constant 0 : index
    %88 = vector.load %arg16[%c0_133, %c2_134, %c0_135, %c0_136] : memref<1x18x18x32xf32, #tpu.memory_space<vmem>>, vector<1x16x16x32xf32>
    %89 = vector.shape_cast %88 : vector<1x16x16x32xf32> to vector<256x32xf32>
    %90 = arith.truncf %89 : vector<256x32xf32> to vector<256x32xbf16>
    %c0_137 = arith.constant 0 : index
    %c192 = arith.constant 192 : index
    %91 = vector.load %arg19[%c0_137, %c192] : memref<256x288xbf16, #tpu.memory_space<vmem>>, vector<256x32xbf16>
    tpu.vector_store %arg19[%c0_137, %c192], %90 {strides = array<i32>} : memref<256x288xbf16, #tpu.memory_space<vmem>>, vector<256x32xbf16>,
    %c0_138 = arith.constant 0 : index
    %c2_139 = arith.constant 2 : index
    %c1_140 = arith.constant 1 : index
    %c0_141 = arith.constant 0 : index
    %92 = vector.load %arg16[%c0_138, %c2_139, %c1_140, %c0_141] : memref<1x18x18x32xf32, #tpu.memory_space<vmem>>, vector<1x16x16x32xf32>
    %93 = vector.shape_cast %92 : vector<1x16x16x32xf32> to vector<256x32xf32>
    %94 = arith.truncf %93 : vector<256x32xf32> to vector<256x32xbf16>
    %c0_142 = arith.constant 0 : index
    %c224 = arith.constant 224 : index
    %95 = vector.load %arg19[%c0_142, %c224] : memref<256x288xbf16, #tpu.memory_space<vmem>>, vector<256x32xbf16>
    tpu.vector_store %arg19[%c0_142, %c224], %94 {strides = array<i32>} : memref<256x288xbf16, #tpu.memory_space<vmem>>, vector<256x32xbf16>,
    %c0_143 = arith.constant 0 : index
    %c2_144 = arith.constant 2 : index
    %c2_145 = arith.constant 2 : index
    %c0_146 = arith.constant 0 : index
    %96 = vector.load %arg16[%c0_143, %c2_144, %c2_145, %c0_146] : memref<1x18x18x32xf32, #tpu.memory_space<vmem>>, vector<1x16x16x32xf32>
    %97 = vector.shape_cast %96 : vector<1x16x16x32xf32> to vector<256x32xf32>
    %98 = arith.truncf %97 : vector<256x32xf32> to vector<256x32xbf16>
    %c0_147 = arith.constant 0 : index
    %c256 = arith.constant 256 : index
    %99 = vector.load %arg19[%c0_147, %c256] : memref<256x288xbf16, #tpu.memory_space<vmem>>, vector<256x32xbf16>
    tpu.vector_store %arg19[%c0_147, %c256], %98 {strides = array<i32>} : memref<256x288xbf16, #tpu.memory_space<vmem>>, vector<256x32xbf16>,
    %c0_148 = arith.constant 0 : index
    %c0_149 = arith.constant 0 : index
    %100 = vector.load %arg19[%c0_148, %c0_149] : memref<256x288xbf16, #tpu.memory_space<vmem>>, vector<256x288xbf16>
    %c0_150 = arith.constant 0 : index
    %c0_151 = arith.constant 0 : index
    %101 = vector.load %arg5[%c0_150, %c0_151] : memref<288x64xbf16, #tpu.memory_space<vmem>>, vector<288x64xbf16>
    %cst_152 = arith.constant dense<0.000000e+00> : vector<256x64xf32>
    %102 = tpu.matmul %100, %101, %cst_152 {dimension_numbers = #tpu.dot_dimension_numbers<[1], [0], [0], [1], [0, 0, 1, 1], [], []>} : vector<256x288xbf16>, vector<288x64xbf16>, vector<256x64xf32> -> vector<256x64xf32>
    %c0_153 = arith.constant 0 : index
    %c0_154 = arith.constant 0 : index
    %103 = vector.load %arg6[%c0_153, %c0_154] : memref<1x64xf32, #tpu.memory_space<vmem>>, vector<1x64xf32>
    %104 = vector.broadcast %103 : vector<1x64xf32> to vector<256x64xf32>
    %105 = arith.addf %102, %104 : vector<256x64xf32>
    %cst_155 = arith.constant 0.000000e+00 : f32
    %106 = vector.broadcast %cst_155 : f32 to vector<256x64xf32>
    %107 = arith.maximumf %105, %106 : vector<256x64xf32>
    %108 = vector.shape_cast %107 : vector<256x64xf32> to vector<1x8x2x16x64xf32>
    %cst_156 = arith.constant dense<0xFF800000> : vector<1x8x16x64xf32>
    %109 = vector.multi_reduction <maximumf>, %108, %cst_156 [2] : vector<1x8x2x16x64xf32> to vector<1x8x16x64xf32>
    %110 = vector.shape_cast %109 : vector<1x8x16x64xf32> to vector<1x8x8x2x64xf32>
    %cst_157 = arith.constant dense<0xFF800000> : vector<1x8x8x64xf32>
    %111 = vector.multi_reduction <maximumf>, %110, %cst_157 [3] : vector<1x8x8x2x64xf32> to vector<1x8x8x64xf32>
    %cst_158 = arith.constant 0.000000e+00 : f32
    %112 = vector.broadcast %cst_158 : f32 to vector<1x1x10x64xf32>
    %c0_159 = arith.constant 0 : index
    %c0_160 = arith.constant 0 : index
    %c0_161 = arith.constant 0 : index
    %c0_162 = arith.constant 0 : index
    %113 = vector.load %arg17[%c0_159, %c0_160, %c0_161, %c0_162] : memref<1x10x10x64xf32, #tpu.memory_space<vmem>>, vector<1x1x10x64xf32>
    tpu.vector_store %arg17[%c0_159, %c0_160, %c0_161, %c0_162], %112 {strides = array<i32>} : memref<1x10x10x64xf32, #tpu.memory_space<vmem>>, vector<1x1x10x64xf32>,
    %cst_163 = arith.constant 0.000000e+00 : f32
    %114 = vector.broadcast %cst_163 : f32 to vector<1x1x10x64xf32>
    %c0_164 = arith.constant 0 : index
    %c9 = arith.constant 9 : index
    %c0_165 = arith.constant 0 : index
    %c0_166 = arith.constant 0 : index
    %115 = vector.load %arg17[%c0_164, %c9, %c0_165, %c0_166] : memref<1x10x10x64xf32, #tpu.memory_space<vmem>>, vector<1x1x10x64xf32>
    tpu.vector_store %arg17[%c0_164, %c9, %c0_165, %c0_166], %114 {strides = array<i32>} : memref<1x10x10x64xf32, #tpu.memory_space<vmem>>, vector<1x1x10x64xf32>,
    %cst_167 = arith.constant 0.000000e+00 : f32
    %116 = vector.broadcast %cst_167 : f32 to vector<1x10x1x64xf32>
    %c0_168 = arith.constant 0 : index
    %c0_169 = arith.constant 0 : index
    %c0_170 = arith.constant 0 : index
    %c0_171 = arith.constant 0 : index
    %117 = vector.load %arg17[%c0_168, %c0_169, %c0_170, %c0_171] : memref<1x10x10x64xf32, #tpu.memory_space<vmem>>, vector<1x10x1x64xf32>
    tpu.vector_store %arg17[%c0_168, %c0_169, %c0_170, %c0_171], %116 {strides = array<i32>} : memref<1x10x10x64xf32, #tpu.memory_space<vmem>>, vector<1x10x1x64xf32>,
    %cst_172 = arith.constant 0.000000e+00 : f32
    %118 = vector.broadcast %cst_172 : f32 to vector<1x10x1x64xf32>
    %c0_173 = arith.constant 0 : index
    %c0_174 = arith.constant 0 : index
    %c9_175 = arith.constant 9 : index
    %c0_176 = arith.constant 0 : index
    %119 = vector.load %arg17[%c0_173, %c0_174, %c9_175, %c0_176] : memref<1x10x10x64xf32, #tpu.memory_space<vmem>>, vector<1x10x1x64xf32>
    tpu.vector_store %arg17[%c0_173, %c0_174, %c9_175, %c0_176], %118 {strides = array<i32>} : memref<1x10x10x64xf32, #tpu.memory_space<vmem>>, vector<1x10x1x64xf32>,
    %c0_177 = arith.constant 0 : index
    %c1_178 = arith.constant 1 : index
    %c1_179 = arith.constant 1 : index
    %c0_180 = arith.constant 0 : index
    %120 = vector.load %arg17[%c0_177, %c1_178, %c1_179, %c0_180] : memref<1x10x10x64xf32, #tpu.memory_space<vmem>>, vector<1x8x8x64xf32>
    tpu.vector_store %arg17[%c0_177, %c1_178, %c1_179, %c0_180], %111 {strides = array<i32>} : memref<1x10x10x64xf32, #tpu.memory_space<vmem>>, vector<1x8x8x64xf32>,
    %c0_181 = arith.constant 0 : index
    %c0_182 = arith.constant 0 : index
    %c0_183 = arith.constant 0 : index
    %c0_184 = arith.constant 0 : index
    %121 = vector.load %arg17[%c0_181, %c0_182, %c0_183, %c0_184] : memref<1x10x10x64xf32, #tpu.memory_space<vmem>>, vector<1x8x8x64xf32>
    %122 = vector.shape_cast %121 : vector<1x8x8x64xf32> to vector<64x64xf32>
    %123 = arith.truncf %122 : vector<64x64xf32> to vector<64x64xbf16>
    %c0_185 = arith.constant 0 : index
    %c0_186 = arith.constant 0 : index
    %124 = vector.load %arg20[%c0_185, %c0_186] : memref<64x576xbf16, #tpu.memory_space<vmem>>, vector<64x64xbf16>
    tpu.vector_store %arg20[%c0_185, %c0_186], %123 {strides = array<i32>} : memref<64x576xbf16, #tpu.memory_space<vmem>>, vector<64x64xbf16>,
    %c0_187 = arith.constant 0 : index
    %c0_188 = arith.constant 0 : index
    %c1_189 = arith.constant 1 : index
    %c0_190 = arith.constant 0 : index
    %125 = vector.load %arg17[%c0_187, %c0_188, %c1_189, %c0_190] : memref<1x10x10x64xf32, #tpu.memory_space<vmem>>, vector<1x8x8x64xf32>
    %126 = vector.shape_cast %125 : vector<1x8x8x64xf32> to vector<64x64xf32>
    %127 = arith.truncf %126 : vector<64x64xf32> to vector<64x64xbf16>
    %c0_191 = arith.constant 0 : index
    %c64_192 = arith.constant 64 : index
    %128 = vector.load %arg20[%c0_191, %c64_192] : memref<64x576xbf16, #tpu.memory_space<vmem>>, vector<64x64xbf16>
    tpu.vector_store %arg20[%c0_191, %c64_192], %127 {strides = array<i32>} : memref<64x576xbf16, #tpu.memory_space<vmem>>, vector<64x64xbf16>,
    %c0_193 = arith.constant 0 : index
    %c0_194 = arith.constant 0 : index
    %c2_195 = arith.constant 2 : index
    %c0_196 = arith.constant 0 : index
    %129 = vector.load %arg17[%c0_193, %c0_194, %c2_195, %c0_196] : memref<1x10x10x64xf32, #tpu.memory_space<vmem>>, vector<1x8x8x64xf32>
    %130 = vector.shape_cast %129 : vector<1x8x8x64xf32> to vector<64x64xf32>
    %131 = arith.truncf %130 : vector<64x64xf32> to vector<64x64xbf16>
    %c0_197 = arith.constant 0 : index
    %c128_198 = arith.constant 128 : index
    %132 = vector.load %arg20[%c0_197, %c128_198] : memref<64x576xbf16, #tpu.memory_space<vmem>>, vector<64x64xbf16>
    tpu.vector_store %arg20[%c0_197, %c128_198], %131 {strides = array<i32>} : memref<64x576xbf16, #tpu.memory_space<vmem>>, vector<64x64xbf16>,
    %c0_199 = arith.constant 0 : index
    %c1_200 = arith.constant 1 : index
    %c0_201 = arith.constant 0 : index
    %c0_202 = arith.constant 0 : index
    %133 = vector.load %arg17[%c0_199, %c1_200, %c0_201, %c0_202] : memref<1x10x10x64xf32, #tpu.memory_space<vmem>>, vector<1x8x8x64xf32>
    %134 = vector.shape_cast %133 : vector<1x8x8x64xf32> to vector<64x64xf32>
    %135 = arith.truncf %134 : vector<64x64xf32> to vector<64x64xbf16>
    %c0_203 = arith.constant 0 : index
    %c192_204 = arith.constant 192 : index
    %136 = vector.load %arg20[%c0_203, %c192_204] : memref<64x576xbf16, #tpu.memory_space<vmem>>, vector<64x64xbf16>
    tpu.vector_store %arg20[%c0_203, %c192_204], %135 {strides = array<i32>} : memref<64x576xbf16, #tpu.memory_space<vmem>>, vector<64x64xbf16>,
    %c0_205 = arith.constant 0 : index
    %c1_206 = arith.constant 1 : index
    %c1_207 = arith.constant 1 : index
    %c0_208 = arith.constant 0 : index
    %137 = vector.load %arg17[%c0_205, %c1_206, %c1_207, %c0_208] : memref<1x10x10x64xf32, #tpu.memory_space<vmem>>, vector<1x8x8x64xf32>
    %138 = vector.shape_cast %137 : vector<1x8x8x64xf32> to vector<64x64xf32>
    %139 = arith.truncf %138 : vector<64x64xf32> to vector<64x64xbf16>
    %c0_209 = arith.constant 0 : index
    %c256_210 = arith.constant 256 : index
    %140 = vector.load %arg20[%c0_209, %c256_210] : memref<64x576xbf16, #tpu.memory_space<vmem>>, vector<64x64xbf16>
    tpu.vector_store %arg20[%c0_209, %c256_210], %139 {strides = array<i32>} : memref<64x576xbf16, #tpu.memory_space<vmem>>, vector<64x64xbf16>,
    %c0_211 = arith.constant 0 : index
    %c1_212 = arith.constant 1 : index
    %c2_213 = arith.constant 2 : index
    %c0_214 = arith.constant 0 : index
    %141 = vector.load %arg17[%c0_211, %c1_212, %c2_213, %c0_214] : memref<1x10x10x64xf32, #tpu.memory_space<vmem>>, vector<1x8x8x64xf32>
    %142 = vector.shape_cast %141 : vector<1x8x8x64xf32> to vector<64x64xf32>
    %143 = arith.truncf %142 : vector<64x64xf32> to vector<64x64xbf16>
    %c0_215 = arith.constant 0 : index
    %c320 = arith.constant 320 : index
    %144 = vector.load %arg20[%c0_215, %c320] : memref<64x576xbf16, #tpu.memory_space<vmem>>, vector<64x64xbf16>
    tpu.vector_store %arg20[%c0_215, %c320], %143 {strides = array<i32>} : memref<64x576xbf16, #tpu.memory_space<vmem>>, vector<64x64xbf16>,
    %c0_216 = arith.constant 0 : index
    %c2_217 = arith.constant 2 : index
    %c0_218 = arith.constant 0 : index
    %c0_219 = arith.constant 0 : index
    %145 = vector.load %arg17[%c0_216, %c2_217, %c0_218, %c0_219] : memref<1x10x10x64xf32, #tpu.memory_space<vmem>>, vector<1x8x8x64xf32>
    %146 = vector.shape_cast %145 : vector<1x8x8x64xf32> to vector<64x64xf32>
    %147 = arith.truncf %146 : vector<64x64xf32> to vector<64x64xbf16>
    %c0_220 = arith.constant 0 : index
    %c384 = arith.constant 384 : index
    %148 = vector.load %arg20[%c0_220, %c384] : memref<64x576xbf16, #tpu.memory_space<vmem>>, vector<64x64xbf16>
    tpu.vector_store %arg20[%c0_220, %c384], %147 {strides = array<i32>} : memref<64x576xbf16, #tpu.memory_space<vmem>>, vector<64x64xbf16>,
    %c0_221 = arith.constant 0 : index
    %c2_222 = arith.constant 2 : index
    %c1_223 = arith.constant 1 : index
    %c0_224 = arith.constant 0 : index
    %149 = vector.load %arg17[%c0_221, %c2_222, %c1_223, %c0_224] : memref<1x10x10x64xf32, #tpu.memory_space<vmem>>, vector<1x8x8x64xf32>
    %150 = vector.shape_cast %149 : vector<1x8x8x64xf32> to vector<64x64xf32>
    %151 = arith.truncf %150 : vector<64x64xf32> to vector<64x64xbf16>
    %c0_225 = arith.constant 0 : index
    %c448 = arith.constant 448 : index
    %152 = vector.load %arg20[%c0_225, %c448] : memref<64x576xbf16, #tpu.memory_space<vmem>>, vector<64x64xbf16>
    tpu.vector_store %arg20[%c0_225, %c448], %151 {strides = array<i32>} : memref<64x576xbf16, #tpu.memory_space<vmem>>, vector<64x64xbf16>,
    %c0_226 = arith.constant 0 : index
    %c2_227 = arith.constant 2 : index
    %c2_228 = arith.constant 2 : index
    %c0_229 = arith.constant 0 : index
    %153 = vector.load %arg17[%c0_226, %c2_227, %c2_228, %c0_229] : memref<1x10x10x64xf32, #tpu.memory_space<vmem>>, vector<1x8x8x64xf32>
    %154 = vector.shape_cast %153 : vector<1x8x8x64xf32> to vector<64x64xf32>
    %155 = arith.truncf %154 : vector<64x64xf32> to vector<64x64xbf16>
    %c0_230 = arith.constant 0 : index
    %c512 = arith.constant 512 : index
    %156 = vector.load %arg20[%c0_230, %c512] : memref<64x576xbf16, #tpu.memory_space<vmem>>, vector<64x64xbf16>
    tpu.vector_store %arg20[%c0_230, %c512], %155 {strides = array<i32>} : memref<64x576xbf16, #tpu.memory_space<vmem>>, vector<64x64xbf16>,
    %c0_231 = arith.constant 0 : index
    %c0_232 = arith.constant 0 : index
    %157 = vector.load %arg20[%c0_231, %c0_232] : memref<64x576xbf16, #tpu.memory_space<vmem>>, vector<64x576xbf16>
    %c0_233 = arith.constant 0 : index
    %c0_234 = arith.constant 0 : index
    %158 = vector.load %arg7[%c0_233, %c0_234] : memref<576x128xbf16, #tpu.memory_space<vmem>>, vector<576x128xbf16>
    %cst_235 = arith.constant dense<0.000000e+00> : vector<64x128xf32>
    %159 = tpu.matmul %157, %158, %cst_235 {dimension_numbers = #tpu.dot_dimension_numbers<[1], [0], [0], [1], [0, 0, 1, 1], [], []>} : vector<64x576xbf16>, vector<576x128xbf16>, vector<64x128xf32> -> vector<64x128xf32>
    %c0_236 = arith.constant 0 : index
    %c0_237 = arith.constant 0 : index
    %160 = vector.load %arg8[%c0_236, %c0_237] : memref<1x128xf32, #tpu.memory_space<vmem>>, vector<1x128xf32>
    %161 = vector.broadcast %160 : vector<1x128xf32> to vector<64x128xf32>
    %162 = arith.addf %159, %161 : vector<64x128xf32>
    %cst_238 = arith.constant 0.000000e+00 : f32
    %163 = vector.broadcast %cst_238 : f32 to vector<64x128xf32>
    %164 = arith.maximumf %162, %163 : vector<64x128xf32>
    %165 = vector.shape_cast %164 : vector<64x128xf32> to vector<1x4x2x8x128xf32>
    %cst_239 = arith.constant dense<0xFF800000> : vector<1x4x8x128xf32>
    %166 = vector.multi_reduction <maximumf>, %165, %cst_239 [2] : vector<1x4x2x8x128xf32> to vector<1x4x8x128xf32>
    %167 = vector.shape_cast %166 : vector<1x4x8x128xf32> to vector<1x4x4x2x128xf32>
    %cst_240 = arith.constant dense<0xFF800000> : vector<1x4x4x128xf32>
    %168 = vector.multi_reduction <maximumf>, %167, %cst_240 [3] : vector<1x4x4x2x128xf32> to vector<1x4x4x128xf32>
    %cst_241 = arith.constant dense<0xFF800000> : vector<1x4x128xf32>
    %169 = vector.multi_reduction <maximumf>, %168, %cst_241 [2] : vector<1x4x4x128xf32> to vector<1x4x128xf32>
    %cst_242 = arith.constant dense<0xFF800000> : vector<1x128xf32>
    %170 = vector.multi_reduction <maximumf>, %169, %cst_242 [1] : vector<1x4x128xf32> to vector<1x128xf32>
    %c0_243 = arith.constant 0 : index
    %c0_244 = arith.constant 0 : index
    %c0_245 = arith.constant 0 : index
    %171 = vector.load %arg2[%c0_243, %c0_244, %c0_245] : memref<1x1x8xf32, #tpu.memory_space<vmem>>, vector<1x1x8xf32>
    %172 = vector.shape_cast %171 : vector<1x1x8xf32> to vector<1x8xf32>
    %173 = arith.truncf %170 : vector<1x128xf32> to vector<1x128xbf16>
    %c0_246 = arith.constant 0 : index
    %c0_247 = arith.constant 0 : index
    %174 = vector.load %arg9[%c0_246, %c0_247] : memref<128x256xbf16, #tpu.memory_space<vmem>>, vector<128x256xbf16>
    %cst_248 = arith.constant dense<0.000000e+00> : vector<1x256xf32>
    %175 = tpu.matmul %173, %174, %cst_248 {dimension_numbers = #tpu.dot_dimension_numbers<[1], [0], [0], [1], [0, 0, 1, 1], [], []>} : vector<1x128xbf16>, vector<128x256xbf16>, vector<1x256xf32> -> vector<1x256xf32>
    %176 = arith.truncf %172 : vector<1x8xf32> to vector<1x8xbf16>
    %c0_249 = arith.constant 0 : index
    %c0_250 = arith.constant 0 : index
    %177 = vector.load %arg10[%c0_249, %c0_250] : memref<8x256xbf16, #tpu.memory_space<vmem>>, vector<8x256xbf16>
    %cst_251 = arith.constant dense<0.000000e+00> : vector<1x256xf32>
    %178 = tpu.matmul %176, %177, %cst_251 {dimension_numbers = #tpu.dot_dimension_numbers<[1], [0], [0], [1], [0, 0, 1, 1], [], []>} : vector<1x8xbf16>, vector<8x256xbf16>, vector<1x256xf32> -> vector<1x256xf32>
    %179 = arith.addf %175, %178 : vector<1x256xf32>
    %c0_252 = arith.constant 0 : index
    %c0_253 = arith.constant 0 : index
    %180 = vector.load %arg11[%c0_252, %c0_253] : memref<1x256xf32, #tpu.memory_space<vmem>>, vector<1x256xf32>
    %181 = arith.addf %179, %180 : vector<1x256xf32>
    %cst_254 = arith.constant 0.000000e+00 : f32
    %182 = vector.broadcast %cst_254 : f32 to vector<1x256xf32>
    %183 = arith.maximumf %181, %182 : vector<1x256xf32>
    %184 = arith.truncf %183 : vector<1x256xf32> to vector<1x256xbf16>
    %c0_255 = arith.constant 0 : index
    %c0_256 = arith.constant 0 : index
    %185 = vector.load %arg12[%c0_255, %c0_256] : memref<256x6xbf16, #tpu.memory_space<vmem>>, vector<256x6xbf16>
    %cst_257 = arith.constant dense<0.000000e+00> : vector<1x6xf32>
    %186 = tpu.matmul %184, %185, %cst_257 {dimension_numbers = #tpu.dot_dimension_numbers<[1], [0], [0], [1], [0, 0, 1, 1], [], []>} : vector<1x256xbf16>, vector<256x6xbf16>, vector<1x6xf32> -> vector<1x6xf32>
    %c0_258 = arith.constant 0 : index
    %c0_259 = arith.constant 0 : index
    %187 = vector.load %arg13[%c0_258, %c0_259] : memref<1x6xf32, #tpu.memory_space<vmem>>, vector<1x6xf32>
    %188 = arith.addf %186, %187 : vector<1x6xf32>
    %189 = vector.shape_cast %188 : vector<1x6xf32> to vector<1x1x6xf32>
    %c0_260 = arith.constant 0 : index
    %c0_261 = arith.constant 0 : index
    %c0_262 = arith.constant 0 : index
    %190 = vector.load %arg14[%c0_260, %c0_261, %c0_262] : memref<1x1x6xf32, #tpu.memory_space<vmem>>, vector<1x1x6xf32>
    tpu.vector_store %arg14[%c0_260, %c0_261, %c0_262], %189 {strides = array<i32>} : memref<1x1x6xf32, #tpu.memory_space<vmem>>, vector<1x1x6xf32>,
    return
  }
  func.func @transform_0(%arg0: i32) -> (i32, i32, i32, i32) {
    %c0_i32 = arith.constant 0 : i32
    %c0_i32_0 = arith.constant 0 : i32
    %c0_i32_1 = arith.constant 0 : i32
    %c0_i32_2 = arith.constant 0 : i32
    return %arg0, %c0_i32, %c0_i32_0, %c0_i32_1 : i32, i32, i32, i32
  }
  func.func @transform_1(%arg0: i32) -> (i32, i32, i32) {
    %c0_i32 = arith.constant 0 : i32
    %c0_i32_0 = arith.constant 0 : i32
    %c0_i32_1 = arith.constant 0 : i32
    return %arg0, %c0_i32, %c0_i32_0 : i32, i32, i32
  }
  func.func @transform_2(%arg0: i32) -> (i32, i32) {
    %c0_i32 = arith.constant 0 : i32
    %c0_i32_0 = arith.constant 0 : i32
    %c0_i32_1 = arith.constant 0 : i32
    return %c0_i32, %c0_i32_0 : i32, i32
  }
  func.func @transform_3(%arg0: i32) -> (i32, i32) {
    %c0_i32 = arith.constant 0 : i32
    %c0_i32_0 = arith.constant 0 : i32
    %c0_i32_1 = arith.constant 0 : i32
    return %c0_i32, %c0_i32_0 : i32, i32
  }
  func.func @transform_4(%arg0: i32) -> (i32, i32) {
    %c0_i32 = arith.constant 0 : i32
    %c0_i32_0 = arith.constant 0 : i32
    %c0_i32_1 = arith.constant 0 : i32
    return %c0_i32, %c0_i32_0 : i32, i32
  }
  func.func @transform_5(%arg0: i32) -> (i32, i32) {
    %c0_i32 = arith.constant 0 : i32
    %c0_i32_0 = arith.constant 0 : i32
    %c0_i32_1 = arith.constant 0 : i32
    return %c0_i32, %c0_i32_0 : i32, i32
  }
  func.func @transform_6(%arg0: i32) -> (i32, i32) {
    %c0_i32 = arith.constant 0 : i32
    %c0_i32_0 = arith.constant 0 : i32
    %c0_i32_1 = arith.constant 0 : i32
    return %c0_i32, %c0_i32_0 : i32, i32
  }
  func.func @transform_7(%arg0: i32) -> (i32, i32) {
    %c0_i32 = arith.constant 0 : i32
    %c0_i32_0 = arith.constant 0 : i32
    %c0_i32_1 = arith.constant 0 : i32
    return %c0_i32, %c0_i32_0 : i32, i32
  }
  func.func @transform_8(%arg0: i32) -> (i32, i32) {
    %c0_i32 = arith.constant 0 : i32
    %c0_i32_0 = arith.constant 0 : i32
    %c0_i32_1 = arith.constant 0 : i32
    return %c0_i32, %c0_i32_0 : i32, i32
  }
  func.func @transform_9(%arg0: i32) -> (i32, i32) {
    %c0_i32 = arith.constant 0 : i32
    %c0_i32_0 = arith.constant 0 : i32
    %c0_i32_1 = arith.constant 0 : i32
    return %c0_i32, %c0_i32_0 : i32, i32
  }
  func.func @transform_10(%arg0: i32) -> (i32, i32) {
    %c0_i32 = arith.constant 0 : i32
    %c0_i32_0 = arith.constant 0 : i32
    %c0_i32_1 = arith.constant 0 : i32
    return %c0_i32, %c0_i32_0 : i32, i32
  }
  func.func @transform_11(%arg0: i32) -> (i32, i32) {
    %c0_i32 = arith.constant 0 : i32
    %c0_i32_0 = arith.constant 0 : i32
    %c0_i32_1 = arith.constant 0 : i32
    return %c0_i32, %c0_i32_0 : i32, i32
  }
  func.func @transform_12(%arg0: i32) -> (i32, i32) {
    %c0_i32 = arith.constant 0 : i32
    %c0_i32_0 = arith.constant 0 : i32
    %c0_i32_1 = arith.constant 0 : i32
    return %c0_i32, %c0_i32_0 : i32, i32
  }
  func.func @transform_13(%arg0: i32) -> (i32, i32, i32) {
    %c0_i32 = arith.constant 0 : i32
    %c0_i32_0 = arith.constant 0 : i32
    %c0_i32_1 = arith.constant 0 : i32
    return %arg0, %c0_i32, %c0_i32_0 : i32, i32, i32
  }
}

</mosaic_0001>

<bundles_post_ra>
// kernel: tpu_custom_call.1
= control target key start
LH: loop header
LB: loop body
LE: loop exit
PB: predicated region body
PF: predicated region fallthrough
CT: control target
= control target key end

     0   :  { %s8760_s0 = inlined_call_operand.vmem [shape: f32[2,16,16,4], index: 0, kind: input, shape index: {}]   ;;  %s8761_s1 = inlined_call_operand.vmem [shape: f32[2,1,8], index: 1, kind: input, shape index: {}]   ;;  %s8762_s2 = inlined_call_operand.vmem [shape: bf16[36,32], index: 2, kind: input, shape index: {}]   ;;  %s8763_s3 = inlined_call_operand.vmem [shape: f32[1,32], index: 3, kind: input, shape index: {}]   ;;  %s8764_s4 = inlined_call_operand.vmem [shape: bf16[288,64], index: 4, kind: input, shape index: {}]   ;;  %s8765_s5 = inlined_call_operand.vmem [shape: f32[1,64], index: 5, kind: input, shape index: {}]   ;;  %s8766_s6 = inlined_call_operand.vmem [shape: bf16[576,128], index: 6, kind: input, shape index: {}]   ;;  %s8767_s7 = inlined_call_operand.vmem [shape: f32[1,128], index: 7, kind: input, shape index: {}]   ;;  %s8768_s8 = inlined_call_operand.vmem [shape: bf16[128,256], index: 8, kind: input, shape index: {}]   ;;  %s8769_s9 = inlined_call_operand.vmem [shape: bf16[8,256], index: 9, kind: input, shape index: {}]   ;;  %s8770_s10 = inlined_call_operand.vmem [shape: f32[1,256], index: 10, kind: input, shape index: {}]   ;;  %s8771_s11 = inlined_call_operand.vmem [shape: bf16[256,6], index: 11, kind: input, shape index: {}]   ;;  %s8772_s12 = inlined_call_operand.vmem [shape: f32[1,6], index: 12, kind: input, shape index: {}]   ;;  %s8773_s13 = inlined_call_operand.hbm [shape: f32[2,1,6], index: 13, kind: output, shape index: {}]  }
   0x1   :  { %8790 = sst [smem:[#allocation11_spill]] %s8760_s0 }
   0x2   :  { %8791 = sst [smem:[#allocation12_spill]] %s8762_s2 }
   0x3   :  { %8792 = sst [smem:[#allocation13_spill]] %s8763_s3 }
   0x4   :  { %8793 = sst [smem:[#allocation14_spill]] %s8764_s4 }
   0x5   :  { %18 = vsyncpa [#allocation9], 0 }
   0x6   :  { %20 = vsyncpa [#allocation9 + $0x1], 0  ;;  %s6830_s25 = smov 0   ;;  %s6832_s26 = smov 0  }
   0x7   :  { %s6834_s27 = smov 0   ;;  %s6836_s28 = smov 0  }
   0x8 LB: > { %s6851_s29 = sadd.s32 4294967295, %s6744_s28   ;;  %s6037_s30 = sadd.s32 4294967294, %s6744_s28   ;;  %s6744_s28 = sphi %s6836_s28, %s8811_s28   ;;  %s6740_s27 = sphi %s6834_s27, %s8810_s27   ;;  %s6736_s26 = sphi %s6832_s26, %s8809_s26   ;;  %s6732_s25 = sphi %s6830_s25, %s8808_s25  }
   0x9   : > { %s6855_s14 = sadd.s32 1, %s6744_s28   ;;  %s316_s15 = sadd.s32 1, %s6740_s27 }
   0xa   : > { %s313_s16 = ssub.s32 %s6744_s28, %s6855_s14  ;;  %p326_p0 = scmp.ne.s32.totalorder %s6740_s27, %s6736_s26 }
   0xb   : > { %p314_p1 = scmp.eq.s32.totalorder %s313_s16, 0  ;;  %p327_p2 = scmp.eq.s32.totalorder %s6851_s29, 1 }
   0xc   : > { %p332_p3 = scmp.ne.s32.totalorder %s6736_s26, %s6732_s25  ;;  %p333_p4 = scmp.eq.s32.totalorder %s6037_s30, 1 }
   0xd   : > { %s6866_s17 = scalar_select %p314_p1, %s6740_s27, %s316_s15  }
   0xe   : > { %p6868_p5 = por %p327_p2, %p326_p0  ;;  %p6872_p6 = por %p333_p4, %p332_p3 }
   0xf   : > { %p6040_p7 = scmp.ge.s32.totalorder %s6744_s28, 1  ;;  %p398_p8 = scmp.lt.s32.totalorder %s6744_s28, 3 }
  0x11   : > { %p399_p9 = pnand %p6040_p7, %p398_p8 }
  0x12   : > { %vm453_vm0 = vcmask (!%p399_p9), 31744   ;;  %vm456_vm1 = vcmask (!%p399_p9), 25600   ;;  %vm462_vm2 = vcmask (!%p399_p9), 24576   ;;  %v6746_v0 = vmov (!%p399_p9), 0.0   ;;  %p444_p10 = scmp.lt.s32.totalorder (!%p399_p9), %s6851_s29, 1  ;;  %s8796_s0 = sld [smem:[#allocation11_spill]] (!%p399_p9) }
  0x13   : > { %402 = sbr.rel (%p399_p9) target bundleno = 1934 (0x78e), region = 72  ;;  %454 = vst.msk [vmem:[#allocation2] sm:$0xff] (!%p399_p9), %vm453_vm0, %v6746_v0  ;;  %455 = vst.msk [vmem:[#allocation2 + $0x8] sm:$0xff] (!%p399_p9), %vm453_vm0, %v6746_v0  ;;  %s8782_s30 = smov (!%p399_p9), 4   ;;  %vm1753_vm3 = vcmask (!%p399_p9), 1041408   ;;  %vm740_vm4 = vcmask (!%p399_p9), 64544  }
  0x14   : > { %457 = vst.msk [vmem:[#allocation2 + $0x10] sm:$0x3] (!%p399_p9), %vm456_vm1, %v6746_v0  ;;  %461 = vst.msk [vmem:[#allocation2 + $0x1a8] sm:$0x3] (!%p399_p9), %vm456_vm1, %v6746_v0  ;;  %s8780_s15 = smov (!%p399_p9), 8   ;;  %s8776_s16 = smov (!%p399_p9), 12  }
  0x15   : > { %459 = vst.msk [vmem:[#allocation2 + $0x198] sm:$0xff] (!%p399_p9), %vm453_vm0, %v6746_v0  ;;  %460 = vst.msk [vmem:[#allocation2 + $0x1a0] sm:$0xff] (!%p399_p9), %vm453_vm0, %v6746_v0  ;;  %s8778_s22 = smov (!%p399_p9), 20   ;;  %s8797_s2 = sld [smem:[#allocation12_spill]] (!%p399_p9)  ;;  %vm869_vm5 = vcmask (!%p399_p9), 97344   ;;  %vm998_vm6 = vcmask (!%p399_p9), 130144  }
  0x16   : > { %464 = vst.msk [vmem:[#allocation2 + $0x18] sm:$0x1] (!%p399_p9), %vm462_vm2, %v6746_v0  ;;  %465 = vst.msk [vmem:[#allocation2 + $0x30] sm:$0x1] (!%p399_p9), %vm462_vm2, %v6746_v0  ;;  %s8799_s23 = smov (!%p399_p9), 12   ;;  %vm1127_vm7 = vcmask (!%p399_p9), 162944  }
  0x17   : > { %466 = vst.msk [vmem:[#allocation2 + $0x48] sm:$0x1] (!%p399_p9), %vm462_vm2, %v6746_v0  ;;  %467 = vst.msk [vmem:[#allocation2 + $0x60] sm:$0x1] (!%p399_p9), %vm462_vm2, %v6746_v0  ;;  %vm1256_vm8 = vcmask (!%p399_p9), 195744   ;;  %vm1386_vm9 = vcmask (!%p399_p9), 228544  }
  0x18   : > { %468 = vst.msk [vmem:[#allocation2 + $0x78] sm:$0x1] (!%p399_p9), %vm462_vm2, %v6746_v0  ;;  %469 = vst.msk [vmem:[#allocation2 + $0x90] sm:$0x1] (!%p399_p9), %vm462_vm2, %v6746_v0  ;;  %vm1515_vm10 = vcmask (!%p399_p9), 261344   ;;  %vm1644_vm11 = vcmask (!%p399_p9), 294144  }
  0x19   : > { %470 = vst.msk [vmem:[#allocation2 + $0xa8] sm:$0x1] (!%p399_p9), %vm462_vm2, %v6746_v0  ;;  %471 = vst.msk [vmem:[#allocation2 + $0xc0] sm:$0x1] (!%p399_p9), %vm462_vm2, %v6746_v0  ;;  %vm1704_vm12 = vcmask (!%p399_p9), 293888   ;;  %vm1950_vm13 = vcmask (!%p399_p9), 261120  }
  0x1a   : > { %472 = vst.msk [vmem:[#allocation2 + $0xd8] sm:$0x1] %vm462_vm2, %v6746_v0  ;;  %473 = vst.msk [vmem:[#allocation2 + $0xf0] sm:$0x1] %vm462_vm2, %v6746_v0  ;;  %s6962_s20 = scalar_select %p444_p10, %s6851_s29, 1  ;;  %v628_v4 = vld [vmem:[#allocation2 + $0x1] sm:$0xff] }
  0x1b   : > { %474 = vst.msk [vmem:[#allocation2 + $0x108] sm:$0x1] %vm462_vm2, %v6746_v0  ;;  %475 = vst.msk [vmem:[#allocation2 + $0x120] sm:$0x1] %vm462_vm2, %v6746_v0  ;;  %v629_v5 = vld [vmem:[#allocation2 + $0x9] sm:$0xff]  ;;  %vm1953_vm14 = vcmask 254976  }
  0x1c   : > { %476 = vst.msk [vmem:[#allocation2 + $0x138] sm:$0x1] %vm462_vm2, %v6746_v0  ;;  %477 = vst.msk [vmem:[#allocation2 + $0x150] sm:$0x1] %vm462_vm2, %v6746_v0  ;;  %s6178_s21 = sshll.u32 %s6962_s20, 8  ;;  %v757_v6 = vld [vmem:[#allocation2 + $0x2] sm:$0xff]  ;;  %v660_v7 = vpack.c.bf16 %v629_v5, %v628_v4 }
  0x1d   : > { %478 = vst.msk [vmem:[#allocation2 + $0x168] sm:$0x1] %vm462_vm2, %v6746_v0  ;;  %479 = vst.msk [vmem:[#allocation2 + $0x180] sm:$0x1] %vm462_vm2, %v6746_v0  ;;  %s6968_s24 = scalar_lea.vmem %s8796_s0, %s6178_s21  ;;  %v565_v23 = vld [vmem:[#allocation2 + $0x8] sm:$0xff]  ;;  %s8774_s21 = smov 16  }
  0x1e   : > { %482 = vst.msk [vmem:[#allocation2 + $0x29] sm:$0x1] %vm462_vm2, %v6746_v0  ;;  %483 = vst.msk [vmem:[#allocation2 + $0x41] sm:$0x1] %vm462_vm2, %v6746_v0  ;;  %v499_v1 = vld [vmem:[%s6968_s24] sm:$0xff]  ;;  %v500_v2 = vld [vmem:[%s6968_s24 + $0x8] sm:$0xff]  ;;  %692 = vrot.lane.b32.xlu0 %v660_v7, %s8782_s30 }
  0x1f   : > { %484 = vst.msk [vmem:[#allocation2 + $0x59] sm:$0x1] %vm462_vm2, %v6746_v0  ;;  %485 = vst.msk [vmem:[#allocation2 + $0x71] sm:$0x1] %vm462_vm2, %v6746_v0  ;;  %v501_v3 = vld [vmem:[%s6968_s24 + $0x10] sm:$0xff]  ;;  %v502_v9 = vld [vmem:[%s6968_s24 + $0x18] sm:$0xff] }
  0x20   : > { %486 = vst.msk [vmem:[#allocation2 + $0x89] sm:$0x1] %vm462_vm2, %v6746_v0  ;;  %487 = vst.msk [vmem:[#allocation2 + $0xa1] sm:$0x1] %vm462_vm2, %v6746_v0  ;;  %v503_v10 = vld [vmem:[%s6968_s24 + $0x20] sm:$0xff]  ;;  %v504_v12 = vld [vmem:[%s6968_s24 + $0x28] sm:$0xff] }
  0x21   : > { %488 = vst.msk [vmem:[#allocation2 + $0xb9] sm:$0x1] %vm462_vm2, %v6746_v0  ;;  %489 = vst.msk [vmem:[#allocation2 + $0xd1] sm:$0x1] %vm462_vm2, %v6746_v0  ;;  %v505_v13 = vld [vmem:[%s6968_s24 + $0x30] sm:$0xff]  ;;  %v506_v14 = vld [vmem:[%s6968_s24 + $0x38] sm:$0xff] }
  0x22   : > { %490 = vst.msk [vmem:[#allocation2 + $0xe9] sm:$0x1] %vm462_vm2, %v6746_v0  ;;  %491 = vst.msk [vmem:[#allocation2 + $0x101] sm:$0x1] %vm462_vm2, %v6746_v0  ;;  %v507_v15 = vld [vmem:[%s6968_s24 + $0x40] sm:$0xff]  ;;  %v508_v16 = vld [vmem:[%s6968_s24 + $0x48] sm:$0xff] }
  0x23   : > { %492 = vst.msk [vmem:[#allocation2 + $0x119] sm:$0x1] %vm462_vm2, %v6746_v0  ;;  %493 = vst.msk [vmem:[#allocation2 + $0x131] sm:$0x1] %vm462_vm2, %v6746_v0  ;;  %v509_v17 = vld [vmem:[%s6968_s24 + $0x50] sm:$0xff]  ;;  %v510_v18 = vld [vmem:[%s6968_s24 + $0x58] sm:$0xff] }
  0x24   : > { %494 = vst.msk [vmem:[#allocation2 + $0x149] sm:$0x1] %vm462_vm2, %v6746_v0  ;;  %495 = vst.msk [vmem:[#allocation2 + $0x161] sm:$0x1] %vm462_vm2, %v6746_v0  ;;  %v511_v19 = vld [vmem:[%s6968_s24 + $0x60] sm:$0xff]  ;;  %v512_v20 = vld [vmem:[%s6968_s24 + $0x68] sm:$0xff] }
  0x25   : > { %496 = vst.msk [vmem:[#allocation2 + $0x179] sm:$0x1] %vm462_vm2, %v6746_v0  ;;  %497 = vst.msk [vmem:[#allocation2 + $0x191] sm:$0x1] %vm462_vm2, %v6746_v0  ;;  %v513_v21 = vld [vmem:[%s6968_s24 + $0x70] sm:$0xff]  ;;  %v514_v22 = vld [vmem:[%s6968_s24 + $0x78] sm:$0xff] }
  0x26   : > { %498 = vst.msk [vmem:[#allocation2 + $0x1a9] sm:$0x1] %vm462_vm2, %v6746_v0  ;;  %463 = vst.msk [vmem:[#allocation2] sm:$0x1] %vm462_vm2, %v6746_v0  ;;  %v515_v25 = vld [vmem:[%s6968_s24 + $0x80] sm:$0xff]  ;;  %v516_v26 = vld [vmem:[%s6968_s24 + $0x88] sm:$0xff] }
  0x27   : > { %481 = vst.msk [vmem:[#allocation2 + $0x11] sm:$0x1] %vm462_vm2, %v6746_v0  ;;  %480 = vst.msk [vmem:[#allocation2 + $0x198] sm:$0x1] %vm462_vm2, %v6746_v0  ;;  %v518_v7 = vld [vmem:[%s6968_s24 + $0x98] sm:$0xff]  ;;  %s8802_s0 = smov 32  }
  0x28   : > { %532 = vst.msk [vmem:[#allocation2 + $0x19] sm:$0xff] %vm453_vm0, %v499_v1  ;;  %533 = vst.msk [vmem:[#allocation2 + $0x21] sm:$0xff] %vm453_vm0, %v500_v2  ;;  %vm1959_vm15 = vcmask 253952   ;;  %s8806_s4 = sld [smem:[#allocation14_spill]]  ;;  %s8807_s3 = sld [smem:[#allocation13_spill]]  ;;  %vm2334_vm1 = vcmask 785920  }
  0x29   : > { %534 = vst.msk [vmem:[#allocation2 + $0x31] sm:$0xff] %vm453_vm0, %v501_v3  ;;  %535 = vst.msk [vmem:[#allocation2 + $0x39] sm:$0xff] %vm453_vm0, %v502_v9  ;;  %vm2463_vm2 = vcmask 1048320  }
  0x2a   : > { %536 = vst.msk [vmem:[#allocation2 + $0x49] sm:$0xff] %vm453_vm0, %v503_v10  ;;  %537 = vst.msk [vmem:[#allocation2 + $0x51] sm:$0xff] %vm453_vm0, %v504_v12  ;;  %v6582_v10 = vld [vmem:[%s8797_s2 + $0x8] sm:$0xff]  }
  0x2b   : > { %538 = vst.msk [vmem:[#allocation2 + $0x61] sm:$0xff] %vm453_vm0, %v505_v13  ;;  %539 = vst.msk [vmem:[#allocation2 + $0x69] sm:$0xff] %vm453_vm0, %v506_v14  ;;  %v6583_v13 = vld [vmem:[%s8797_s2 + $0x10] ss:$0 sps:$4 sm:$0x33]   ;;  %v520_v14 = vld [vmem:[%s6968_s24 + $0xa8] sm:$0xff] }
  0x2c   : > { %540 = vst.msk [vmem:[#allocation2 + $0x79] sm:$0xff] %vm453_vm0, %v507_v15  ;;  %541 = vst.msk [vmem:[#allocation2 + $0x81] sm:$0xff] %vm453_vm0, %v508_v16 }
  0x2d   : > { %542 = vst.msk [vmem:[#allocation2 + $0x91] sm:$0xff] %vm453_vm0, %v509_v17  ;;  %543 = vst.msk [vmem:[#allocation2 + $0x99] sm:$0xff] %vm453_vm0, %v510_v18  ;;  %v564_v24 = vld [vmem:[#allocation2] sm:$0xff] }
  0x2e   : > { %v758_v8 = vld [vmem:[#allocation2 + $0xa] sm:$0xff]  ;;  %544 = vst.msk [vmem:[#allocation2 + $0xa9] sm:$0xff] %vm453_vm0, %v511_v19  ;;  %545 = vst.msk [vmem:[#allocation2 + $0xb1] sm:$0xff] %vm453_vm0, %v512_v20  ;;  %v596_v30 = vpack.c.bf16 %v565_v23, %v564_v24  ;;  %v1755_v19 = vsel %vm1753_vm3, %v6583_v13, 0 }
  0x2f   : > { %v789_v11 = vpack.c.bf16 %v758_v8, %v757_v6  ;;  %546 = vst.msk [vmem:[#allocation2 + $0xc1] sm:$0xff] %vm453_vm0, %v513_v21  ;;  %547 = vst.msk [vmem:[#allocation2 + $0xc9] sm:$0xff] %vm453_vm0, %v514_v22  ;;  %v630_v27 = vld [vmem:[#allocation2 + $0x19] sm:$0xff]  ;;  %v631_v28 = vld [vmem:[#allocation2 + $0x21] sm:$0xff] }
  0x30   : > { %v759_v29 = vld [vmem:[#allocation2 + $0x1a] sm:$0xff]  ;;  %548 = vst.msk [vmem:[#allocation2 + $0xd9] sm:$0xff] %vm453_vm0, %v515_v25  ;;  %549 = vst.msk [vmem:[#allocation2 + $0xe1] sm:$0xff] %vm453_vm0, %v516_v26  ;;  %v661_v31 = vpack.c.bf16 %v631_v28, %v630_v27  ;;  %v760_v32 = vld [vmem:[#allocation2 + $0x22] sm:$0xff] }
  0x31   : > { %821 = vrot.lane.b32.xlu1 %v789_v11, %s8780_s15  ;;  %v886_v33 = vld [vmem:[#allocation2 + $0x18] sm:$0xff]  ;;  %v887_v34 = vld [vmem:[#allocation2 + $0x20] sm:$0xff]  ;;  %v790_v35 = vpack.c.bf16 %v760_v32, %v759_v29  ;;  %v888_v37 = vld [vmem:[#allocation2 + $0x30] sm:$0xff]  ;;  %612 = vst.msk [vmem:[#allocation5] sm:$0xff] %vm453_vm0, %v596_v30 }
  0x32   : > { %v918_v36 = vpack.c.bf16 %v887_v34, %v886_v33  ;;  %v889_v38 = vld [vmem:[#allocation2 + $0x38] sm:$0xff]  ;;  %694 = vrot.lane.b32.xlu0 %v661_v31, %s8782_s30  ;;  %v1276_v40 = vld [vmem:[#allocation2 + $0x48] sm:$0xff]  ;;  %v1277_v41 = vld [vmem:[#allocation2 + $0x50] sm:$0xff]  ;;  %551 = vst.msk [vmem:[#allocation2 + $0xf9] sm:$0xff] %vm453_vm0, %v518_v7 }
  0x33   : > { %v919_v39 = vpack.c.bf16 %v889_v38, %v888_v37  ;;  %v1017_v42 = vld [vmem:[#allocation2 + $0x31] sm:$0xff]  ;;  %v1018_v43 = vld [vmem:[#allocation2 + $0x39] sm:$0xff]  ;;  %v7012_v44 = vpack.c.bf16 %v1277_v41, %v1276_v40  ;;  %v893_v46 = vld [vmem:[#allocation2 + $0x68] sm:$0xff]  ;;  %553 = vst.msk [vmem:[#allocation2 + $0x111] sm:$0xff] %vm453_vm0, %v520_v14 }
  0x34   : > { %613 = vst.msk [vmem:[#allocation5 + $0x8] sm:$0xff] %vm453_vm0, %v918_v36  ;;  %v892_v45 = vld [vmem:[#allocation2 + $0x60] sm:$0xff]  ;;  %v7021_v48 = vpack.c.bf16 %v1018_v43, %v1017_v42  ;;  %v1280_v49 = vld [vmem:[#allocation2 + $0x78] sm:$0xff]  ;;  %v896_v54 = vld [vmem:[#allocation2 + $0x90] sm:$0xff] }
  0x35   : > { %823 = vrot.lane.b32.xlu1 %v790_v35, %s8780_s15  ;;  %614 = vst.msk [vmem:[#allocation5 + $0x10] sm:$0xff] %vm453_vm0, %v919_v39  ;;  %v7016_v47 = vpack.c.bf16 %v893_v46, %v892_v45  ;;  %615 = vst.msk [vmem:[#allocation5 + $0x18] sm:$0xff] %vm453_vm0, %v7012_v44  ;;  %v1281_v50 = vld [vmem:[#allocation2 + $0x80] sm:$0xff]  ;;  %v1146_v51 = vld [vmem:[#allocation2 + $0x32] sm:$0xff]  ;;  %s8788_s15 = smov 28  }
  0x36   : > { %950 = vrot.lane.b32.xlu0 %v918_v36, %s8776_s16  ;;  %v1147_v52 = vld [vmem:[#allocation2 + $0x3a] sm:$0xff]  ;;  %v7023_v53 = vpack.c.bf16 %v1281_v50, %v1280_v49  ;;  %v1284_v58 = vld [vmem:[#allocation2 + $0xa8] sm:$0xff]  ;;  %v1285_v59 = vld [vmem:[#allocation2 + $0xb0] sm:$0xff]  ;;  %1951 = vst.msk [vmem:[#allocation3] sm:$0xff] %vm1950_vm13, %v6746_v0 }
  0x37   : > { %616 = vst.msk [vmem:[#allocation5 + $0x20] sm:$0xff] %vm453_vm0, %v7016_v47  ;;  %v897_v55 = vld [vmem:[#allocation2 + $0x98] sm:$0xff]  ;;  %v7034_v57 = vpack.c.bf16 %v1147_v52, %v1146_v51  ;;  %v7036_v60 = vpack.c.bf16 %v1285_v59, %v1284_v58  ;;  %v900_v61 = vld [vmem:[#allocation2 + $0xc0] sm:$0xff]  ;;  %v901_v62 = vld [vmem:[#allocation2 + $0xc8] sm:$0xff] }
  0x38   : > { %v7028_v56 = vpack.c.bf16 %v897_v55, %v896_v54  ;;  %617 = vst.msk [vmem:[#allocation5 + $0x28] sm:$0xff] %vm453_vm0, %v7023_v53  ;;  %v7041_v63 = vpack.c.bf16 %v901_v62, %v900_v61  ;;  %v1288_v1 = vld [vmem:[#allocation2 + $0xd8] sm:$0xff]  ;;  %v1289_v2 = vld [vmem:[#allocation2 + $0xe0] sm:$0xff]  ;;  %v1405_v3 = vld [vmem:[#allocation2 + $0x49] sm:$0xff] }
  0x39   : > { %952 = vrot.lane.b32.xlu1 %v919_v39, %s8776_s16  ;;  %619 = vst.msk [vmem:[#allocation5 + $0x38] sm:$0xff] %vm453_vm0, %v7036_v60  ;;  %v1406_v4 = vld [vmem:[#allocation2 + $0x51] sm:$0xff]  ;;  %v7047_v5 = vpack.c.bf16 %v1289_v2, %v1288_v1  ;;  %v6581_v8 = vld [vmem:[%s8797_s2] sm:$0xff]   ;;  %s8786_s16 = smov 24   ;;  %v1022_v27 = vld [vmem:[#allocation2 + $0x69] sm:$0xff]  ;;  %s8805_s2 = smov 28  }
  0x3a   : > { %1079 = vrot.lane.b32.xlu0 %v661_v31, %s8774_s21  ;;  %618 = vst.msk [vmem:[#allocation5 + $0x30] sm:$0xff] %vm453_vm0, %v7028_v56  ;;  %620 = vst.msk [vmem:[#allocation5 + $0x40] sm:$0xff] %vm453_vm0, %v7041_v63  ;;  %v517_v6 = vld [vmem:[%s6968_s24 + $0x90] sm:$0xff]  ;;  %v519_v11 = vld [vmem:[%s6968_s24 + $0xa0] sm:$0xff]  ;;  %v1436_v12 = vpack.c.bf16 %v1406_v4, %v1405_v3  ;;  %6438 = vmatprep.subr.bf16.mxu0 %v6581_v8 }
  0x3b   : > { %v1534_v9 = vld [vmem:[#allocation2 + $0x4a] sm:$0xff]  ;;  %550 = vst.msk [vmem:[#allocation2 + $0xf1] sm:$0xff] %vm453_vm0, %v517_v6  ;;  %621 = vst.msk [vmem:[#allocation5 + $0x48] sm:$0xff] %vm453_vm0, %v7047_v5  ;;  %v1535_v15 = vld [vmem:[#allocation2 + $0x52] sm:$0xff]  ;;  %6439 = vmatpush3.bf16.msra.mxu0 %v6581_v8 }
  0x3c   : > { %552 = vst.msk [vmem:[#allocation2 + $0x109] sm:$0xff] %vm453_vm0, %v519_v11  ;;  %6440 = vmatprep.subr.bf16.mxu0 %v6582_v10  ;;  %v1565_v16 = vpack.c.bf16 %v1535_v15, %v1534_v9  ;;  %v521_v24 = vld [vmem:[%s6968_s24 + $0xb0] sm:$0xff]  ;;  %v522_v25 = vld [vmem:[%s6968_s24 + $0xb8] sm:$0xff]  ;;  %v1021_v26 = vld [vmem:[#allocation2 + $0x61] sm:$0xff] }
  0x3d   : > { %1081 = vrot.lane.b32.xlu1 %v7021_v48, %s8774_s21  ;;  %554 = vst.msk [vmem:[#allocation2 + $0x121] sm:$0xff] %vm453_vm0, %v521_v24  ;;  %555 = vst.msk [vmem:[#allocation2 + $0x129] sm:$0xff] %vm453_vm0, %v522_v25  ;;  %s8798_s21 = smov 8   ;;  %v1050_v31 = vpack.c.bf16 %v1022_v27, %v1021_v26  ;;  %v1150_v32 = vld [vmem:[#allocation2 + $0x62] sm:$0xff]  ;;  %v1151_v33 = vld [vmem:[#allocation2 + $0x6a] sm:$0xff] }
  0x3e   : > { %1208 = vrot.lane.b32.xlu0 %v790_v35, %s8778_s22  ;;  %v523_v34 = vld [vmem:[%s6968_s24 + $0xc0] sm:$0xff]  ;;  %v524_v35 = vld [vmem:[%s6968_s24 + $0xc8] sm:$0xff]  ;;  %v1179_v36 = vpack.c.bf16 %v1151_v33, %v1150_v32  ;;  %v525_v46 = vld [vmem:[%s6968_s24 + $0xd0] sm:$0xff]  ;;  %1952 = vst.msk [vmem:[#allocation3 + $0x8] sm:$0xff] %vm1950_vm13, %v6746_v0 }
  0x3f   : > { %6441 = vmatpush3.bf16.msra.mxu0 %v6582_v10  ;;  %556 = vst.msk [vmem:[#allocation2 + $0x139] sm:$0xff] %vm453_vm0, %v523_v34  ;;  %557 = vst.msk [vmem:[#allocation2 + $0x141] sm:$0xff] %vm453_vm0, %v524_v35  ;;  %v1409_v37 = vld [vmem:[#allocation2 + $0x79] sm:$0xff]  ;;  %v1410_v38 = vld [vmem:[#allocation2 + $0x81] sm:$0xff] }
  0x40   : > { %6528 = vmatprep.subr.msk.bf16.mxu0 %vm1753_vm3, %v6583_v13  ;;  %v1438_v42 = vpack.c.bf16 %v1410_v38, %v1409_v37  ;;  %v1538_v43 = vld [vmem:[#allocation2 + $0x7a] sm:$0xff]  ;;  %558 = vst.msk [vmem:[#allocation2 + $0x151] sm:$0xff] %vm453_vm0, %v525_v46  ;;  %v1154_v55 = vld [vmem:[#allocation2 + $0x92] sm:$0xff]  ;;  %v528_v59 = vld [vmem:[%s6968_s24 + $0xe8] sm:$0xff] }
  0x41   : > { %1210 = vrot.lane.b32.xlu1 %v7034_v57, %s8778_s22  ;;  %s8784_s22 = smov 32   ;;  %v1026_v49 = vld [vmem:[#allocation2 + $0x99] sm:$0xff]  ;;  %561 = vst.msk [vmem:[#allocation2 + $0x171] sm:$0xff] %vm453_vm0, %v528_v59  ;;  %v1413_v61 = vld [vmem:[#allocation2 + $0xa9] sm:$0xff]  ;;  %v1414_v62 = vld [vmem:[#allocation2 + $0xb1] sm:$0xff] }
  0x42   : > { %1338 = vrot.lane.b32.xlu0 %v919_v39, %s8786_s16  ;;  %v904_v17 = vld [vmem:[#allocation2 + $0xf0] sm:$0xff]  ;;  %v905_v18 = vld [vmem:[#allocation2 + $0xf8] sm:$0xff]  ;;  %v527_v58 = vld [vmem:[%s6968_s24 + $0xe0] sm:$0xff]  ;;  %v1440_v4 = vpack.c.bf16 %v1414_v62, %v1413_v61  ;;  %1956 = vst.msk [vmem:[#allocation3 + $0x198] sm:$0xff] %vm1950_vm13, %v6746_v0 }
  0x43   : > { %v7080_v20 = vpack.c.bf16 %v905_v18, %v904_v17  ;;  %v1292_v21 = vld [vmem:[#allocation2 + $0x108] sm:$0xff]  ;;  %v1293_v22 = vld [vmem:[#allocation2 + $0x110] sm:$0xff]  ;;  %6443 = vmatpush3.bf16.msra.mxu0 %v1755_v19  ;;  %560 = vst.msk [vmem:[#allocation2 + $0x169] sm:$0xff] %vm453_vm0, %v527_v58  ;;  %v530_v9 = vld [vmem:[%s6968_s24 + $0xf8] sm:$0xff] }
  0x44   : > { %v7083_v23 = vpack.c.bf16 %v1293_v22, %v1292_v21  ;;  %v908_v28 = vld [vmem:[#allocation2 + $0x120] sm:$0xff]  ;;  %v909_v29 = vld [vmem:[#allocation2 + $0x128] sm:$0xff]  ;;  %v1543_v7 = vld [vmem:[#allocation2 + $0xb2] sm:$0xff]  ;;  %563 = vst.msk [vmem:[#allocation2 + $0x189] sm:$0xff] %vm453_vm0, %v530_v9 }
  0x45   : > { %1340 = vrot.lane.b32.xlu1 %v7012_v44, %s8786_s16  ;;  %622 = vst.msk [vmem:[#allocation5 + $0x50] sm:$0xff] %vm453_vm0, %v7080_v20  ;;  %v7101_v30 = vpack.c.bf16 %v909_v29, %v908_v28  ;;  %v1542_v6 = vld [vmem:[#allocation2 + $0xaa] sm:$0xff]  ;;  %v1029_v10 = vld [vmem:[#allocation2 + $0xc1] sm:$0xff]  ;;  %v1034_v35 = vld [vmem:[#allocation2 + $0xf9] sm:$0xff] }
  0x46   : > { %1467 = vrot.lane.b32.xlu0 %v7021_v48, %s8788_s15  ;;  %623 = vst.msk [vmem:[#allocation5 + $0x58] sm:$0xff] %vm453_vm0, %v7083_v23  ;;  %v1296_v39 = vld [vmem:[#allocation2 + $0x138] sm:$0xff]  ;;  %v1297_v40 = vld [vmem:[#allocation2 + $0x140] sm:$0xff]  ;;  %v1569_v8 = vpack.c.bf16 %v1543_v7, %v1542_v6  ;;  %v1030_v11 = vld [vmem:[#allocation2 + $0xc9] sm:$0xff] }
  0x47   : > { %624 = vst.msk [vmem:[#allocation5 + $0x60] sm:$0xff] %vm453_vm0, %v7101_v30  ;;  %v7117_v41 = vpack.c.bf16 %v1297_v40, %v1296_v39  ;;  %v912_v50 = vld [vmem:[#allocation2 + $0x150] sm:$0xff]  ;;  %v1158_v13 = vld [vmem:[#allocation2 + $0xc2] sm:$0xff]  ;;  %v1546_v22 = vld [vmem:[#allocation2 + $0xda] sm:$0xff] }
  0x48   : > { %v1159_v14 = vld [vmem:[#allocation2 + $0xca] sm:$0xff]  ;;  %v1418_v18 = vld [vmem:[#allocation2 + $0xe1] sm:$0xff]  ;;  %v1162_v39 = vld [vmem:[#allocation2 + $0xf2] sm:$0xff]  ;;  %1957 = vst.msk [vmem:[#allocation3 + $0x1a0] sm:$0xff] %vm1950_vm13, %v6746_v0 }
  0x49   : > { %1469 = vrot.lane.b32.xlu1 %v1436_v12, %s8788_s15  ;;  %625 = vst.msk [vmem:[#allocation5 + $0x68] sm:$0xff] %vm453_vm0, %v7117_v41  ;;  %v1183_v15 = vpack.c.bf16 %v1159_v14, %v1158_v13  ;;  %v1547_v24 = vld [vmem:[#allocation2 + $0xe2] sm:$0xff]  ;;  %v1033_v34 = vld [vmem:[#allocation2 + $0xf1] sm:$0xff]  ;;  %v1163_v40 = vld [vmem:[#allocation2 + $0xfa] sm:$0xff] }
  0x4a   : > { %1596 = vrot.lane.b32.xlu0 %v7034_v57, %s8784_s22  ;;  %v1300_v1 = vld [vmem:[#allocation2 + $0x168] sm:$0xff]  ;;  %v1301_v2 = vld [vmem:[#allocation2 + $0x170] sm:$0xff]  ;;  %v1571_v26 = vpack.c.bf16 %v1547_v24, %v1546_v22  ;;  %v1056_v37 = vpack.c.bf16 %v1034_v35, %v1033_v34  ;;  %v1554_v22 = vld [vmem:[#allocation2 + $0x13a] sm:$0xff]  ;;  %1954 = vst.msk [vmem:[#allocation3 + $0x10] sm:$0x3] %vm1953_vm14, %v6746_v0 }
  0x4b   : > { %v7153_v3 = vpack.c.bf16 %v1301_v2, %v1300_v1  ;;  %v1421_v46 = vld [vmem:[#allocation2 + $0x109] sm:$0xff]  ;;  %v1037_v6 = vld [vmem:[#allocation2 + $0x121] sm:$0xff]  ;;  %v1041_v34 = vld [vmem:[#allocation2 + $0x151] sm:$0xff]  ;;  %1958 = vst.msk [vmem:[#allocation3 + $0x1a8] sm:$0x3] %vm1953_vm14, %v6746_v0  ;;  %vm4658_vm14 = vcmask 1048064  }
  0x4c   : > { %v1038_v7 = vld [vmem:[#allocation2 + $0x129] sm:$0xff]  ;;  %1980 = vst.msk [vmem:[#allocation3 + $0x41] sm:$0x1] %vm1959_vm15, %v6746_v0  ;;  %1960 = vst.msk [vmem:[#allocation3] sm:$0x1] %vm1959_vm15, %v6746_v0 }
  0x4d   : > { %1598 = vrot.lane.b32.xlu1 %v1565_v16, %s8784_s22  ;;  %s8801_s22 = smov 20   ;;  %627 = vst.msk [vmem:[#allocation5 + $0x78] sm:$0xff] %vm453_vm0, %v7153_v3  ;;  %v1555_v24 = vld [vmem:[#allocation2 + $0x142] sm:$0xff] }
  0x4e   : > { %696 = vrot.lane.b32.xlu0 %v7021_v48, %s8782_s30  ;;  %v1025_v48 = vld [vmem:[#allocation2 + $0x91] sm:$0xff]  ;;  %1961 = vst.msk [vmem:[#allocation3 + $0x18] sm:$0x1] %vm1959_vm15, %v6746_v0  ;;  %1962 = vst.msk [vmem:[#allocation3 + $0x30] sm:$0x1] %vm1959_vm15, %v6746_v0 }
  0x4f   : > { %v1052_v54 = vpack.c.bf16 %v1026_v49, %v1025_v48  ;;  %1963 = vst.msk [vmem:[#allocation3 + $0x48] sm:$0x1] %vm1959_vm15, %v6746_v0  ;;  %1964 = vst.msk [vmem:[#allocation3 + $0x60] sm:$0x1] %vm1959_vm15, %v6746_v0 }
  0x50   : > { %1965 = vst.msk [vmem:[#allocation3 + $0x78] sm:$0x1] %vm1959_vm15, %v6746_v0  ;;  %1966 = vst.msk [vmem:[#allocation3 + $0x90] sm:$0x1] %vm1959_vm15, %v6746_v0 }
  0x51   : > { %698 = vrot.lane.b32.xlu1 %v1436_v12, %s8782_s30  ;;  %s8800_s30 = smov 16   ;;  %1967 = vst.msk [vmem:[#allocation3 + $0xa8] sm:$0x1] %vm1959_vm15, %v6746_v0  ;;  %1968 = vst.msk [vmem:[#allocation3 + $0xc0] sm:$0x1] %vm1959_vm15, %v6746_v0 }
  0x52   : > { %825 = vrot.lane.b32.xlu0 %v7034_v57, %s8798_s21  ;;  %v1155_v57 = vld [vmem:[#allocation2 + $0x9a] sm:$0xff]  ;;  %1969 = vst.msk [vmem:[#allocation3 + $0xd8] sm:$0x1] %vm1959_vm15, %v6746_v0  ;;  %1970 = vst.msk [vmem:[#allocation3 + $0xf0] sm:$0x1] %vm1959_vm15, %v6746_v0 }
  0x53   : > { %1971 = vst.msk [vmem:[#allocation3 + $0x108] sm:$0x1] %vm1959_vm15, %v6746_v0  ;;  %1972 = vst.msk [vmem:[#allocation3 + $0x120] sm:$0x1] %vm1959_vm15, %v6746_v0 }
  0x54   : > { %1973 = vst.msk [vmem:[#allocation3 + $0x138] sm:$0x1] %vm1959_vm15, %v6746_v0  ;;  %1974 = vst.msk [vmem:[#allocation3 + $0x150] sm:$0x1] %vm1959_vm15, %v6746_v0 }
  0x55   : > { %827 = vrot.lane.b32.xlu1 %v1565_v16, %s8798_s21  ;;  %1975 = vst.msk [vmem:[#allocation3 + $0x168] sm:$0x1] %vm1959_vm15, %v6746_v0  ;;  %1976 = vst.msk [vmem:[#allocation3 + $0x180] sm:$0x1] %vm1959_vm15, %v6746_v0 }
  0x56   : > { %954 = vrot.lane.b32.xlu0 %v7012_v44, %s8799_s23  ;;  %v1539_v44 = vld [vmem:[#allocation2 + $0x82] sm:$0xff]  ;;  %1977 = vst.msk [vmem:[#allocation3 + $0x198] sm:$0x1] %vm1959_vm15, %v6746_v0  ;;  %1979 = vst.msk [vmem:[#allocation3 + $0x29] sm:$0x1] %vm1959_vm15, %v6746_v0 }
  0x57   : > { %v1567_v45 = vpack.c.bf16 %v1539_v44, %v1538_v43  ;;  %v1185_v43 = vpack.c.bf16 %v1163_v40, %v1162_v39  ;;  %1981 = vst.msk [vmem:[#allocation3 + $0x59] sm:$0x1] %vm1959_vm15, %v6746_v0  ;;  %1982 = vst.msk [vmem:[#allocation3 + $0x71] sm:$0x1] %vm1959_vm15, %v6746_v0 }
  0x58   : > { %1983 = vst.msk [vmem:[#allocation3 + $0x89] sm:$0x1] %vm1959_vm15, %v6746_v0  ;;  %1984 = vst.msk [vmem:[#allocation3 + $0xa1] sm:$0x1] %vm1959_vm15, %v6746_v0 }
  0x59   : > { %956 = vrot.lane.b32.xlu1 %v7016_v47, %s8799_s23  ;;  %1985 = vst.msk [vmem:[#allocation3 + $0xb9] sm:$0x1] %vm1959_vm15, %v6746_v0  ;;  %1986 = vst.msk [vmem:[#allocation3 + $0xd1] sm:$0x1] %vm1959_vm15, %v6746_v0 }
  0x5a   : > { %1083 = vrot.lane.b32.xlu0 %v1436_v12, %s8800_s30  ;;  %v1054_v12 = vpack.c.bf16 %v1030_v11, %v1029_v10  ;;  %v1166_v10 = vld [vmem:[#allocation2 + $0x122] sm:$0xff]  ;;  %v1167_v11 = vld [vmem:[#allocation2 + $0x12a] sm:$0xff]  ;;  %1987 = vst.msk [vmem:[#allocation3 + $0xe9] sm:$0x1] %vm1959_vm15, %v6746_v0  ;;  %1988 = vst.msk [vmem:[#allocation3 + $0x101] sm:$0x1] %vm1959_vm15, %v6746_v0 }
  0x5b   : > { %v1187_v13 = vpack.c.bf16 %v1167_v11, %v1166_v10  ;;  %1989 = vst.msk [vmem:[#allocation3 + $0x119] sm:$0x1] %vm1959_vm15, %v6746_v0  ;;  %1990 = vst.msk [vmem:[#allocation3 + $0x131] sm:$0x1] %vm1959_vm15, %v6746_v0 }
  0x5c   : > { %1991 = vst.msk [vmem:[#allocation3 + $0x149] sm:$0x1] %vm1959_vm15, %v6746_v0  ;;  %1992 = vst.msk [vmem:[#allocation3 + $0x161] sm:$0x1] %vm1959_vm15, %v6746_v0 }
  0x5d   : > { %1085 = vrot.lane.b32.xlu1 %v1050_v31, %s8800_s30  ;;  %1993 = vst.msk [vmem:[#allocation3 + $0x179] sm:$0x1] %vm1959_vm15, %v6746_v0  ;;  %1994 = vst.msk [vmem:[#allocation3 + $0x191] sm:$0x1] %vm1959_vm15, %v6746_v0 }
  0x5e   : > { %1212 = vrot.lane.b32.xlu0 %v1565_v16, %s8801_s22  ;;  %1978 = vst.msk [vmem:[#allocation3 + $0x11] sm:$0x1] %vm1959_vm15, %v6746_v0  ;;  %1995 = vst.msk [vmem:[#allocation3 + $0x1a9] sm:$0x1] %vm1959_vm15, %v6746_v0  ;;  %vm5602_vm15 = vcmask 1043456  }
  0x61   : > { %1214 = vrot.lane.b32.xlu1 %v1179_v36, %s8801_s22 }
  0x62   : > { %1342 = vrot.lane.b32.xlu0 %v7016_v47, %s8786_s16  ;;  %v526_v47 = vld [vmem:[%s6968_s24 + $0xd8] sm:$0xff] }
  0x63   : > { %559 = vst.msk [vmem:[#allocation2 + $0x159] sm:$0xff] %vm453_vm0, %v526_v47  ;;  %v1422_v47 = vld [vmem:[#allocation2 + $0x111] sm:$0xff] }
  0x64   : > { %v1444_v49 = vpack.c.bf16 %v1422_v47, %v1421_v46  ;;  %v1430_v46 = vld [vmem:[#allocation2 + $0x171] sm:$0xff] }
  0x65   : > { %1344 = vrot.lane.b32.xlu1 %v7023_v53, %s8786_s16  ;;  %s8803_s16 = smov 4  }
  0x66   : > { %1471 = vrot.lane.b32.xlu0 %v1050_v31, %s8788_s15 }
  0x69   : > { %1473 = vrot.lane.b32.xlu1 %v1438_v42, %s8788_s15  ;;  %s8804_s15 = smov 24  }
  0x6a   : > { %1600 = vrot.lane.b32.xlu0 %v1179_v36, %s8802_s0  ;;  %v913_v51 = vld [vmem:[#allocation2 + $0x158] sm:$0xff] }
  0x6b   : > { %v7135_v52 = vpack.c.bf16 %v913_v51, %v912_v50  ;;  %v1042_v35 = vld [vmem:[#allocation2 + $0x159] sm:$0xff] }
  0x6c   : > { %v1170_v39 = vld [vmem:[#allocation2 + $0x152] sm:$0xff]  ;;  %v1171_v40 = vld [vmem:[#allocation2 + $0x15a] sm:$0xff] }
  0x6d   : > { %1602 = vrot.lane.b32.xlu1 %v1567_v45, %s8802_s0  ;;  %626 = vst.msk [vmem:[#allocation5 + $0x70] sm:$0xff] %vm453_vm0, %v7135_v52 }
  0x6e   : > { %700 = vrot.lane.b32.xlu0 %v1050_v31, %s8803_s16 }
  0x71   : > { %702 = vrot.lane.b32.xlu1 %v1438_v42, %s8803_s16 }
  0x72   : > { %829 = vrot.lane.b32.xlu0 %v1179_v36, %s8798_s21 }
  0x75   : > { %831 = vrot.lane.b32.xlu1 %v1567_v45, %s8798_s21 }
  0x76   : > { %958 = vrot.lane.b32.xlu0 %v7023_v53, %s8799_s23  ;;  %v1181_v53 = vpack.c.bf16 %v1155_v57, %v1154_v55  ;;  %v1551_v55 = vld [vmem:[#allocation2 + $0x112] sm:$0xff] }
  0x79   : > { %960 = vrot.lane.b32.xlu1 %v7028_v56, %s8799_s23 }
  0x7a   : > { %1087 = vrot.lane.b32.xlu0 %v1438_v42, %s8800_s30 }
  0x7d   : > { %1089 = vrot.lane.b32.xlu1 %v1052_v54, %s8800_s30 }
  0x7e   : > { %1216 = vrot.lane.b32.xlu0 %v1567_v45, %s8801_s22 }
  0x81   : > { %1218 = vrot.lane.b32.xlu1 %v1181_v53, %s8801_s22 }
  0x82   : > { %1346 = vrot.lane.b32.xlu0 %v7028_v56, %s8804_s15  ;;  %v529_v56 = vld [vmem:[%s6968_s24 + $0xf0] sm:$0xff]  ;;  %s6756_s24 = smov 96  }
  0x83   : > { %562 = vst.msk [vmem:[#allocation2 + $0x181] sm:$0xff] %vm453_vm0, %v529_v56  ;;  %v1058_v56 = vpack.c.bf16 %v1038_v7, %v1037_v6  ;;  %vm2205_vm0 = vcmask 523520  }
  0x85   : > { %1348 = vrot.lane.b32.xlu1 %v7036_v60, %s8804_s15 }
  0x86   : > { %1475 = vrot.lane.b32.xlu0 %v1052_v54, %s8805_s2 }
  0x89   : > { %1477 = vrot.lane.b32.xlu1 %v1440_v4, %s8805_s2 }
  0x8a   : > { %1604 = vrot.lane.b32.xlu0 %v1181_v53, %s8802_s0  ;;  %v1045_v7 = vld [vmem:[#allocation2 + $0x181] sm:$0xff] }
  0x8b   : > { %v1174_v11 = vld [vmem:[#allocation2 + $0x182] sm:$0xff] }
  0x8d   : > { %1606 = vrot.lane.b32.xlu1 %v1569_v8, %s8802_s0 }
  0x8e   : > { %704 = vrot.lane.b32.xlu0 %v1052_v54, %s8803_s16  ;;  %v1550_v54 = vld [vmem:[#allocation2 + $0x10a] sm:$0xff] }
  0x90   : > { %v693_v16 = vpop.permute.xlu0 %692 }
  0x91   : > { %706 = vrot.lane.b32.xlu1 %v1440_v4, %s8803_s16  ;;  %741 = vst.msk [vmem:[#allocation5] sm:$0xff] %vm740_vm4, %v693_v16  ;;  %v1425_v16 = vld [vmem:[#allocation2 + $0x139] sm:$0xff] }
  0x92   : > { %833 = vrot.lane.b32.xlu0 %v1181_v53, %s8798_s21 }
  0x95   : > { %835 = vrot.lane.b32.xlu1 %v1569_v8, %s8798_s21 }
  0x96   : > { %962 = vrot.lane.b32.xlu0 %v7036_v60, %s8799_s23  ;;  %v1417_v60 = vld [vmem:[#allocation2 + $0xd9] sm:$0xff] }
  0x97   : > { %v1442_v19 = vpack.c.bf16 %v1418_v18, %v1417_v60 }
  0x99   : > { %964 = vrot.lane.b32.xlu1 %v7041_v63, %s8799_s23 }
  0x9a   : > { %1091 = vrot.lane.b32.xlu0 %v1440_v4, %s8800_s30 }
  0x9d   : > { %1093 = vrot.lane.b32.xlu1 %v1054_v12, %s8800_s30 }
  0x9e   : > { %1220 = vrot.lane.b32.xlu0 %v1569_v8, %s8801_s22 }
  0xa1   : > { %1222 = vrot.lane.b32.xlu1 %v1183_v15, %s8801_s22 }
  0xa2   : > { %1350 = vrot.lane.b32.xlu0 %v7041_v63, %s8804_s15 }
  0xa3   : > { %v822_v17 = vpop.permute.xlu1 %821 }
  0xa4   : > { %870 = vst.msk [vmem:[#allocation5] sm:$0xff] %vm869_vm5, %v822_v17  ;;  %v695_v21 = vpop.permute.xlu0 %694  ;;  %v1426_v17 = vld [vmem:[#allocation2 + $0x141] sm:$0xff] }
  0xa5   : > { %1352 = vrot.lane.b32.xlu1 %v7047_v5, %s8804_s15  ;;  %742 = vst.msk [vmem:[#allocation5 + $0x8] sm:$0xff] %vm740_vm4, %v695_v21  ;;  %v1446_v18 = vpack.c.bf16 %v1426_v17, %v1425_v16 }
  0xa6   : > { %1479 = vrot.lane.b32.xlu0 %v1054_v12, %s8805_s2 }
  0xa7   : > { %v824_v25 = vpop.permute.xlu1 %823 }
  0xa8   : > { %871 = vst.msk [vmem:[#allocation5 + $0x8] sm:$0xff] %vm869_vm5, %v824_v25  ;;  %v951_v27 = vpop.permute.xlu0 %950 }
  0xa9   : > { %1481 = vrot.lane.b32.xlu1 %v1442_v19, %s8805_s2  ;;  %999 = vst.msk [vmem:[#allocation5] sm:$0xff] %vm998_vm6, %v951_v27 }
  0xaa   : > { %1608 = vrot.lane.b32.xlu0 %v1183_v15, %s8802_s0 }
  0xab   : > { %v953_v63 = vpop.permute.xlu1 %952 }
  0xac   : > { %1000 = vst.msk [vmem:[#allocation5 + $0x8] sm:$0xff] %vm998_vm6, %v953_v63  ;;  %v1080_v28 = vpop.permute.xlu0 %1079 }
  0xad   : > { %1610 = vrot.lane.b32.xlu1 %v1571_v26, %s8802_s0  ;;  %1128 = vst.msk [vmem:[#allocation5] sm:$0xff] %vm1127_vm7, %v1080_v28 }
  0xae   : > { %708 = vrot.lane.b32.xlu0 %v1054_v12, %s8803_s16 }
  0xaf   : > { %v1082_v29 = vpop.permute.xlu1 %1081 }
  0xb0   : > { %1129 = vst.msk [vmem:[#allocation5 + $0x8] sm:$0xff] %vm1127_vm7, %v1082_v29  ;;  %v1209_v31 = vpop.permute.xlu0 %1208 }
  0xb1   : > { %710 = vrot.lane.b32.xlu1 %v1442_v19, %s8803_s16  ;;  %1257 = vst.msk [vmem:[#allocation5] sm:$0xff] %vm1256_vm8, %v1209_v31 }
  0xb2   : > { %837 = vrot.lane.b32.xlu0 %v1183_v15, %s8798_s21 }
  0xb3   : > { %v1211_v32 = vpop.permute.xlu1 %1210 }
  0xb4   : > { %1258 = vst.msk [vmem:[#allocation5 + $0x8] sm:$0xff] %vm1256_vm8, %v1211_v32  ;;  %v1339_v33 = vpop.permute.xlu0 %1338 }
  0xb5   : > { %839 = vrot.lane.b32.xlu1 %v1571_v26, %s8798_s21  ;;  %1387 = vst.msk [vmem:[#allocation5] sm:$0xff] %vm1386_vm9, %v1339_v33 }
  0xb6   : > { %966 = vrot.lane.b32.xlu0 %v7047_v5, %s8799_s23 }
  0xb7   : > { %v1341_v36 = vpop.permute.xlu1 %1340 }
  0xb8   : > { %1388 = vst.msk [vmem:[#allocation5 + $0x8] sm:$0xff] %vm1386_vm9, %v1341_v36  ;;  %v1468_v38 = vpop.permute.xlu0 %1467 }
  0xb9   : > { %968 = vrot.lane.b32.xlu1 %v7080_v20, %s8799_s23  ;;  %1516 = vst.msk [vmem:[#allocation5] sm:$0xff] %vm1515_vm10, %v1468_v38 }
  0xba   : > { %1095 = vrot.lane.b32.xlu0 %v1442_v19, %s8800_s30 }
  0xbb   : > { %v1470_v42 = vpop.permute.xlu1 %1469 }
  0xbc   : > { %1517 = vst.msk [vmem:[#allocation5 + $0x8] sm:$0xff] %vm1515_vm10, %v1470_v42  ;;  %v1597_v5 = vpop.permute.xlu0 %1596 }
  0xbd   : > { %1097 = vrot.lane.b32.xlu1 %v1056_v37, %s8800_s30  ;;  %1645 = vst.msk [vmem:[#allocation5] sm:$0xff] %vm1644_vm11, %v1597_v5 }
  0xbe   : > { %1224 = vrot.lane.b32.xlu0 %v1571_v26, %s8801_s22 }
  0xbf   : > { %v1599_v44 = vpop.permute.xlu1 %1598 }
  0xc0   : > { %1646 = vst.msk [vmem:[#allocation5 + $0x8] sm:$0xff] %vm1644_vm11, %v1599_v44  ;;  %v697_v45 = vpop.permute.xlu0 %696 }
  0xc1   : > { %1226 = vrot.lane.b32.xlu1 %v1185_v43, %s8801_s22  ;;  %743 = vst.msk [vmem:[#allocation5 + $0x10] sm:$0xff] %vm740_vm4, %v697_v45  ;;  %v1429_v45 = vld [vmem:[#allocation2 + $0x169] sm:$0xff] }
  0xc2   : > { %1354 = vrot.lane.b32.xlu0 %v7080_v20, %s8804_s15  ;;  %v1573_v20 = vpack.c.bf16 %v1551_v55, %v1550_v54  ;;  %v1559_v54 = vld [vmem:[#allocation2 + $0x172] sm:$0xff] }
  0xc3   : > { %v699_v48 = vpop.permute.xlu1 %698 }
  0xc4   : > { %744 = vst.msk [vmem:[#allocation5 + $0x18] sm:$0xff] %vm740_vm4, %v699_v48  ;;  %v826_v50 = vpop.permute.xlu0 %825  ;;  %v1661_v51 = vld [vmem:[#allocation5] sm:$0xff]  ;;  %v1448_v48 = vpack.c.bf16 %v1430_v46, %v1429_v45 }
  0xc5   : > { %1356 = vrot.lane.b32.xlu1 %v7083_v23, %s8804_s15  ;;  %872 = vst.msk [vmem:[#allocation5 + $0x10] sm:$0xff] %vm869_vm5, %v826_v50  ;;  %6444 = vmatprep.mubr.msk.bf16.mxu0 %vm1704_vm12, %v1661_v51  ;;  %v1558_v51 = vld [vmem:[#allocation2 + $0x16a] sm:$0xff] }
  0xc6   : > { %1483 = vrot.lane.b32.xlu0 %v1056_v37, %s8805_s2 }
  0xc7   : > { %v828_v57 = vpop.permute.xlu1 %827  ;;  %v1662_v58 = vld [vmem:[#allocation5 + $0x8] sm:$0xff] }
  0xc8   : > { %873 = vst.msk [vmem:[#allocation5 + $0x18] sm:$0xff] %vm869_vm5, %v828_v57  ;;  %6445 = vmatmul.mubr.msk.bf16.vlgmr.msra.gmra.mrb[0].mxu0 %vm1704_vm12, %v1662_v58  ;;  %v955_v59 = vpop.permute.xlu0 %954 }
  0xc9   : > { %1485 = vrot.lane.b32.xlu1 %v1444_v49, %s8805_s2  ;;  %1001 = vst.msk [vmem:[#allocation5 + $0x10] sm:$0xff] %vm998_vm6, %v955_v59 }
  0xca   : > { %1612 = vrot.lane.b32.xlu0 %v1185_v43, %s8802_s0 }
  0xcb   : > { %v957_v53 = vpop.permute.xlu1 %956 }
  0xcc   : > { %1002 = vst.msk [vmem:[#allocation5 + $0x18] sm:$0xff] %vm998_vm6, %v957_v53  ;;  %v1084_v61 = vpop.permute.xlu0 %1083 }
  0xcd   : > { %1614 = vrot.lane.b32.xlu1 %v1573_v20, %s8802_s0  ;;  %1130 = vst.msk [vmem:[#allocation5 + $0x10] sm:$0xff] %vm1127_vm7, %v1084_v61 }
  0xce   : > { %712 = vrot.lane.b32.xlu0 %v1056_v37, %s8803_s16  ;;  %v1060_v37 = vpack.c.bf16 %v1042_v35, %v1041_v34 }
  0xcf   : > { %v1086_v62 = vpop.permute.xlu1 %1085 }
  0xd0   : > { %1131 = vst.msk [vmem:[#allocation5 + $0x18] sm:$0xff] %vm1127_vm7, %v1086_v62  ;;  %v1213_v1 = vpop.permute.xlu0 %1212  ;;  %v916_v62 = vld [vmem:[#allocation2 + $0x180] sm:$0xff] }
  0xd1   : > { %714 = vrot.lane.b32.xlu1 %v1444_v49, %s8803_s16  ;;  %1259 = vst.msk [vmem:[#allocation5 + $0x10] sm:$0xff] %vm1256_vm8, %v1213_v1  ;;  %v917_v1 = vld [vmem:[#allocation2 + $0x188] sm:$0xff] }
  0xd2   : > { %841 = vrot.lane.b32.xlu0 %v1185_v43, %s8798_s21  ;;  %v1189_v43 = vpack.c.bf16 %v1171_v40, %v1170_v39 }
  0xd3   : > { %v1215_v2 = vpop.permute.xlu1 %1214 }
  0xd4   : > { %1260 = vst.msk [vmem:[#allocation5 + $0x18] sm:$0xff] %vm1256_vm8, %v1215_v2  ;;  %v1343_v4 = vpop.permute.xlu0 %1342 }
  0xd5   : > { %843 = vrot.lane.b32.xlu1 %v1573_v20, %s8798_s21  ;;  %1389 = vst.msk [vmem:[#allocation5 + $0x10] sm:$0xff] %vm1386_vm9, %v1343_v4  ;;  %v7319_v4 = vpack.c.bf16 %v917_v1, %v916_v62 }
  0xd6   : > { %970 = vrot.lane.b32.xlu0 %v7083_v23, %s8799_s23 }
  0xd7   : > { %v1345_v8 = vpop.permute.xlu1 %1344 }
  0xd8   : > { %1390 = vst.msk [vmem:[#allocation5 + $0x18] sm:$0xff] %vm1386_vm9, %v1345_v8  ;;  %v1472_v9 = vpop.permute.xlu0 %1471  ;;  %v1046_v8 = vld [vmem:[#allocation2 + $0x189] sm:$0xff] }
  0xd9   : > { %972 = vrot.lane.b32.xlu1 %v7101_v30, %s8799_s23  ;;  %1518 = vst.msk [vmem:[#allocation5 + $0x10] sm:$0xff] %vm1515_vm10, %v1472_v9  ;;  %v7327_v9 = vpack.c.bf16 %v1046_v8, %v1045_v7 }
  0xda   : > { %1099 = vrot.lane.b32.xlu0 %v1444_v49, %s8800_s30 }
  0xdb   : > { %v1474_v12 = vpop.permute.xlu1 %1473 }
  0xdc   : > { %1519 = vst.msk [vmem:[#allocation5 + $0x18] sm:$0xff] %vm1515_vm10, %v1474_v12  ;;  %v1601_v14 = vpop.permute.xlu0 %1600  ;;  %v1175_v12 = vld [vmem:[#allocation2 + $0x18a] sm:$0xff] }
  0xdd   : > { %1101 = vrot.lane.b32.xlu1 %v1058_v56, %s8800_s30  ;;  %1647 = vst.msk [vmem:[#allocation5 + $0x10] sm:$0xff] %vm1644_vm11, %v1601_v14 }
  0xde   : > { %1228 = vrot.lane.b32.xlu0 %v1573_v20, %s8801_s22 }
  0xdf   : > { %v1603_v23 = vpop.permute.xlu1 %1602 }
  0xe0   : > { %1648 = vst.msk [vmem:[#allocation5 + $0x18] sm:$0xff] %vm1644_vm11, %v1603_v23  ;;  %v701_v15 = vpop.permute.xlu0 %700  ;;  %v1304_v23 = vld [vmem:[#allocation2 + $0x198] sm:$0xff] }
  0xe1   : > { %1230 = vrot.lane.b32.xlu1 %v1187_v13, %s8801_s22  ;;  %745 = vst.msk [vmem:[#allocation5 + $0x20] sm:$0xff] %vm740_vm4, %v701_v15  ;;  %v1305_v15 = vld [vmem:[#allocation2 + $0x1a0] sm:$0xff] }
  0xe2   : > { %1358 = vrot.lane.b32.xlu0 %v7101_v30, %s8804_s15  ;;  %v1575_v30 = vpack.c.bf16 %v1555_v24, %v1554_v22  ;;  %v1321_v17 = vpack.c.bf16 %v1305_v15, %v1304_v23 }
  0xe3   : > { %v703_v60 = vpop.permute.xlu1 %702 }
  0xe4   : > { %746 = vst.msk [vmem:[#allocation5 + $0x28] sm:$0xff] %vm740_vm4, %v703_v60  ;;  %v830_v19 = vpop.permute.xlu0 %829  ;;  %v1663_v21 = vld [vmem:[#allocation5 + $0x10] sm:$0xff] }
  0xe5   : > { %1360 = vrot.lane.b32.xlu1 %v7117_v41, %s8804_s15  ;;  %874 = vst.msk [vmem:[#allocation5 + $0x20] sm:$0xff] %vm869_vm5, %v830_v19  ;;  %6448 = vmatprep.mubr.msk.bf16.mxu0 %vm1704_vm12, %v1663_v21  ;;  %v1434_v19 = vld [vmem:[#allocation2 + $0x1a1] sm:$0xff] }
  0xe6   : > { %1487 = vrot.lane.b32.xlu0 %v1058_v56, %s8805_s2 }
  0xe7   : > { %v832_v25 = vpop.permute.xlu1 %831  ;;  %v1664_v26 = vld [vmem:[#allocation5 + $0x18] sm:$0xff] }
  0xe8   : > { %875 = vst.msk [vmem:[#allocation5 + $0x28] sm:$0xff] %vm869_vm5, %v832_v25  ;;  %6449 = vmatmul.mubr.msk.bf16.gmra.mrb[4].mxu0 %vm1704_vm12, %v1664_v26  ;;  %v959_v27 = vpop.permute.xlu0 %958  ;;  %v1562_v26 = vld [vmem:[#allocation2 + $0x19a] sm:$0xff] }
  0xe9   : > { %1489 = vrot.lane.b32.xlu1 %v1446_v18, %s8805_s2  ;;  %1003 = vst.msk [vmem:[#allocation5 + $0x20] sm:$0xff] %vm998_vm6, %v959_v27 }
  0xea   : > { %1616 = vrot.lane.b32.xlu0 %v1187_v13, %s8802_s0 }
  0xeb   : > { %v961_v63 = vpop.permute.xlu1 %960 }
  0xec   : > { %1004 = vst.msk [vmem:[#allocation5 + $0x28] sm:$0xff] %vm998_vm6, %v961_v63  ;;  %v1088_v28 = vpop.permute.xlu0 %1087 }
  0xed   : > { %1618 = vrot.lane.b32.xlu1 %v1575_v30, %s8802_s0  ;;  %1132 = vst.msk [vmem:[#allocation5 + $0x20] sm:$0xff] %vm1127_vm7, %v1088_v28 }
  0xee   : > { %716 = vrot.lane.b32.xlu0 %v1058_v56, %s8803_s16 }
  0xef   : > { %v1090_v29 = vpop.permute.xlu1 %1089 }
  0xf0   : > { %1133 = vst.msk [vmem:[#allocation5 + $0x28] sm:$0xff] %vm1127_vm7, %v1090_v29  ;;  %v1217_v31 = vpop.permute.xlu0 %1216 }
  0xf1   : > { %718 = vrot.lane.b32.xlu1 %v1446_v18, %s8803_s16  ;;  %1261 = vst.msk [vmem:[#allocation5 + $0x20] sm:$0xff] %vm1256_vm8, %v1217_v31  ;;  %v2093_v31 = vld [vmem:[#allocation3 + $0x1] sm:$0xff] }
  0xf2   : > { %845 = vrot.lane.b32.xlu0 %v1187_v13, %s8798_s21  ;;  %v7344_v13 = vpack.c.bf16 %v1175_v12, %v1174_v11 }
  0xf3   : > { %v1219_v32 = vpop.permute.xlu1 %1218 }
  0xf4   : > { %1262 = vst.msk [vmem:[#allocation5 + $0x28] sm:$0xff] %vm1256_vm8, %v1219_v32  ;;  %v1347_v33 = vpop.permute.xlu0 %1346  ;;  %v2094_v32 = vld [vmem:[#allocation3 + $0x9] sm:$0xff] }
  0xf5   : > { %847 = vrot.lane.b32.xlu1 %v1575_v30, %s8798_s21  ;;  %1391 = vst.msk [vmem:[#allocation5 + $0x20] sm:$0xff] %vm1386_vm9, %v1347_v33  ;;  %v2125_v34 = vpack.c.bf16 %v2094_v32, %v2093_v31 }
  0xf6   : > { %974 = vrot.lane.b32.xlu0 %v7117_v41, %s8799_s23 }
  0xf7   : > { %v1349_v36 = vpop.permute.xlu1 %1348 }
  0xf8   : > { %1392 = vst.msk [vmem:[#allocation5 + $0x28] sm:$0xff] %vm1386_vm9, %v1349_v36  ;;  %v1476_v38 = vpop.permute.xlu0 %1475  ;;  %v2222_v36 = vld [vmem:[#allocation3 + $0x2] sm:$0xff] }
  0xf9   : > { %976 = vrot.lane.b32.xlu1 %v7135_v52, %s8799_s23  ;;  %1520 = vst.msk [vmem:[#allocation5 + $0x20] sm:$0xff] %vm1515_vm10, %v1476_v38 }
  0xfa   : > { %1103 = vrot.lane.b32.xlu0 %v1446_v18, %s8800_s30  ;;  %v1433_v18 = vld [vmem:[#allocation2 + $0x199] sm:$0xff] }
  0xfb   : > { %v1478_v42 = vpop.permute.xlu1 %1477  ;;  %v1450_v22 = vpack.c.bf16 %v1434_v19, %v1433_v18 }
  0xfc   : > { %1521 = vst.msk [vmem:[#allocation5 + $0x28] sm:$0xff] %vm1515_vm10, %v1478_v42  ;;  %v1605_v5 = vpop.permute.xlu0 %1604 }
  0xfd   : > { %1105 = vrot.lane.b32.xlu1 %v1060_v37, %s8800_s30  ;;  %1649 = vst.msk [vmem:[#allocation5 + $0x20] sm:$0xff] %vm1644_vm11, %v1605_v5 }
  0xfe   : > { %1232 = vrot.lane.b32.xlu0 %v1575_v30, %s8801_s22  ;;  %v1563_v30 = vld [vmem:[#allocation2 + $0x1a2] sm:$0xff] }
  0xff   : > { %v1607_v41 = vpop.permute.xlu1 %1606  ;;  %v1579_v28 = vpack.c.bf16 %v1563_v30, %v1562_v26 }
 0x100   : > { %1650 = vst.msk [vmem:[#allocation5 + $0x28] sm:$0xff] %vm1644_vm11, %v1607_v41  ;;  %v705_v44 = vpop.permute.xlu0 %704 }
 0x101   : > { %1234 = vrot.lane.b32.xlu1 %v1189_v43, %s8801_s22  ;;  %747 = vst.msk [vmem:[#allocation5 + $0x30] sm:$0xff] %vm740_vm4, %v705_v44 }
 0x102   : > { %1362 = vrot.lane.b32.xlu0 %v7135_v52, %s8804_s15  ;;  %v7303_v52 = vpack.c.bf16 %v1559_v54, %v1558_v51 }
 0x103   : > { %v707_v47 = vpop.permute.xlu1 %706 }
 0x104   : > { %748 = vst.msk [vmem:[#allocation5 + $0x38] sm:$0xff] %vm740_vm4, %v707_v47  ;;  %v834_v49 = vpop.permute.xlu0 %833  ;;  %v1665_v50 = vld [vmem:[#allocation5 + $0x20] sm:$0xff] }
 0x105   : > { %1364 = vrot.lane.b32.xlu1 %v7153_v3, %s8804_s15  ;;  %876 = vst.msk [vmem:[#allocation5 + $0x30] sm:$0xff] %vm869_vm5, %v834_v49  ;;  %6452 = vmatprep.mubr.msk.bf16.mxu0 %vm1704_vm12, %v1665_v50 }
 0x106   : > { %1491 = vrot.lane.b32.xlu0 %v1060_v37, %s8805_s2 }
 0x107   : > { %v836_v55 = vpop.permute.xlu1 %835  ;;  %v1666_v57 = vld [vmem:[#allocation5 + $0x28] sm:$0xff] }
 0x108   : > { %877 = vst.msk [vmem:[#allocation5 + $0x38] sm:$0xff] %vm869_vm5, %v836_v55  ;;  %6453 = vmatmul.mubr.msk.bf16.gmra.mrb[8].mxu0 %vm1704_vm12, %v1666_v57  ;;  %v963_v58 = vpop.permute.xlu0 %962 }
 0x109   : > { %1493 = vrot.lane.b32.xlu1 %v1448_v48, %s8805_s2  ;;  %1005 = vst.msk [vmem:[#allocation5 + $0x30] sm:$0xff] %vm998_vm6, %v963_v58 }
 0x10a   : > { %1620 = vrot.lane.b32.xlu0 %v1189_v43, %s8802_s0 }
 0x10b   : > { %v965_v20 = vpop.permute.xlu1 %964 }
 0x10c   : > { %1006 = vst.msk [vmem:[#allocation5 + $0x38] sm:$0xff] %vm998_vm6, %v965_v20  ;;  %v1092_v59 = vpop.permute.xlu0 %1091 }
 0x10d   : > { %1622 = vrot.lane.b32.xlu1 %v7303_v52, %s8802_s0  ;;  %1134 = vst.msk [vmem:[#allocation5 + $0x30] sm:$0xff] %vm1127_vm7, %v1092_v59  ;;  %v6585_v59 = vld [vmem:[%s8806_s4 + $0x88] sm:$0xff]  }
 0x10e   : > { %720 = vrot.lane.b32.xlu0 %v1060_v37, %s8803_s16  ;;  %v2223_v37 = vld [vmem:[#allocation3 + $0xa] sm:$0xff] }
 0x10f   : > { %v1094_v53 = vpop.permute.xlu1 %1093  ;;  %v2254_v39 = vpack.c.bf16 %v2223_v37, %v2222_v36  ;;  %v2029_v36 = vld [vmem:[#allocation3] sm:$0xff]  ;;  %v2030_v37 = vld [vmem:[#allocation3 + $0x8] sm:$0xff] }
 0x110   : > { %1135 = vst.msk [vmem:[#allocation5 + $0x38] sm:$0xff] %vm1127_vm7, %v1094_v53  ;;  %v1221_v61 = vpop.permute.xlu0 %1220 }
 0x111   : > { %722 = vrot.lane.b32.xlu1 %v1448_v48, %s8803_s16  ;;  %1263 = vst.msk [vmem:[#allocation5 + $0x30] sm:$0xff] %vm1256_vm8, %v1221_v61 }
 0x112   : > { %849 = vrot.lane.b32.xlu0 %v1189_v43, %s8798_s21 }
 0x113   : > { %v1223_v2 = vpop.permute.xlu1 %1222 }
 0x114   : > { %1264 = vst.msk [vmem:[#allocation5 + $0x38] sm:$0xff] %vm1256_vm8, %v1223_v2  ;;  %v1351_v6 = vpop.permute.xlu0 %1350 }
 0x115   : > { %851 = vrot.lane.b32.xlu1 %v7303_v52, %s8798_s21  ;;  %1393 = vst.msk [vmem:[#allocation5 + $0x30] sm:$0xff] %vm1386_vm9, %v1351_v6 }
 0x116   : > { %978 = vrot.lane.b32.xlu0 %v7153_v3, %s8799_s23 }
 0x117   : > { %v1353_v56 = vpop.permute.xlu1 %1352 }
 0x118   : > { %1394 = vst.msk [vmem:[#allocation5 + $0x38] sm:$0xff] %vm1386_vm9, %v1353_v56  ;;  %v1480_v10 = vpop.permute.xlu0 %1479 }
 0x119   : > { %980 = vrot.lane.b32.xlu1 %v7319_v4, %s8799_s23  ;;  %1522 = vst.msk [vmem:[#allocation5 + $0x30] sm:$0xff] %vm1515_vm10, %v1480_v10  ;;  %s451_s23 = scalar_lea.vmem %s8761_s1, %s6962_s20  ;;  %s6175_s20 = sshll.u32 %s6851_s29, 4 }
 0x11a   : > { %1107 = vrot.lane.b32.xlu0 %v1448_v48, %s8800_s30 }
 0x11b   : > { %v1482_v3 = vpop.permute.xlu1 %1481 }
 0x11c   : > { %1523 = vst.msk [vmem:[#allocation5 + $0x38] sm:$0xff] %vm1515_vm10, %v1482_v3  ;;  %v1609_v14 = vpop.permute.xlu0 %1608 }
 0x11d   : > { %1109 = vrot.lane.b32.xlu1 %v7327_v9, %s8800_s30  ;;  %1651 = vst.msk [vmem:[#allocation5 + $0x30] sm:$0xff] %vm1644_vm11, %v1609_v14 }
 0x11e   : > { %1236 = vrot.lane.b32.xlu0 %v7303_v52, %s8801_s22  ;;  %v6584_v52 = vld [vmem:[%s8806_s4 + $0x80] sm:$0xff]  }
 0x11f   : > { %v1611_v16 = vpop.permute.xlu1 %1610  ;;  %6476 = vmatprep.subr.bf16.mxu0 %v6584_v52 }
 0x120   : > { %1652 = vst.msk [vmem:[#allocation5 + $0x38] sm:$0xff] %vm1644_vm11, %v1611_v16  ;;  %v709_v60 = vpop.permute.xlu0 %708  ;;  %6477 = vmatpush3.bf16.msra.mxu0 %v6584_v52 }
 0x121   : > { %1238 = vrot.lane.b32.xlu1 %v7344_v13, %s8801_s22  ;;  %749 = vst.msk [vmem:[#allocation5 + $0x40] sm:$0xff] %vm740_vm4, %v709_v60  ;;  %6478 = vmatprep.subr.bf16.mxu0 %v6585_v59  ;;  %s8718_s22 = scalar_lea.hbm %s8773_s13, %s6175_s20 }
 0x122   : > { %1366 = vrot.lane.b32.xlu0 %v7319_v4, %s8804_s15 }
 0x123   : > { %v711_v21 = vpop.permute.xlu1 %710 }
 0x124   : > { %750 = vst.msk [vmem:[#allocation5 + $0x48] sm:$0xff] %vm740_vm4, %v711_v21  ;;  %v838_v24 = vpop.permute.xlu0 %837  ;;  %v1667_v25 = vld [vmem:[#allocation5 + $0x30] sm:$0xff]  ;;  %6479 = vmatpush3.bf16.msra.mxu0 %v6585_v59 }
 0x125   : > { %1368 = vrot.lane.b32.xlu1 %v1321_v17, %s8804_s15  ;;  %878 = vst.msk [vmem:[#allocation5 + $0x40] sm:$0xff] %vm869_vm5, %v838_v24  ;;  %6456 = vmatprep.mubr.msk.bf16.mxu0 %vm1704_vm12, %v1667_v25 }
 0x126   : > { %1495 = vrot.lane.b32.xlu0 %v7327_v9, %s8805_s2 }
 0x127   : > { %v840_v27 = vpop.permute.xlu1 %839  ;;  %v1668_v63 = vld [vmem:[#allocation5 + $0x38] sm:$0xff] }
 0x128   : > { %879 = vst.msk [vmem:[#allocation5 + $0x48] sm:$0xff] %vm869_vm5, %v840_v27  ;;  %6457 = vmatmul.mubr.msk.bf16.gmra.mrb[12].mxu0 %vm1704_vm12, %v1668_v63  ;;  %v967_v29 = vpop.permute.xlu0 %966 }
 0x129   : > { %1497 = vrot.lane.b32.xlu1 %v1450_v22, %s8805_s2  ;;  %1007 = vst.msk [vmem:[#allocation5 + $0x40] sm:$0xff] %vm998_vm6, %v967_v29  ;;  %s6755_s2 = smov 64  }
 0x12a   : > { %1624 = vrot.lane.b32.xlu0 %v7344_v13, %s8802_s0 }
 0x12b   : > { %v969_v33 = vpop.permute.xlu1 %968 }
 0x12c   : > { %1008 = vst.msk [vmem:[#allocation5 + $0x48] sm:$0xff] %vm998_vm6, %v969_v33  ;;  %v1096_v35 = vpop.permute.xlu0 %1095 }
 0x12d   : > { %1626 = vrot.lane.b32.xlu1 %v1579_v28, %s8802_s0  ;;  %1136 = vst.msk [vmem:[#allocation5 + $0x40] sm:$0xff] %vm1127_vm7, %v1096_v35  ;;  %v6586_v35 = vld [vmem:[%s8806_s4 + $0x40] sm:$0xff]  }
 0x12e   : > { %6198 = vmatprep.subr.bf16.mxu1 %v6586_v35 }
 0x12f   : > { %v1098_v38 = vpop.permute.xlu1 %1097 }
 0x130   : > { %1137 = vst.msk [vmem:[#allocation5 + $0x48] sm:$0xff] %vm1127_vm7, %v1098_v38  ;;  %v1225_v40 = vpop.permute.xlu0 %1224 }
 0x131   : > { %2157 = vrot.lane.b32.xlu1 %v2125_v34, %s8802_s0  ;;  %1265 = vst.msk [vmem:[#allocation5 + $0x40] sm:$0xff] %vm1256_vm8, %v1225_v40  ;;  %v6587_v40 = vld [vmem:[%s8806_s4] sm:$0xff]  }
 0x132   : > { %6199 = vmatpush3.bf16.msra.mxu1 %v6587_v40 }
 0x133   : > { %v1227_v42 = vpop.permute.xlu1 %1226 }
 0x134   : > { %1266 = vst.msk [vmem:[#allocation5 + $0x48] sm:$0xff] %vm1256_vm8, %v1227_v42  ;;  %v1355_v43 = vpop.permute.xlu0 %1354 }
 0x135   : > { %2286 = vrot.lane.b32.xlu1 %v2254_v39, %s6755_s2  ;;  %1395 = vst.msk [vmem:[#allocation5 + $0x40] sm:$0xff] %vm1386_vm9, %v1355_v43  ;;  %v2061_v39 = vpack.c.bf16 %v2030_v37, %v2029_v36  ;;  %v6588_v43 = vld [vmem:[%s8806_s4 + $0x48] sm:$0xff]  }
 0x136   : > { %6200 = vmatprep.subr.bf16.mxu1 %v6588_v43 }
 0x137   : > { %v1357_v5 = vpop.permute.xlu1 %1356  ;;  %2077 = vst.msk [vmem:[#allocation6] sm:$0xff] %vm1950_vm13, %v2061_v39 }
 0x138   : > { %1396 = vst.msk [vmem:[#allocation5 + $0x48] sm:$0xff] %vm1386_vm9, %v1357_v5  ;;  %v1484_v41 = vpop.permute.xlu0 %1483  ;;  %v7522_v5 = vld [vmem:[%s8807_s3] ss:$0 sm:$0xff] }
 0x139   : > { %1524 = vst.msk [vmem:[#allocation5 + $0x40] sm:$0xff] %vm1515_vm10, %v1484_v41 }
 0x13b   : > { %v1486_v44 = vpop.permute.xlu1 %1485 }
 0x13c   : > { %1525 = vst.msk [vmem:[#allocation5 + $0x48] sm:$0xff] %vm1515_vm10, %v1486_v44  ;;  %v1613_v45 = vpop.permute.xlu0 %1612  ;;  %v6589_v44 = vld [vmem:[%s8806_s4 + $0x8] sm:$0xff]  }
 0x13d   : > { %1653 = vst.msk [vmem:[#allocation5 + $0x40] sm:$0xff] %vm1644_vm11, %v1613_v45  ;;  %6201 = vmatpush3.bf16.msra.mxu1 %v6589_v44 }
 0x13f   : > { %v1615_v46 = vpop.permute.xlu1 %1614 }
 0x140   : > { %1654 = vst.msk [vmem:[#allocation5 + $0x48] sm:$0xff] %vm1644_vm11, %v1615_v46  ;;  %v713_v47 = vpop.permute.xlu0 %712 }
 0x141   : > { %751 = vst.msk [vmem:[#allocation5 + $0x50] sm:$0xff] %vm740_vm4, %v713_v47 }
 0x143   : > { %v715_v48 = vpop.permute.xlu1 %714 }
 0x144   : > { %752 = vst.msk [vmem:[#allocation5 + $0x58] sm:$0xff] %vm740_vm4, %v715_v48  ;;  %v842_v49 = vpop.permute.xlu0 %841  ;;  %v1669_v50 = vld [vmem:[#allocation5 + $0x40] sm:$0xff] }
 0x145   : > { %880 = vst.msk [vmem:[#allocation5 + $0x50] sm:$0xff] %vm869_vm5, %v842_v49  ;;  %6460 = vmatprep.mubr.msk.bf16.mxu0 %vm1704_vm12, %v1669_v50 }
 0x147   : > { %v844_v51 = vpop.permute.xlu1 %843  ;;  %v1670_v54 = vld [vmem:[#allocation5 + $0x48] sm:$0xff] }
 0x148   : > { %881 = vst.msk [vmem:[#allocation5 + $0x58] sm:$0xff] %vm869_vm5, %v844_v51  ;;  %6461 = vmatmul.mubr.msk.bf16.gmra.mrb[16].mxu0 %vm1704_vm12, %v1670_v54  ;;  %v971_v55 = vpop.permute.xlu0 %970  ;;  %v6590_v51 = vld [vmem:[%s8806_s4 + $0x50] sm:$0xff]  }
 0x149   : > { %1009 = vst.msk [vmem:[#allocation5 + $0x50] sm:$0xff] %vm998_vm6, %v971_v55  ;;  %6202 = vmatprep.subr.bf16.mxu1 %v6590_v51 }
 0x14b   : > { %v973_v57 = vpop.permute.xlu1 %972 }
 0x14c   : > { %1010 = vst.msk [vmem:[#allocation5 + $0x58] sm:$0xff] %vm998_vm6, %v973_v57  ;;  %v1100_v58 = vpop.permute.xlu0 %1099 }
 0x14d   : > { %1138 = vst.msk [vmem:[#allocation5 + $0x50] sm:$0xff] %vm1127_vm7, %v1100_v58  ;;  %v6591_v58 = vld [vmem:[%s8806_s4 + $0x10] sm:$0xff]  }
 0x14e   : > { %6203 = vmatpush3.bf16.msra.mxu1 %v6591_v58 }
 0x14f   : > { %v1102_v20 = vpop.permute.xlu1 %1101 }
 0x150   : > { %1139 = vst.msk [vmem:[#allocation5 + $0x58] sm:$0xff] %vm1127_vm7, %v1102_v20  ;;  %v1229_v53 = vpop.permute.xlu0 %1228 }
 0x151   : > { %1267 = vst.msk [vmem:[#allocation5 + $0x50] sm:$0xff] %vm1256_vm8, %v1229_v53 }
 0x153   : > { %v1231_v61 = vpop.permute.xlu1 %1230 }
 0x154   : > { %1268 = vst.msk [vmem:[#allocation5 + $0x58] sm:$0xff] %vm1256_vm8, %v1231_v61  ;;  %v1359_v62 = vpop.permute.xlu0 %1358 }
 0x155   : > { %1397 = vst.msk [vmem:[#allocation5 + $0x50] sm:$0xff] %vm1386_vm9, %v1359_v62 }
 0x157   : > { %v1361_v1 = vpop.permute.xlu1 %1360 }
 0x158   : > { %1398 = vst.msk [vmem:[#allocation5 + $0x58] sm:$0xff] %vm1386_vm9, %v1361_v1  ;;  %v1488_v2 = vpop.permute.xlu0 %1487  ;;  %v6592_v1 = vld [vmem:[%s8806_s4 + $0x58] sm:$0xff]  }
 0x159   : > { %1526 = vst.msk [vmem:[#allocation5 + $0x50] sm:$0xff] %vm1515_vm10, %v1488_v2  ;;  %v6593_v2 = vld [vmem:[%s8806_s4 + $0x18] sm:$0xff]   ;;  %6204 = vmatprep.subr.bf16.mxu1 %v6592_v1 }
 0x15a   : > { %6205 = vmatpush3.bf16.msra.mxu1 %v6593_v2 }
 0x15b   : > { %v1490_v4 = vpop.permute.xlu1 %1489 }
 0x15c   : > { %1527 = vst.msk [vmem:[#allocation5 + $0x58] sm:$0xff] %vm1515_vm10, %v1490_v4  ;;  %v1617_v6 = vpop.permute.xlu0 %1616 }
 0x15d   : > { %1655 = vst.msk [vmem:[#allocation5 + $0x50] sm:$0xff] %vm1644_vm11, %v1617_v6  ;;  %v6594_v6 = vld [vmem:[%s8806_s4 + $0x60] sm:$0xff]  }
 0x15e   : > { %6206 = vmatprep.subr.bf16.mxu1 %v6594_v6 }
 0x15f   : > { %v1619_v7 = vpop.permute.xlu1 %1618 }
 0x160   : > { %1656 = vst.msk [vmem:[#allocation5 + $0x58] sm:$0xff] %vm1644_vm11, %v1619_v7  ;;  %v717_v8 = vpop.permute.xlu0 %716 }
 0x161   : > { %753 = vst.msk [vmem:[#allocation5 + $0x60] sm:$0xff] %vm740_vm4, %v717_v8  ;;  %v6595_v8 = vld [vmem:[%s8806_s4 + $0x20] sm:$0xff]  }
 0x162   : > { %6207 = vmatpush3.bf16.msra.mxu1 %v6595_v8 }
 0x163   : > { %v719_v56 = vpop.permute.xlu1 %718 }
 0x164   : > { %754 = vst.msk [vmem:[#allocation5 + $0x68] sm:$0xff] %vm740_vm4, %v719_v56  ;;  %v846_v9 = vpop.permute.xlu0 %845  ;;  %v1671_v10 = vld [vmem:[#allocation5 + $0x50] sm:$0xff] }
 0x165   : > { %882 = vst.msk [vmem:[#allocation5 + $0x60] sm:$0xff] %vm869_vm5, %v846_v9  ;;  %6464 = vmatprep.mubr.msk.bf16.mxu0 %vm1704_vm12, %v1671_v10 }
 0x167   : > { %v848_v11 = vpop.permute.xlu1 %847  ;;  %v1672_v12 = vld [vmem:[#allocation5 + $0x58] sm:$0xff] }
 0x168   : > { %883 = vst.msk [vmem:[#allocation5 + $0x68] sm:$0xff] %vm869_vm5, %v848_v11  ;;  %6465 = vmatmul.mubr.msk.bf16.gmra.mrb[20].mxu0 %vm1704_vm12, %v1672_v12  ;;  %v975_v3 = vpop.permute.xlu0 %974 }
 0x169   : > { %1011 = vst.msk [vmem:[#allocation5 + $0x60] sm:$0xff] %vm998_vm6, %v975_v3 }
 0x16b   : > { %v977_v13 = vpop.permute.xlu1 %976 }
 0x16c   : > { %1012 = vst.msk [vmem:[#allocation5 + $0x68] sm:$0xff] %vm998_vm6, %v977_v13  ;;  %v1104_v14 = vpop.permute.xlu0 %1103 }
 0x16d   : > { %1140 = vst.msk [vmem:[#allocation5 + $0x60] sm:$0xff] %vm1127_vm7, %v1104_v14 }
 0x16f   : > { %v1106_v23 = vpop.permute.xlu1 %1105 }
 0x170   : > { %1141 = vst.msk [vmem:[#allocation5 + $0x68] sm:$0xff] %vm1127_vm7, %v1106_v23  ;;  %v1233_v15 = vpop.permute.xlu0 %1232 }
 0x171   : > { %1269 = vst.msk [vmem:[#allocation5 + $0x60] sm:$0xff] %vm1256_vm8, %v1233_v15 }
 0x173   : > { %v1235_v16 = vpop.permute.xlu1 %1234 }
 0x174   : > { %1270 = vst.msk [vmem:[#allocation5 + $0x68] sm:$0xff] %vm1256_vm8, %v1235_v16  ;;  %v1363_v17 = vpop.permute.xlu0 %1362 }
 0x175   : > { %1399 = vst.msk [vmem:[#allocation5 + $0x60] sm:$0xff] %vm1386_vm9, %v1363_v17 }
 0x177   : > { %v1365_v60 = vpop.permute.xlu1 %1364 }
 0x178   : > { %1400 = vst.msk [vmem:[#allocation5 + $0x68] sm:$0xff] %vm1386_vm9, %v1365_v60  ;;  %v1492_v18 = vpop.permute.xlu0 %1491 }
 0x179   : > { %1528 = vst.msk [vmem:[#allocation5 + $0x60] sm:$0xff] %vm1515_vm10, %v1492_v18 }
 0x17b   : > { %v1494_v19 = vpop.permute.xlu1 %1493 }
 0x17c   : > { %1529 = vst.msk [vmem:[#allocation5 + $0x68] sm:$0xff] %vm1515_vm10, %v1494_v19  ;;  %v1621_v21 = vpop.permute.xlu0 %1620 }
 0x17d   : > { %1657 = vst.msk [vmem:[#allocation5 + $0x60] sm:$0xff] %vm1644_vm11, %v1621_v21  ;;  %v6596_v21 = vld [vmem:[%s8806_s4 + $0x68] sm:$0xff]  }
 0x17e   : > { %6208 = vmatprep.subr.bf16.mxu1 %v6596_v21 }
 0x17f   : > { %v1623_v22 = vpop.permute.xlu1 %1622 }
 0x180   : > { %1658 = vst.msk [vmem:[#allocation5 + $0x68] sm:$0xff] %vm1644_vm11, %v1623_v22  ;;  %v721_v24 = vpop.permute.xlu0 %720 }
 0x181   : > { %755 = vst.msk [vmem:[#allocation5 + $0x70] sm:$0xff] %vm740_vm4, %v721_v24 }
 0x183   : > { %v723_v25 = vpop.permute.xlu1 %722 }
 0x184   : > { %756 = vst.msk [vmem:[#allocation5 + $0x78] sm:$0xff] %vm740_vm4, %v723_v25  ;;  %v850_v26 = vpop.permute.xlu0 %849  ;;  %v1673_v30 = vld [vmem:[#allocation5 + $0x60] sm:$0xff]  ;;  %v6597_v25 = vld [vmem:[%s8806_s4 + $0x28] sm:$0xff]   ;;  %vm3594_vm4 = vcmask 523264  }
 0x185   : > { %884 = vst.msk [vmem:[#allocation5 + $0x70] sm:$0xff] %vm869_vm5, %v850_v26  ;;  %6468 = vmatprep.mubr.msk.bf16.mxu0 %vm1704_vm12, %v1673_v30  ;;  %v6598_v26 = vld [vmem:[%s8806_s4 + $0x70] sm:$0xff]   ;;  %6209 = vmatpush3.bf16.msra.mxu1 %v6597_v25 }
 0x186   : > { %v6599_v30 = vld [vmem:[%s8806_s4 + $0x30] sm:$0xff]   ;;  %6210 = vmatprep.subr.bf16.mxu1 %v6598_v26  ;;  %4444 = vst.msk [vmem:[#allocation4] sm:$0xff] %vm3594_vm4, %v6746_v0  ;;  %4447 = vst.msk [vmem:[#allocation4 + $0x90] sm:$0xff] %vm3594_vm4, %v6746_v0 }
 0x187   : > { %v852_v27 = vpop.permute.xlu1 %851  ;;  %v1674_v63 = vld [vmem:[#allocation5 + $0x68] sm:$0xff] }
 0x188   : > { %885 = vst.msk [vmem:[#allocation5 + $0x78] sm:$0xff] %vm869_vm5, %v852_v27  ;;  %6469 = vmatmul.mubr.msk.bf16.gmra.mrb[24].mxu0 %vm1704_vm12, %v1674_v63  ;;  %v979_v28 = vpop.permute.xlu0 %978  ;;  %v6600_v27 = vld [vmem:[%s8806_s4 + $0x78] sm:$0xff]   ;;  %vm3995_vm5 = vcmask 517120  }
 0x189   : > { %1013 = vst.msk [vmem:[#allocation5 + $0x70] sm:$0xff] %vm998_vm6, %v979_v28  ;;  %6211 = vmatpush3.bf16.msra.mxu1 %v6599_v30  ;;  %v6601_v63 = vld [vmem:[%s8806_s4 + $0x38] sm:$0xff]  }
 0x18a   : > { %6212 = vmatprep.subr.bf16.mxu1 %v6600_v27  ;;  %4445 = vst.msk [vmem:[#allocation4 + $0x8] sm:$0x3] %vm3995_vm5, %v6746_v0  ;;  %4448 = vst.msk [vmem:[#allocation4 + $0x98] sm:$0x3] %vm3995_vm5, %v6746_v0 }
 0x18b   : > { %v981_v29 = vpop.permute.xlu1 %980 }
 0x18c   : > { %1014 = vst.msk [vmem:[#allocation5 + $0x78] sm:$0xff] %vm998_vm6, %v981_v29  ;;  %v1108_v31 = vpop.permute.xlu0 %1107  ;;  %vm4449_vm6 = vcmask 516096  }
 0x18d   : > { %1142 = vst.msk [vmem:[#allocation5 + $0x70] sm:$0xff] %vm1127_vm7, %v1108_v31  ;;  %6213 = vmatpush3.bf16.msra.mxu1 %v6601_v63 }
 0x18e   : > { %4451 = vst.msk [vmem:[#allocation4 + $0x10] sm:$0x1] %vm4449_vm6, %v6746_v0  ;;  %4452 = vst.msk [vmem:[#allocation4 + $0x20] sm:$0x1] %vm4449_vm6, %v6746_v0 }
 0x18f   : > { %v1110_v32 = vpop.permute.xlu1 %1109  ;;  %4450 = vst.msk [vmem:[#allocation4] sm:$0x1] %vm4449_vm6, %v6746_v0  ;;  %4453 = vst.msk [vmem:[#allocation4 + $0x30] sm:$0x1] %vm4449_vm6, %v6746_v0 }
 0x190   : > { %1143 = vst.msk [vmem:[#allocation5 + $0x78] sm:$0xff] %vm1127_vm7, %v1110_v32  ;;  %v1237_v33 = vpop.permute.xlu0 %1236  ;;  %vm4534_vm7 = vcmask 1041409  }
 0x191   : > { %1271 = vst.msk [vmem:[#allocation5 + $0x70] sm:$0xff] %vm1256_vm8, %v1237_v33 }
 0x192   : > { %4454 = vst.msk [vmem:[#allocation4 + $0x40] sm:$0x1] %vm4449_vm6, %v6746_v0  ;;  %4455 = vst.msk [vmem:[#allocation4 + $0x50] sm:$0x1] %vm4449_vm6, %v6746_v0 }
 0x193   : > { %v1239_v34 = vpop.permute.xlu1 %1238  ;;  %4456 = vst.msk [vmem:[#allocation4 + $0x60] sm:$0x1] %vm4449_vm6, %v6746_v0  ;;  %4457 = vst.msk [vmem:[#allocation4 + $0x70] sm:$0x1] %vm4449_vm6, %v6746_v0 }
 0x194   : > { %1272 = vst.msk [vmem:[#allocation5 + $0x78] sm:$0xff] %vm1256_vm8, %v1239_v34  ;;  %v1367_v38 = vpop.permute.xlu0 %1366  ;;  %vm4536_vm8 = vcmask 1042434  }
 0x195   : > { %1401 = vst.msk [vmem:[#allocation5 + $0x70] sm:$0xff] %vm1386_vm9, %v1367_v38 }
 0x196   : > { %4458 = vst.msk [vmem:[#allocation4 + $0x80] sm:$0x1] %vm4449_vm6, %v6746_v0  ;;  %4459 = vst.msk [vmem:[#allocation4 + $0x90] sm:$0x1] %vm4449_vm6, %v6746_v0 }
 0x197   : > { %v1369_v42 = vpop.permute.xlu1 %1368  ;;  %4460 = vst.msk [vmem:[#allocation4 + $0x9] sm:$0x1] %vm4449_vm6, %v6746_v0  ;;  %4461 = vst.msk [vmem:[#allocation4 + $0x19] sm:$0x1] %vm4449_vm6, %v6746_v0 }
 0x198   : > { %1402 = vst.msk [vmem:[#allocation5 + $0x78] sm:$0xff] %vm1386_vm9, %v1369_v42  ;;  %v1496_v41 = vpop.permute.xlu0 %1495  ;;  %vm4538_vm9 = vcmask 1043459  }
 0x199   : > { %1530 = vst.msk [vmem:[#allocation5 + $0x70] sm:$0xff] %vm1515_vm10, %v1496_v41 }
 0x19a   : > { %4462 = vst.msk [vmem:[#allocation4 + $0x29] sm:$0x1] %vm4449_vm6, %v6746_v0  ;;  %4463 = vst.msk [vmem:[#allocation4 + $0x39] sm:$0x1] %vm4449_vm6, %v6746_v0 }
 0x19b   : > { %v1498_v45 = vpop.permute.xlu1 %1497  ;;  %v6446_v46 = vpop.f32.mrb[0].mxu0  ;;  %4464 = vst.msk [vmem:[#allocation4 + $0x49] sm:$0x1] %vm4449_vm6, %v6746_v0  ;;  %4465 = vst.msk [vmem:[#allocation4 + $0x59] sm:$0x1] %vm4449_vm6, %v6746_v0 }
 0x19c   : > { %1531 = vst.msk [vmem:[#allocation5 + $0x78] sm:$0xff] %vm1515_vm10, %v1498_v45  ;;  %v1800_v47 = vadd.f32 %v6446_v46, %v7522_v5  ;;  %v1791_v48 = vpop.f32.mrb[1].mxu0  ;;  %v1625_v57 = vpop.permute.xlu0 %1624  ;;  %vm4540_vm10 = vcmask 1044484  }
 0x19d   : > { %v1792_v49 = vadd.f32 %v7522_v5, %v1791_v48  ;;  %v6447_v50 = vpop.f32.mrb[2].mxu0  ;;  %1659 = vst.msk [vmem:[#allocation5 + $0x70] sm:$0xff] %vm1644_vm11, %v1625_v57 }
 0x19e   : > { %v1920_v54 = vmax.f32 %v1800_v47, 0.0  ;;  %v1803_v55 = vadd.f32 %v6447_v50, %v7522_v5  ;;  %v1794_v52 = vpop.f32.mrb[3].mxu0  ;;  %4466 = vst.msk [vmem:[#allocation4 + $0x69] sm:$0x1] %vm4449_vm6, %v6746_v0  ;;  %4467 = vst.msk [vmem:[#allocation4 + $0x79] sm:$0x1] %vm4449_vm6, %v6746_v0 }
 0x19f   : > { %v1918_v20 = vmax.f32 %v1792_v49, 0.0  ;;  %v1795_v59 = vadd.f32 %v7522_v5, %v1794_v52  ;;  %v1627_v53 = vpop.permute.xlu1 %1626  ;;  %4468 = vst.msk [vmem:[#allocation4 + $0x89] sm:$0x1] %vm4449_vm6, %v6746_v0  ;;  %4469 = vst.msk [vmem:[#allocation4 + $0x99] sm:$0x1] %vm4449_vm6, %v6746_v0 }
 0x1a0   : > { %1999 = vst.msk [vmem:[#allocation3 + $0x31] sm:$0xff] %vm1950_vm13, %v1920_v54  ;;  %v1921_v61 = vmax.f32 %v1803_v55, 0.0 }
 0x1a1   : > { %1660 = vst.msk [vmem:[#allocation5 + $0x78] sm:$0xff] %vm1644_vm11, %v1627_v53  ;;  %v1919_v62 = vmax.f32 %v1795_v59, 0.0  ;;  %vm4542_vm11 = vcmask 1045509  }
 0x1a2   : > { %1997 = vst.msk [vmem:[#allocation3 + $0x19] sm:$0xff] %vm1950_vm13, %v1918_v20  ;;  %2000 = vst.msk [vmem:[#allocation3 + $0x39] sm:$0xff] %vm1950_vm13, %v1921_v61 }
 0x1a3   : > { %1998 = vst.msk [vmem:[#allocation3 + $0x21] sm:$0xff] %vm1950_vm13, %v1919_v62  ;;  %v2158_v4 = vpop.permute.xlu1 %2157 }
 0x1a4   : > { %2206 = vst.msk [vmem:[#allocation6] sm:$0xff] %vm2205_vm0, %v2158_v4  ;;  %v1675_v7 = vld [vmem:[#allocation5 + $0x70] sm:$0xff] }
 0x1a5   : > { %6472 = vmatprep.mubr.msk.bf16.mxu0 %vm1704_vm12, %v1675_v7 }
 0x1a7   : > { %v2287_v9 = vpop.permute.xlu1 %2286  ;;  %v2673_v10 = vld [vmem:[#allocation3 + $0x30] sm:$0xff] }
 0x1a8   : > { %v1676_v56 = vld [vmem:[#allocation5 + $0x78] sm:$0xff]  ;;  %v2801_v11 = vld [vmem:[#allocation3 + $0x31] sm:$0xff]  ;;  %2335 = vst.msk [vmem:[#allocation6] sm:$0xff] %vm2334_vm1, %v2287_v9 }
 0x1a9   : > { %6473 = vmatmul.mubr.msk.bf16.gmra.mrb[28].mxu0 %vm1704_vm12, %v1676_v56  ;;  %v2929_v12 = vld [vmem:[#allocation3 + $0x32] sm:$0xff]  ;;  %v2930_v3 = vld [vmem:[#allocation3 + $0x3a] sm:$0xff]  ;;  %vm4544_vm12 = vcmask 1046534  }
 0x1aa   : > { %v2674_v13 = vld [vmem:[#allocation3 + $0x38] sm:$0xff]  ;;  %v2961_v14 = vpack.c.bf16 %v2930_v3, %v2929_v12  ;;  %v2352_v18 = vld [vmem:[#allocation3 + $0x20] sm:$0xff] }
 0x1ab   : > { %v2705_v23 = vpack.c.bf16 %v2674_v13, %v2673_v10  ;;  %v2802_v15 = vld [vmem:[#allocation3 + $0x39] sm:$0xff]  ;;  %v2096_v19 = vld [vmem:[#allocation3 + $0x21] sm:$0xff] }
 0x1ac   : > { %v2351_v16 = vld [vmem:[#allocation3 + $0x18] sm:$0xff]  ;;  %v2833_v60 = vpack.c.bf16 %v2802_v15, %v2801_v11  ;;  %2977 = vst.msk [vmem:[#allocation6 + $0x10] sm:$0xff] %vm1950_vm13, %v2961_v14  ;;  %v2545_v31 = vld [vmem:[#allocation3 + $0x22] sm:$0xff] }
 0x1ad   : > { %v2095_v17 = vld [vmem:[#allocation3 + $0x19] sm:$0xff]  ;;  %2737 = vrot.lane.b32.xlu0 %v2705_v23, %s6755_s2  ;;  %2417 = vrot.lane.b32.xlu1 %v2705_v23, %s6756_s24  ;;  %v2383_v22 = vpack.c.bf16 %v2352_v18, %v2351_v16  ;;  %2079 = vst.msk [vmem:[#allocation6 + $0x30] sm:$0xff] %vm1950_vm13, %v2705_v23 }
 0x1ae   : > { %v2126_v24 = vpack.c.bf16 %v2096_v19, %v2095_v17  ;;  %2529 = vst.msk [vmem:[#allocation6 + $0x20] sm:$0xff] %vm1950_vm13, %v2833_v60  ;;  %v2544_v29 = vld [vmem:[#allocation3 + $0x1a] sm:$0xff] }
 0x1af   : > { %2078 = vst.msk [vmem:[#allocation6 + $0x18] sm:$0xff] %vm1950_vm13, %v2383_v22  ;;  %v2576_v32 = vpack.c.bf16 %v2545_v31, %v2544_v29 }
 0x1b0   : > { %2528 = vst.msk [vmem:[#allocation6 + $0x8] sm:$0xff] %vm1950_vm13, %v2126_v24 }
 0x1b1   : > { %2865 = vrot.lane.b32.xlu0 %v2833_v60, %s6756_s24  ;;  %2161 = vrot.lane.b32.xlu1 %v2833_v60, %s8802_s0 }
 0x1b3   : > { %v2995_v28 = vld [vmem:[#allocation6 + $0x10] sm:$0xff] }
 0x1b4   : > { %6480 = vmatprep.mubr.msk.bf16.mxu0 %vm1950_vm13, %v2995_v28 }
 0x1b5   : > { %2610 = vrot.lane.b32.xlu0 %v2961_v14, %s8802_s0  ;;  %2290 = vrot.lane.b32.xlu1 %v2961_v14, %s6755_s2 }
 0x1b9   : > { %2608 = vrot.lane.b32.xlu0 %v2576_v32, %s8802_s0  ;;  %2415 = vrot.lane.b32.xlu1 %v2383_v22, %s6756_s24 }
 0x1bb   : > { %v6450_v33 = vpop.f32.mrb[4].mxu0 }
 0x1bc   : > { %v1816_v34 = vadd.f32 %v6450_v33, %v7522_v5  ;;  %v1807_v35 = vpop.f32.mrb[5].mxu0 }
 0x1bd   : > { %v1808_v36 = vadd.f32 %v7522_v5, %v1807_v35  ;;  %2159 = vrot.lane.b32.xlu1 %v2126_v24, %s8802_s0  ;;  %v6451_v37 = vpop.f32.mrb[6].mxu0 }
 0x1be   : > { %v1924_v38 = vmax.f32 %v1816_v34, 0.0  ;;  %v1819_v39 = vadd.f32 %v6451_v37, %v7522_v5  ;;  %v1810_v40 = vpop.f32.mrb[7].mxu0 }
 0x1bf   : > { %v1922_v42 = vmax.f32 %v1808_v36, 0.0  ;;  %v1811_v43 = vadd.f32 %v7522_v5, %v1810_v40 }
 0x1c0   : > { %2003 = vst.msk [vmem:[#allocation3 + $0x61] sm:$0xff] %vm1950_vm13, %v1924_v38  ;;  %v1925_v41 = vmax.f32 %v1819_v39, 0.0 }
 0x1c1   : > { %2001 = vst.msk [vmem:[#allocation3 + $0x49] sm:$0xff] %vm1950_vm13, %v1922_v42  ;;  %v1923_v44 = vmax.f32 %v1811_v43, 0.0  ;;  %2288 = vrot.lane.b32.xlu1 %v2576_v32, %s6755_s2 }
 0x1c2   : > { %2004 = vst.msk [vmem:[#allocation3 + $0x69] sm:$0xff] %vm1950_vm13, %v1925_v41 }
 0x1c3   : > { %2002 = vst.msk [vmem:[#allocation3 + $0x51] sm:$0xff] %vm1950_vm13, %v1923_v44 }
 0x1c7   : > { %v2677_v45 = vld [vmem:[#allocation3 + $0x60] sm:$0xff] }
 0x1c8   : > { %v2805_v46 = vld [vmem:[#allocation3 + $0x61] sm:$0xff]  ;;  %v2803_v53 = vld [vmem:[#allocation3 + $0x49] sm:$0xff] }
 0x1c9   : > { %v2933_v47 = vld [vmem:[#allocation3 + $0x62] sm:$0xff]  ;;  %v2934_v48 = vld [vmem:[#allocation3 + $0x6a] sm:$0xff] }
 0x1ca   : > { %v2678_v49 = vld [vmem:[#allocation3 + $0x68] sm:$0xff]  ;;  %v2963_v51 = vpack.c.bf16 %v2934_v48, %v2933_v47  ;;  %v2932_v55 = vld [vmem:[#allocation3 + $0x52] sm:$0xff] }
 0x1cb   : > { %v2675_v50 = vld [vmem:[#allocation3 + $0x48] sm:$0xff]  ;;  %v2707_v57 = vpack.c.bf16 %v2678_v49, %v2677_v45  ;;  %v2676_v59 = vld [vmem:[#allocation3 + $0x50] sm:$0xff] }
 0x1cc   : > { %v2931_v54 = vld [vmem:[#allocation3 + $0x4a] sm:$0xff]  ;;  %2979 = vst.msk [vmem:[#allocation6 + $0x40] sm:$0xff] %vm1950_vm13, %v2963_v51  ;;  %v2706_v62 = vpack.c.bf16 %v2676_v59, %v2675_v50 }
 0x1cd   : > { %v2806_v52 = vld [vmem:[#allocation3 + $0x69] sm:$0xff]  ;;  %v2962_v58 = vpack.c.bf16 %v2932_v55, %v2931_v54  ;;  %v2804_v61 = vld [vmem:[#allocation3 + $0x51] sm:$0xff]  ;;  %2741 = vrot.lane.b32.xlu0 %v2707_v57, %s6755_s2  ;;  %2421 = vrot.lane.b32.xlu1 %v2707_v57, %s6756_s24  ;;  %2081 = vst.msk [vmem:[#allocation6 + $0x60] sm:$0xff] %vm1950_vm13, %v2707_v57 }
 0x1ce   : > { %v2835_v20 = vpack.c.bf16 %v2806_v52, %v2805_v46  ;;  %v2834_v1 = vpack.c.bf16 %v2804_v61, %v2803_v53  ;;  %2080 = vst.msk [vmem:[#allocation6 + $0x48] sm:$0xff] %vm1950_vm13, %v2706_v62 }
 0x1cf   : > { %2978 = vst.msk [vmem:[#allocation6 + $0x28] sm:$0xff] %vm1950_vm13, %v2962_v58 }
 0x1d0   : > { %2531 = vst.msk [vmem:[#allocation6 + $0x50] sm:$0xff] %vm1950_vm13, %v2835_v20  ;;  %2530 = vst.msk [vmem:[#allocation6 + $0x38] sm:$0xff] %vm1950_vm13, %v2834_v1 }
 0x1d1   : > { %2869 = vrot.lane.b32.xlu0 %v2835_v20, %s6756_s24  ;;  %2165 = vrot.lane.b32.xlu1 %v2835_v20, %s8802_s0 }
 0x1d3   : > { %v3001_v4 = vld [vmem:[#allocation6 + $0x40] sm:$0xff] }
 0x1d5   : > { %2614 = vrot.lane.b32.xlu0 %v2963_v51, %s8802_s0  ;;  %2294 = vrot.lane.b32.xlu1 %v2963_v51, %s6755_s2 }
 0x1d6   : > { %v2998_v2 = vld [vmem:[#allocation6 + $0x28] sm:$0xff] }
 0x1d7   : > { %6481 = vmatmul.mubr.msk.bf16.vlgmr.msra.gmra.mrb[32].mxu0 %vm1950_vm13, %v2998_v2 }
 0x1d8   : > { %6484 = vmatprep.mubr.msk.bf16.mxu0 %vm1950_vm13, %v3001_v4 }
 0x1d9   : > { %2739 = vrot.lane.b32.xlu0 %v2706_v62, %s6755_s2  ;;  %2419 = vrot.lane.b32.xlu1 %v2706_v62, %s6756_s24 }
 0x1db   : > { %v6454_v6 = vpop.f32.mrb[8].mxu0 }
 0x1dc   : > { %v1832_v7 = vadd.f32 %v6454_v6, %v7522_v5  ;;  %v1823_v8 = vpop.f32.mrb[9].mxu0 }
 0x1dd   : > { %2867 = vrot.lane.b32.xlu0 %v2834_v1, %s6756_s24  ;;  %2163 = vrot.lane.b32.xlu1 %v2834_v1, %s8802_s0  ;;  %v1824_v56 = vadd.f32 %v7522_v5, %v1823_v8  ;;  %v6455_v9 = vpop.f32.mrb[10].mxu0 }
 0x1de   : > { %v1928_v10 = vmax.f32 %v1832_v7, 0.0  ;;  %v1835_v11 = vadd.f32 %v6455_v9, %v7522_v5  ;;  %v1826_v12 = vpop.f32.mrb[11].mxu0 }
 0x1df   : > { %v1926_v3 = vmax.f32 %v1824_v56, 0.0  ;;  %v1827_v13 = vadd.f32 %v7522_v5, %v1826_v12 }
 0x1e0   : > { %2007 = vst.msk [vmem:[#allocation3 + $0x91] sm:$0xff] %vm1950_vm13, %v1928_v10  ;;  %v1929_v14 = vmax.f32 %v1835_v11, 0.0 }
 0x1e1   : > { %2612 = vrot.lane.b32.xlu0 %v2962_v58, %s8802_s0  ;;  %2292 = vrot.lane.b32.xlu1 %v2962_v58, %s6755_s2  ;;  %2005 = vst.msk [vmem:[#allocation3 + $0x79] sm:$0xff] %vm1950_vm13, %v1926_v3  ;;  %v1927_v23 = vmax.f32 %v1827_v13, 0.0 }
 0x1e2   : > { %2008 = vst.msk [vmem:[#allocation3 + $0x99] sm:$0xff] %vm1950_vm13, %v1929_v14 }
 0x1e3   : > { %2006 = vst.msk [vmem:[#allocation3 + $0x81] sm:$0xff] %vm1950_vm13, %v1927_v23 }
 0x1e7   : > { %v2681_v15 = vld [vmem:[#allocation3 + $0x90] sm:$0xff] }
 0x1e8   : > { %v2809_v16 = vld [vmem:[#allocation3 + $0x91] sm:$0xff]  ;;  %v2807_v28 = vld [vmem:[#allocation3 + $0x79] sm:$0xff] }
 0x1e9   : > { %v2937_v17 = vld [vmem:[#allocation3 + $0x92] sm:$0xff]  ;;  %v2938_v60 = vld [vmem:[#allocation3 + $0x9a] sm:$0xff] }
 0x1ea   : > { %v2682_v18 = vld [vmem:[#allocation3 + $0x98] sm:$0xff]  ;;  %v2965_v21 = vpack.c.bf16 %v2938_v60, %v2937_v17  ;;  %v2936_v24 = vld [vmem:[#allocation3 + $0x82] sm:$0xff] }
 0x1eb   : > { %v2679_v19 = vld [vmem:[#allocation3 + $0x78] sm:$0xff]  ;;  %v2709_v25 = vpack.c.bf16 %v2682_v18, %v2681_v15  ;;  %v2680_v63 = vld [vmem:[#allocation3 + $0x80] sm:$0xff] }
 0x1ec   : > { %v2935_v22 = vld [vmem:[#allocation3 + $0x7a] sm:$0xff]  ;;  %2981 = vst.msk [vmem:[#allocation6 + $0x70] sm:$0xff] %vm1950_vm13, %v2965_v21  ;;  %v2708_v31 = vpack.c.bf16 %v2680_v63, %v2679_v19 }
 0x1ed   : > { %v2810_v26 = vld [vmem:[#allocation3 + $0x99] sm:$0xff]  ;;  %v2964_v30 = vpack.c.bf16 %v2936_v24, %v2935_v22  ;;  %v2808_v29 = vld [vmem:[#allocation3 + $0x81] sm:$0xff]  ;;  %2745 = vrot.lane.b32.xlu0 %v2709_v25, %s6755_s2  ;;  %2425 = vrot.lane.b32.xlu1 %v2709_v25, %s6756_s24  ;;  %2083 = vst.msk [vmem:[#allocation6 + $0x90] sm:$0xff] %vm1950_vm13, %v2709_v25 }
 0x1ee   : > { %v2837_v27 = vpack.c.bf16 %v2810_v26, %v2809_v16  ;;  %v2836_v32 = vpack.c.bf16 %v2808_v29, %v2807_v28  ;;  %2082 = vst.msk [vmem:[#allocation6 + $0x78] sm:$0xff] %vm1950_vm13, %v2708_v31 }
 0x1ef   : > { %2980 = vst.msk [vmem:[#allocation6 + $0x58] sm:$0xff] %vm1950_vm13, %v2964_v30 }
 0x1f0   : > { %2533 = vst.msk [vmem:[#allocation6 + $0x80] sm:$0xff] %vm1950_vm13, %v2837_v27  ;;  %2532 = vst.msk [vmem:[#allocation6 + $0x68] sm:$0xff] %vm1950_vm13, %v2836_v32 }
 0x1f1   : > { %2873 = vrot.lane.b32.xlu0 %v2837_v27, %s6756_s24  ;;  %2169 = vrot.lane.b32.xlu1 %v2837_v27, %s8802_s0 }
 0x1f3   : > { %v3007_v34 = vld [vmem:[#allocation6 + $0x70] sm:$0xff] }
 0x1f5   : > { %2618 = vrot.lane.b32.xlu0 %v2965_v21, %s8802_s0  ;;  %2298 = vrot.lane.b32.xlu1 %v2965_v21, %s6755_s2 }
 0x1f6   : > { %v3004_v33 = vld [vmem:[#allocation6 + $0x58] sm:$0xff] }
 0x1f7   : > { %6485 = vmatmul.mubr.msk.bf16.gmra.mrb[36].mxu0 %vm1950_vm13, %v3004_v33 }
 0x1f8   : > { %6488 = vmatprep.mubr.msk.bf16.mxu0 %vm1950_vm13, %v3007_v34 }
 0x1f9   : > { %2743 = vrot.lane.b32.xlu0 %v2708_v31, %s6755_s2  ;;  %2423 = vrot.lane.b32.xlu1 %v2708_v31, %s6756_s24 }
 0x1fb   : > { %v6458_v35 = vpop.f32.mrb[12].mxu0 }
 0x1fc   : > { %v1848_v36 = vadd.f32 %v6458_v35, %v7522_v5  ;;  %v1839_v37 = vpop.f32.mrb[13].mxu0 }
 0x1fd   : > { %2871 = vrot.lane.b32.xlu0 %v2836_v32, %s6756_s24  ;;  %2167 = vrot.lane.b32.xlu1 %v2836_v32, %s8802_s0  ;;  %v1840_v38 = vadd.f32 %v7522_v5, %v1839_v37  ;;  %v6459_v39 = vpop.f32.mrb[14].mxu0 }
 0x1fe   : > { %v1932_v40 = vmax.f32 %v1848_v36, 0.0  ;;  %v1851_v42 = vadd.f32 %v6459_v39, %v7522_v5  ;;  %v1842_v43 = vpop.f32.mrb[15].mxu0 }
 0x1ff   : > { %v1930_v41 = vmax.f32 %v1840_v38, 0.0  ;;  %v1843_v44 = vadd.f32 %v7522_v5, %v1842_v43 }
 0x200   : > { %2011 = vst.msk [vmem:[#allocation3 + $0xc1] sm:$0xff] %vm1950_vm13, %v1932_v40  ;;  %v1933_v45 = vmax.f32 %v1851_v42, 0.0 }
 0x201   : > { %2616 = vrot.lane.b32.xlu0 %v2964_v30, %s8802_s0  ;;  %2296 = vrot.lane.b32.xlu1 %v2964_v30, %s6755_s2  ;;  %2009 = vst.msk [vmem:[#allocation3 + $0xa9] sm:$0xff] %vm1950_vm13, %v1930_v41  ;;  %v1931_v46 = vmax.f32 %v1843_v44, 0.0 }
 0x202   : > { %2012 = vst.msk [vmem:[#allocation3 + $0xc9] sm:$0xff] %vm1950_vm13, %v1933_v45 }
 0x203   : > { %2010 = vst.msk [vmem:[#allocation3 + $0xb1] sm:$0xff] %vm1950_vm13, %v1931_v46 }
 0x207   : > { %v2685_v47 = vld [vmem:[#allocation3 + $0xc0] sm:$0xff] }
 0x208   : > { %v2683_v51 = vld [vmem:[#allocation3 + $0xa8] sm:$0xff]  ;;  %v2045_v55 = vld [vmem:[#allocation3 + $0xc0] sm:$0xff] }
 0x209   : > { %v2941_v48 = vld [vmem:[#allocation3 + $0xc2] sm:$0xff]  ;;  %v2942_v49 = vld [vmem:[#allocation3 + $0xca] sm:$0xff] }
 0x20a   : > { %v2686_v50 = vld [vmem:[#allocation3 + $0xc8] sm:$0xff]  ;;  %v2967_v57 = vpack.c.bf16 %v2942_v49, %v2941_v48  ;;  %v2940_v58 = vld [vmem:[#allocation3 + $0xb2] sm:$0xff] }
 0x20b   : > { %v2811_v54 = vld [vmem:[#allocation3 + $0xa9] sm:$0xff]  ;;  %v2711_v20 = vpack.c.bf16 %v2686_v50, %v2685_v47  ;;  %v2812_v62 = vld [vmem:[#allocation3 + $0xb1] sm:$0xff]  ;;  %v2494_v7 = vld [vmem:[#allocation3 + $0xc1] sm:$0xff] }
 0x20c   : > { %v2939_v52 = vld [vmem:[#allocation3 + $0xaa] sm:$0xff]  ;;  %2983 = vst.msk [vmem:[#allocation6 + $0xa0] sm:$0xff] %vm1950_vm13, %v2967_v57  ;;  %v2838_v4 = vpack.c.bf16 %v2812_v62, %v2811_v54  ;;  %v2813_v56 = vld [vmem:[#allocation3 + $0xc1] sm:$0xff] }
 0x20d   : > { %v2814_v59 = vld [vmem:[#allocation3 + $0xc9] sm:$0xff]  ;;  %v2966_v53 = vpack.c.bf16 %v2940_v58, %v2939_v52  ;;  %2749 = vrot.lane.b32.xlu0 %v2711_v20, %s6755_s2  ;;  %2429 = vrot.lane.b32.xlu1 %v2711_v20, %s6756_s24 }
 0x20e   : > { %v2684_v61 = vld [vmem:[#allocation3 + $0xb0] sm:$0xff]  ;;  %v2046_v1 = vld [vmem:[#allocation3 + $0xc8] sm:$0xff]  ;;  %v2839_v10 = vpack.c.bf16 %v2814_v59, %v2813_v56  ;;  %2534 = vst.msk [vmem:[#allocation6 + $0x98] sm:$0xff] %vm1950_vm13, %v2838_v4 }
 0x20f   : > { %v2710_v2 = vpack.c.bf16 %v2684_v61, %v2683_v51  ;;  %v2069_v6 = vpack.c.bf16 %v2046_v1, %v2045_v55  ;;  %v2495_v8 = vld [vmem:[#allocation3 + $0xc9] sm:$0xff]  ;;  %2982 = vst.msk [vmem:[#allocation6 + $0x88] sm:$0xff] %vm1950_vm13, %v2966_v53 }
 0x210   : > { %v2519_v9 = vpack.c.bf16 %v2495_v8, %v2494_v7 }
 0x211   : > { %2085 = vst.msk [vmem:[#allocation6 + $0xc0] sm:$0xff] %vm1950_vm13, %v2069_v6  ;;  %2084 = vst.msk [vmem:[#allocation6 + $0xa8] sm:$0xff] %vm1950_vm13, %v2710_v2  ;;  %2877 = vrot.lane.b32.xlu0 %v2839_v10, %s6756_s24  ;;  %2173 = vrot.lane.b32.xlu1 %v2839_v10, %s8802_s0 }
 0x212   : > { %2535 = vst.msk [vmem:[#allocation6 + $0xb0] sm:$0xff] %vm1950_vm13, %v2519_v9 }
 0x213   : > { %v3013_v12 = vld [vmem:[#allocation6 + $0xa0] sm:$0xff] }
 0x215   : > { %2622 = vrot.lane.b32.xlu0 %v2967_v57, %s8802_s0  ;;  %2302 = vrot.lane.b32.xlu1 %v2967_v57, %s6755_s2 }
 0x216   : > { %v3010_v11 = vld [vmem:[#allocation6 + $0x88] sm:$0xff] }
 0x217   : > { %6489 = vmatmul.mubr.msk.bf16.gmra.mrb[40].mxu0 %vm1950_vm13, %v3010_v11 }
 0x218   : > { %6492 = vmatprep.mubr.msk.bf16.mxu0 %vm1950_vm13, %v3013_v12 }
 0x219   : > { %2747 = vrot.lane.b32.xlu0 %v2710_v2, %s6755_s2  ;;  %2427 = vrot.lane.b32.xlu1 %v2710_v2, %s6756_s24 }
 0x21b   : > { %v6462_v3 = vpop.f32.mrb[16].mxu0 }
 0x21c   : > { %v1864_v13 = vadd.f32 %v6462_v3, %v7522_v5  ;;  %v1855_v14 = vpop.f32.mrb[17].mxu0 }
 0x21d   : > { %2875 = vrot.lane.b32.xlu0 %v2838_v4, %s6756_s24  ;;  %2171 = vrot.lane.b32.xlu1 %v2838_v4, %s8802_s0  ;;  %v1856_v23 = vadd.f32 %v7522_v5, %v1855_v14  ;;  %v6463_v15 = vpop.f32.mrb[18].mxu0 }
 0x21e   : > { %v1936_v16 = vmax.f32 %v1864_v13, 0.0  ;;  %v1867_v17 = vadd.f32 %v6463_v15, %v7522_v5  ;;  %v1858_v21 = vpop.f32.mrb[19].mxu0 }
 0x21f   : > { %v2738_v60 = vpop.permute.xlu0 %2737  ;;  %v2418_v18 = vpop.permute.xlu1 %2417  ;;  %v1934_v19 = vmax.f32 %v1856_v23, 0.0  ;;  %v1859_v24 = vadd.f32 %v7522_v5, %v1858_v21 }
 0x220   : > { %2015 = vst.msk [vmem:[#allocation3 + $0xf1] sm:$0xff] %vm1950_vm13, %v1936_v16  ;;  %v1937_v22 = vmax.f32 %v1867_v17, 0.0 }
 0x221   : > { %2620 = vrot.lane.b32.xlu0 %v2966_v53, %s8802_s0  ;;  %2300 = vrot.lane.b32.xlu1 %v2966_v53, %s6755_s2  ;;  %2013 = vst.msk [vmem:[#allocation3 + $0xd9] sm:$0xff] %vm1950_vm13, %v1934_v19  ;;  %v1935_v25 = vmax.f32 %v1859_v24, 0.0 }
 0x222   : > { %2016 = vst.msk [vmem:[#allocation3 + $0xf9] sm:$0xff] %vm1950_vm13, %v1937_v22 }
 0x223   : > { %v2866_v26 = vpop.permute.xlu0 %2865  ;;  %v2162_v30 = vpop.permute.xlu1 %2161  ;;  %2014 = vst.msk [vmem:[#allocation3 + $0xe1] sm:$0xff] %vm1950_vm13, %v1935_v25 }
 0x224   : > { %2208 = vst.msk [vmem:[#allocation6 + $0x30] sm:$0xff] %vm2205_vm0, %v2162_v30 }
 0x227   : > { %v2611_v27 = vpop.permute.xlu0 %2610  ;;  %v2291_v63 = vpop.permute.xlu1 %2290  ;;  %v2689_v28 = vld [vmem:[#allocation3 + $0xf0] sm:$0xff] }
 0x228   : > { %2657 = vst.msk [vmem:[#allocation6 + $0x20] sm:$0xff] %vm2205_vm0, %v2611_v27  ;;  %v2817_v36 = vld [vmem:[#allocation3 + $0xf1] sm:$0xff]  ;;  %v2815_v46 = vld [vmem:[#allocation3 + $0xd9] sm:$0xff] }
 0x229   : > { %2337 = vst.msk [vmem:[#allocation6 + $0x30] sm:$0xff] %vm2334_vm1, %v2291_v63  ;;  %v2945_v29 = vld [vmem:[#allocation3 + $0xf2] sm:$0xff]  ;;  %v2946_v31 = vld [vmem:[#allocation3 + $0xfa] sm:$0xff] }
 0x22a   : > { %v2690_v32 = vld [vmem:[#allocation3 + $0xf8] sm:$0xff]  ;;  %v2969_v33 = vpack.c.bf16 %v2946_v31, %v2945_v29  ;;  %v2944_v40 = vld [vmem:[#allocation3 + $0xe2] sm:$0xff] }
 0x22b   : > { %v2609_v34 = vpop.permute.xlu0 %2608  ;;  %v2713_v35 = vpack.c.bf16 %v2690_v32, %v2689_v28  ;;  %v2818_v37 = vld [vmem:[#allocation3 + $0xf9] sm:$0xff]  ;;  %v2416_v42 = vpop.permute.xlu1 %2415  ;;  %v2816_v47 = vld [vmem:[#allocation3 + $0xe1] sm:$0xff] }
 0x22c   : > { %v2687_v38 = vld [vmem:[#allocation3 + $0xd8] sm:$0xff]  ;;  %2656 = vst.msk [vmem:[#allocation6 + $0x8] sm:$0xff] %vm2205_vm0, %v2609_v34  ;;  %v2841_v43 = vpack.c.bf16 %v2818_v37, %v2817_v36  ;;  %v2688_v41 = vld [vmem:[#allocation3 + $0xe0] sm:$0xff]  ;;  %v2840_v48 = vpack.c.bf16 %v2816_v47, %v2815_v46 }
 0x22d   : > { %v2943_v39 = vld [vmem:[#allocation3 + $0xda] sm:$0xff]  ;;  %2985 = vst.msk [vmem:[#allocation6 + $0xd0] sm:$0xff] %vm1950_vm13, %v2969_v33  ;;  %2753 = vrot.lane.b32.xlu0 %v2713_v35, %s6755_s2  ;;  %2433 = vrot.lane.b32.xlu1 %v2713_v35, %s6756_s24  ;;  %v2712_v45 = vpack.c.bf16 %v2688_v41, %v2687_v38  ;;  %2087 = vst.msk [vmem:[#allocation6 + $0xf0] sm:$0xff] %vm1950_vm13, %v2713_v35 }
 0x22e   : > { %v2968_v44 = vpack.c.bf16 %v2944_v40, %v2943_v39  ;;  %2785 = vst.msk [vmem:[#allocation6 + $0x8] sm:$0xff] %vm2334_vm1, %v2738_v60 }
 0x22f   : > { %2464 = vst.msk [vmem:[#allocation6] sm:$0xff] %vm2463_vm2, %v2416_v42  ;;  %2913 = vst.msk [vmem:[#allocation6 + $0x8] sm:$0xff] %vm2463_vm2, %v2866_v26  ;;  %v2160_v49 = vpop.permute.xlu1 %2159 }
 0x230   : > { %2537 = vst.msk [vmem:[#allocation6 + $0xe0] sm:$0xff] %vm1950_vm13, %v2841_v43  ;;  %2984 = vst.msk [vmem:[#allocation6 + $0xb8] sm:$0xff] %vm1950_vm13, %v2968_v44 }
 0x231   : > { %2086 = vst.msk [vmem:[#allocation6 + $0xd8] sm:$0xff] %vm1950_vm13, %v2712_v45  ;;  %2536 = vst.msk [vmem:[#allocation6 + $0xc8] sm:$0xff] %vm1950_vm13, %v2840_v48  ;;  %2881 = vrot.lane.b32.xlu0 %v2841_v43, %s6756_s24  ;;  %2177 = vrot.lane.b32.xlu1 %v2841_v43, %s8802_s0 }
 0x232   : > { %2207 = vst.msk [vmem:[#allocation6 + $0x18] sm:$0xff] %vm2205_vm0, %v2160_v49 }
 0x233   : > { %v2289_v50 = vpop.permute.xlu1 %2288 }
 0x234   : > { %2336 = vst.msk [vmem:[#allocation6 + $0x18] sm:$0xff] %vm2334_vm1, %v2289_v50  ;;  %v3019_v57 = vld [vmem:[#allocation6 + $0xd0] sm:$0xff] }
 0x235   : > { %2626 = vrot.lane.b32.xlu0 %v2969_v33, %s8802_s0  ;;  %2306 = vrot.lane.b32.xlu1 %v2969_v33, %s6755_s2  ;;  %2465 = vst.msk [vmem:[#allocation6 + $0x18] sm:$0xff] %vm2463_vm2, %v2418_v18 }
 0x236   : > { %v2994_v51 = vld [vmem:[#allocation6 + $0x8] sm:$0xff]  ;;  %v2993_v55 = vld [vmem:[#allocation6] sm:$0xff] }
 0x237   : > { %3272 = vmatprep.mubr.bf16.mxu1 %v2994_v51  ;;  %v3016_v54 = vld [vmem:[#allocation6 + $0xb8] sm:$0xff] }
 0x238   : > { %6493 = vmatmul.mubr.msk.bf16.gmra.mrb[44].mxu0 %vm1950_vm13, %v3016_v54  ;;  %3273 = vmatmul.mubr.bf16.vlgmr.msra.gmra.mrb[0].mxu1 %v2993_v55 }
 0x239   : > { %6496 = vmatprep.mubr.msk.bf16.mxu0 %vm1950_vm13, %v3019_v57  ;;  %2751 = vrot.lane.b32.xlu0 %v2712_v45, %s6755_s2 }
 0x23a   : > { %2431 = vrot.lane.b32.xlu1 %v2712_v45, %s6756_s24 }
 0x23b   : > { %v6466_v52 = vpop.f32.mrb[20].mxu0 }
 0x23c   : > { %v1880_v58 = vadd.f32 %v6466_v52, %v7522_v5  ;;  %v1871_v20 = vpop.f32.mrb[21].mxu0  ;;  %v2996_v38 = vld [vmem:[#allocation6 + $0x18] sm:$0xff] }
 0x23d   : > { %2879 = vrot.lane.b32.xlu0 %v2840_v48, %s6756_s24  ;;  %v1872_v59 = vadd.f32 %v7522_v5, %v1871_v20  ;;  %v6467_v53 = vpop.f32.mrb[22].mxu0 }
 0x23e   : > { %2175 = vrot.lane.b32.xlu1 %v2840_v48, %s8802_s0  ;;  %v1940_v61 = vmax.f32 %v1880_v58, 0.0  ;;  %v1883_v62 = vadd.f32 %v6467_v53, %v7522_v5  ;;  %v1874_v1 = vpop.f32.mrb[23].mxu0 }
 0x23f   : > { %v2742_v2 = vpop.permute.xlu0 %2741  ;;  %v1938_v4 = vmax.f32 %v1872_v59, 0.0  ;;  %v1875_v6 = vadd.f32 %v7522_v5, %v1874_v1  ;;  %v2422_v7 = vpop.permute.xlu1 %2421 }
 0x240   : > { %2019 = vst.msk [vmem:[#allocation3 + $0x121] sm:$0xff] %vm1950_vm13, %v1940_v61  ;;  %v1941_v8 = vmax.f32 %v1883_v62, 0.0 }
 0x241   : > { %2624 = vrot.lane.b32.xlu0 %v2968_v44, %s8802_s0  ;;  %2017 = vst.msk [vmem:[#allocation3 + $0x109] sm:$0xff] %vm1950_vm13, %v1938_v4  ;;  %v1939_v56 = vmax.f32 %v1875_v6, 0.0 }
 0x242   : > { %2304 = vrot.lane.b32.xlu1 %v2968_v44, %s6755_s2  ;;  %2020 = vst.msk [vmem:[#allocation3 + $0x129] sm:$0xff] %vm1950_vm13, %v1941_v8 }
 0x243   : > { %v2870_v9 = vpop.permute.xlu0 %2869  ;;  %2018 = vst.msk [vmem:[#allocation3 + $0x111] sm:$0xff] %vm1950_vm13, %v1939_v56  ;;  %v2166_v10 = vpop.permute.xlu1 %2165 }
 0x244   : > { %2210 = vst.msk [vmem:[#allocation6 + $0x60] sm:$0xff] %vm2205_vm0, %v2166_v10 }
 0x247   : > { %v2615_v11 = vpop.permute.xlu0 %2614  ;;  %v2295_v12 = vpop.permute.xlu1 %2294  ;;  %v2693_v3 = vld [vmem:[#allocation3 + $0x120] sm:$0xff] }
 0x248   : > { %2659 = vst.msk [vmem:[#allocation6 + $0x50] sm:$0xff] %vm2205_vm0, %v2615_v11  ;;  %v2821_v13 = vld [vmem:[#allocation3 + $0x121] sm:$0xff]  ;;  %v2819_v27 = vld [vmem:[#allocation3 + $0x109] sm:$0xff] }
 0x249   : > { %2339 = vst.msk [vmem:[#allocation6 + $0x60] sm:$0xff] %vm2334_vm1, %v2295_v12  ;;  %v2949_v14 = vld [vmem:[#allocation3 + $0x122] sm:$0xff]  ;;  %v2950_v23 = vld [vmem:[#allocation3 + $0x12a] sm:$0xff] }
 0x24a   : > { %v2694_v15 = vld [vmem:[#allocation3 + $0x128] sm:$0xff]  ;;  %v2971_v17 = vpack.c.bf16 %v2950_v23, %v2949_v14  ;;  %v2948_v18 = vld [vmem:[#allocation3 + $0x112] sm:$0xff] }
 0x24b   : > { %v2691_v16 = vld [vmem:[#allocation3 + $0x108] sm:$0xff]  ;;  %v2740_v19 = vpop.permute.xlu0 %2739  ;;  %v2715_v21 = vpack.c.bf16 %v2694_v15, %v2693_v3  ;;  %v2420_v25 = vpop.permute.xlu1 %2419  ;;  %v2692_v30 = vld [vmem:[#allocation3 + $0x110] sm:$0xff] }
 0x24c   : > { %v2947_v60 = vld [vmem:[#allocation3 + $0x10a] sm:$0xff]  ;;  %2786 = vst.msk [vmem:[#allocation6 + $0x20] sm:$0xff] %vm2334_vm1, %v2740_v19  ;;  %v2714_v28 = vpack.c.bf16 %v2692_v30, %v2691_v16 }
 0x24d   : > { %v2822_v22 = vld [vmem:[#allocation3 + $0x129] sm:$0xff]  ;;  %v2970_v24 = vpack.c.bf16 %v2948_v18, %v2947_v60  ;;  %v2820_v63 = vld [vmem:[#allocation3 + $0x111] sm:$0xff]  ;;  %2987 = vst.msk [vmem:[#allocation6 + $0x100] sm:$0xff] %vm1950_vm13, %v2971_v17  ;;  %2757 = vrot.lane.b32.xlu0 %v2715_v21, %s6755_s2  ;;  %2437 = vrot.lane.b32.xlu1 %v2715_v21, %s6756_s24  ;;  %2089 = vst.msk [vmem:[#allocation6 + $0x120] sm:$0xff] %vm1950_vm13, %v2715_v21 }
 0x24e   : > { %v2843_v26 = vpack.c.bf16 %v2822_v22, %v2821_v13  ;;  %2466 = vst.msk [vmem:[#allocation6 + $0x30] sm:$0xff] %vm2463_vm2, %v2420_v25  ;;  %v2842_v29 = vpack.c.bf16 %v2820_v63, %v2819_v27 }
 0x24f   : > { %2986 = vst.msk [vmem:[#allocation6 + $0xe8] sm:$0xff] %vm1950_vm13, %v2970_v24  ;;  %v2868_v31 = vpop.permute.xlu0 %2867  ;;  %2088 = vst.msk [vmem:[#allocation6 + $0x108] sm:$0xff] %vm1950_vm13, %v2714_v28  ;;  %v2164_v32 = vpop.permute.xlu1 %2163 }
 0x250   : > { %2539 = vst.msk [vmem:[#allocation6 + $0x110] sm:$0xff] %vm1950_vm13, %v2843_v26  ;;  %2538 = vst.msk [vmem:[#allocation6 + $0xf8] sm:$0xff] %vm1950_vm13, %v2842_v29 }
 0x251   : > { %2914 = vst.msk [vmem:[#allocation6 + $0x20] sm:$0xff] %vm2463_vm2, %v2868_v31  ;;  %2885 = vrot.lane.b32.xlu0 %v2843_v26, %s6756_s24  ;;  %2181 = vrot.lane.b32.xlu1 %v2843_v26, %s8802_s0  ;;  %v6680_v26 = vld [vmem:[%s8807_s3] ss:$0 sm:$0xff] }
 0x252   : > { %2209 = vst.msk [vmem:[#allocation6 + $0x48] sm:$0xff] %vm2205_vm0, %v2164_v32 }
 0x253   : > { %v2613_v33 = vpop.permute.xlu0 %2612  ;;  %v2293_v34 = vpop.permute.xlu1 %2292 }
 0x254   : > { %2658 = vst.msk [vmem:[#allocation6 + $0x38] sm:$0xff] %vm2205_vm0, %v2613_v33  ;;  %v3025_v36 = vld [vmem:[#allocation6 + $0x100] sm:$0xff] }
 0x255   : > { %2787 = vst.msk [vmem:[#allocation6 + $0x38] sm:$0xff] %vm2334_vm1, %v2742_v2  ;;  %2338 = vst.msk [vmem:[#allocation6 + $0x48] sm:$0xff] %vm2334_vm1, %v2293_v34  ;;  %2630 = vrot.lane.b32.xlu0 %v2971_v17, %s8802_s0  ;;  %2310 = vrot.lane.b32.xlu1 %v2971_v17, %s6755_s2  ;;  %v2999_v55 = vld [vmem:[#allocation6 + $0x30] sm:$0xff] }
 0x256   : > { %v3022_v35 = vld [vmem:[#allocation6 + $0xe8] sm:$0xff]  ;;  %2915 = vst.msk [vmem:[#allocation6 + $0x38] sm:$0xff] %vm2463_vm2, %v2870_v9  ;;  %2467 = vst.msk [vmem:[#allocation6 + $0x48] sm:$0xff] %vm2463_vm2, %v2422_v7 }
 0x257   : > { %6497 = vmatmul.mubr.msk.bf16.gmra.mrb[48].mxu0 %vm1950_vm13, %v3022_v35 }
 0x258   : > { %6500 = vmatprep.mubr.msk.bf16.mxu0 %vm1950_vm13, %v3025_v36  ;;  %v2997_v37 = vld [vmem:[#allocation6 + $0x20] sm:$0xff] }
 0x259   : > { %3280 = vmatprep.mubr.bf16.mxu1 %v2997_v37  ;;  %2755 = vrot.lane.b32.xlu0 %v2714_v28, %s6755_s2 }
 0x25a   : > { %2435 = vrot.lane.b32.xlu1 %v2714_v28, %s6756_s24  ;;  %3281 = vmatmul.mubr.bf16.gmra.mrb[4].mxu1 %v2996_v38 }
 0x25b   : > { %v6470_v39 = vpop.f32.mrb[24].mxu0 }
 0x25c   : > { %v1896_v40 = vadd.f32 %v6470_v39, %v7522_v5  ;;  %v1887_v42 = vpop.f32.mrb[25].mxu0 }
 0x25d   : > { %2883 = vrot.lane.b32.xlu0 %v2842_v29, %s6756_s24  ;;  %v3000_v43 = vld [vmem:[#allocation6 + $0x38] sm:$0xff]  ;;  %v1888_v41 = vadd.f32 %v7522_v5, %v1887_v42  ;;  %v6471_v44 = vpop.f32.mrb[26].mxu0 }
 0x25e   : > { %2179 = vrot.lane.b32.xlu1 %v2842_v29, %s8802_s0  ;;  %3288 = vmatprep.mubr.bf16.mxu1 %v3000_v43  ;;  %v1944_v45 = vmax.f32 %v1896_v40, 0.0  ;;  %v1899_v46 = vadd.f32 %v6471_v44, %v7522_v5  ;;  %v1890_v47 = vpop.f32.mrb[27].mxu0 }
 0x25f   : > { %v2746_v48 = vpop.permute.xlu0 %2745  ;;  %v1942_v49 = vmax.f32 %v1888_v41, 0.0  ;;  %v1891_v50 = vadd.f32 %v7522_v5, %v1890_v47  ;;  %v7759_v51 = vpop.permute.xlu1 %2425 }
 0x260   : > { %2023 = vst.msk [vmem:[#allocation3 + $0x151] sm:$0xff] %vm1950_vm13, %v1944_v45  ;;  %v1945_v54 = vmax.f32 %v1899_v46, 0.0 }
 0x261   : > { %2628 = vrot.lane.b32.xlu0 %v2970_v24, %s8802_s0  ;;  %2021 = vst.msk [vmem:[#allocation3 + $0x139] sm:$0xff] %vm1950_vm13, %v1942_v49  ;;  %v1943_v57 = vmax.f32 %v1891_v50, 0.0 }
 0x262   : > { %2308 = vrot.lane.b32.xlu1 %v2970_v24, %s6755_s2  ;;  %3289 = vmatmul.mubr.bf16.gmra.mrb[8].mxu1 %v2999_v55  ;;  %2024 = vst.msk [vmem:[#allocation3 + $0x159] sm:$0xff] %vm1950_vm13, %v1945_v54  ;;  %v3002_v24 = vld [vmem:[#allocation6 + $0x48] sm:$0xff] }
 0x263   : > { %v2874_v52 = vpop.permute.xlu0 %2873  ;;  %2022 = vst.msk [vmem:[#allocation3 + $0x141] sm:$0xff] %vm1950_vm13, %v1943_v57  ;;  %v2170_v5 = vpop.permute.xlu1 %2169 }
 0x264   : > { %2212 = vst.msk [vmem:[#allocation6 + $0x90] sm:$0xff] %vm2205_vm0, %v2170_v5 }
 0x267   : > { %v2619_v58 = vpop.permute.xlu0 %2618  ;;  %v2299_v20 = vpop.permute.xlu1 %2298  ;;  %v2697_v59 = vld [vmem:[#allocation3 + $0x150] sm:$0xff] }
 0x268   : > { %2661 = vst.msk [vmem:[#allocation6 + $0x80] sm:$0xff] %vm2205_vm0, %v2619_v58  ;;  %v2825_v53 = vld [vmem:[#allocation3 + $0x151] sm:$0xff]  ;;  %v2119_v13 = vld [vmem:[#allocation3 + $0x139] sm:$0xff] }
 0x269   : > { %2341 = vst.msk [vmem:[#allocation6 + $0x90] sm:$0xff] %vm2334_vm1, %v2299_v20  ;;  %v2953_v61 = vld [vmem:[#allocation3 + $0x152] sm:$0xff]  ;;  %v2954_v62 = vld [vmem:[#allocation3 + $0x15a] sm:$0xff] }
 0x26a   : > { %v2698_v1 = vld [vmem:[#allocation3 + $0x158] sm:$0xff]  ;;  %v7770_v4 = vpack.c.bf16 %v2954_v62, %v2953_v61  ;;  %v2952_v7 = vld [vmem:[#allocation3 + $0x142] sm:$0xff] }
 0x26b   : > { %v2375_v2 = vld [vmem:[#allocation3 + $0x138] sm:$0xff]  ;;  %v2744_v8 = vpop.permute.xlu0 %2743  ;;  %v2717_v56 = vpack.c.bf16 %v2698_v1, %v2697_v59  ;;  %v2424_v11 = vpop.permute.xlu1 %2423  ;;  %v2376_v3 = vld [vmem:[#allocation3 + $0x140] sm:$0xff] }
 0x26c   : > { %v2951_v6 = vld [vmem:[#allocation3 + $0x13a] sm:$0xff]  ;;  %2788 = vst.msk [vmem:[#allocation6 + $0x50] sm:$0xff] %vm2334_vm1, %v2744_v8  ;;  %v2395_v23 = vpack.c.bf16 %v2376_v3, %v2375_v2  ;;  %v2960_v3 = vld [vmem:[#allocation3 + $0x1a2] sm:$0xff] }
 0x26d   : > { %v2826_v9 = vld [vmem:[#allocation3 + $0x159] sm:$0xff]  ;;  %v2972_v10 = vpack.c.bf16 %v2952_v7, %v2951_v6  ;;  %v2120_v14 = vld [vmem:[#allocation3 + $0x141] sm:$0xff]  ;;  %2989 = vst.msk [vmem:[#allocation6 + $0x130] sm:$0xff] %vm1950_vm13, %v7770_v4  ;;  %2761 = vrot.lane.b32.xlu0 %v2717_v56, %s6755_s2  ;;  %2441 = vrot.lane.b32.xlu1 %v2717_v56, %s6756_s24  ;;  %2091 = vst.msk [vmem:[#allocation6 + $0x150] sm:$0xff] %vm1950_vm13, %v2717_v56 }
 0x26e   : > { %v2845_v12 = vpack.c.bf16 %v2826_v9, %v2825_v53  ;;  %2468 = vst.msk [vmem:[#allocation6 + $0x60] sm:$0xff] %vm2463_vm2, %v2424_v11  ;;  %v2138_v15 = vpack.c.bf16 %v2120_v14, %v2119_v13 }
 0x26f   : > { %2988 = vst.msk [vmem:[#allocation6 + $0x118] sm:$0xff] %vm1950_vm13, %v2972_v10  ;;  %v2872_v16 = vpop.permute.xlu0 %2871  ;;  %2090 = vst.msk [vmem:[#allocation6 + $0x138] sm:$0xff] %vm1950_vm13, %v2395_v23  ;;  %v2168_v17 = vpop.permute.xlu1 %2167 }
 0x270   : > { %2541 = vst.msk [vmem:[#allocation6 + $0x140] sm:$0xff] %vm1950_vm13, %v2845_v12  ;;  %2540 = vst.msk [vmem:[#allocation6 + $0x128] sm:$0xff] %vm1950_vm13, %v2138_v15 }
 0x271   : > { %2916 = vst.msk [vmem:[#allocation6 + $0x50] sm:$0xff] %vm2463_vm2, %v2872_v16  ;;  %2889 = vrot.lane.b32.xlu0 %v2845_v12, %s6756_s24  ;;  %2185 = vrot.lane.b32.xlu1 %v2845_v12, %s8802_s0  ;;  %v2959_v12 = vld [vmem:[#allocation3 + $0x19a] sm:$0xff] }
 0x272   : > { %2211 = vst.msk [vmem:[#allocation6 + $0x78] sm:$0xff] %vm2205_vm0, %v2168_v17  ;;  %v2976_v13 = vpack.c.bf16 %v2960_v3, %v2959_v12 }
 0x273   : > { %v2617_v60 = vpop.permute.xlu0 %2616  ;;  %v2297_v18 = vpop.permute.xlu1 %2296 }
 0x274   : > { %2660 = vst.msk [vmem:[#allocation6 + $0x68] sm:$0xff] %vm2205_vm0, %v2617_v60  ;;  %v3031_v21 = vld [vmem:[#allocation6 + $0x130] sm:$0xff] }
 0x275   : > { %2789 = vst.msk [vmem:[#allocation6 + $0x68] sm:$0xff] %vm2334_vm1, %v2746_v48  ;;  %2340 = vst.msk [vmem:[#allocation6 + $0x78] sm:$0xff] %vm2334_vm1, %v2297_v18  ;;  %2634 = vrot.lane.b32.xlu0 %v7770_v4, %s8802_s0  ;;  %2439 = vrot.lane.b32.xlu1 %v2395_v23, %s6756_s24  ;;  %v3005_v39 = vld [vmem:[#allocation6 + $0x60] sm:$0xff] }
 0x276   : > { %v3028_v19 = vld [vmem:[#allocation6 + $0x118] sm:$0xff]  ;;  %2917 = vst.msk [vmem:[#allocation6 + $0x68] sm:$0xff] %vm2463_vm2, %v2874_v52  ;;  %2469 = vst.msk [vmem:[#allocation6 + $0x78] sm:$0xff] %vm2463_vm2, %v7759_v51 }
 0x277   : > { %6501 = vmatmul.mubr.msk.bf16.gmra.mrb[52].mxu0 %vm1950_vm13, %v3028_v19  ;;  %2992 = vst.msk [vmem:[#allocation6 + $0x178] sm:$0xff] %vm1950_vm13, %v2976_v13  ;;  %v2831_v19 = vld [vmem:[#allocation3 + $0x199] sm:$0xff] }
 0x278   : > { %6504 = vmatprep.mubr.msk.bf16.mxu0 %vm1950_vm13, %v3031_v21  ;;  %v3003_v22 = vld [vmem:[#allocation6 + $0x50] sm:$0xff] }
 0x279   : > { %3296 = vmatprep.mubr.bf16.mxu1 %v3003_v22  ;;  %2759 = vrot.lane.b32.xlu0 %v2395_v23, %s6755_s2  ;;  %v2703_v23 = vld [vmem:[#allocation3 + $0x198] sm:$0xff]  ;;  %v2832_v21 = vld [vmem:[#allocation3 + $0x1a1] sm:$0xff] }
 0x27a   : > { %2183 = vrot.lane.b32.xlu1 %v2138_v15, %s8802_s0  ;;  %3297 = vmatmul.mubr.bf16.gmra.mrb[12].mxu1 %v3002_v24 }
 0x27c   : > { %v6474_v25 = vpop.f32.mrb[28].mxu0 }
 0x27d   : > { %v1912_v30 = vadd.f32 %v6680_v26, %v6474_v25  ;;  %v1903_v27 = vpop.f32.mrb[29].mxu0  ;;  %2887 = vrot.lane.b32.xlu0 %v2138_v15, %s6756_s24  ;;  %v3006_v63 = vld [vmem:[#allocation6 + $0x68] sm:$0xff]  ;;  %v3008_v11 = vld [vmem:[#allocation6 + $0x78] sm:$0xff]  ;;  %v2704_v15 = vld [vmem:[#allocation3 + $0x1a0] sm:$0xff] }
 0x27e   : > { %2312 = vrot.lane.b32.xlu1 %v2972_v10, %s6755_s2  ;;  %v1904_v28 = vadd.f32 %v6680_v26, %v1903_v27  ;;  %v6475_v29 = vpop.f32.mrb[30].mxu0  ;;  %3304 = vmatprep.mubr.bf16.mxu1 %v3006_v63  ;;  %v2720_v18 = vpack.c.bf16 %v2704_v15, %v2703_v23  ;;  %v3040_v25 = vld [vmem:[#allocation6 + $0x178] sm:$0xff] }
 0x27f   : > { %v1948_v31 = vmax.f32 %v1912_v30, 0.0  ;;  %v1915_v32 = vadd.f32 %v6680_v26, %v6475_v29  ;;  %v1906_v33 = vpop.f32.mrb[31].mxu0  ;;  %v2750_v34 = vpop.permute.xlu0 %2749 }
 0x280   : > { %v1946_v35 = vmax.f32 %v1904_v28, 0.0  ;;  %v1907_v36 = vadd.f32 %v6680_v26, %v1906_v33  ;;  %v7805_v37 = vpop.permute.xlu1 %2429  ;;  %v2848_v26 = vpack.c.bf16 %v2832_v21, %v2831_v19 }
 0x281   : > { %2027 = vst.msk [vmem:[#allocation3 + $0x181] sm:$0xff] %vm1950_vm13, %v1948_v31  ;;  %v1949_v38 = vmax.f32 %v1915_v32, 0.0  ;;  %2632 = vrot.lane.b32.xlu0 %v2972_v10, %s8802_s0 }
 0x282   : > { %2314 = vrot.lane.b32.xlu1 %v7770_v4, %s6755_s2  ;;  %2025 = vst.msk [vmem:[#allocation3 + $0x169] sm:$0xff] %vm1950_vm13, %v1946_v35  ;;  %v1947_v40 = vmax.f32 %v1907_v36, 0.0  ;;  %3305 = vmatmul.mubr.bf16.gmra.mrb[16].mxu1 %v3005_v39 }
 0x283   : > { %2028 = vst.msk [vmem:[#allocation3 + $0x189] sm:$0xff] %vm1950_vm13, %v1949_v38  ;;  %v2878_v42 = vpop.permute.xlu0 %2877 }
 0x284   : > { %2026 = vst.msk [vmem:[#allocation3 + $0x171] sm:$0xff] %vm1950_vm13, %v1947_v40  ;;  %v2174_v43 = vpop.permute.xlu1 %2173 }
 0x285   : > { %2214 = vst.msk [vmem:[#allocation6 + $0xc0] sm:$0xff] %vm2205_vm0, %v2174_v43 }
 0x287   : > { %v2623_v41 = vpop.permute.xlu0 %2622 }
 0x288   : > { %2663 = vst.msk [vmem:[#allocation6 + $0xb0] sm:$0xff] %vm2205_vm0, %v2623_v41  ;;  %v2303_v44 = vpop.permute.xlu1 %2302  ;;  %v2701_v45 = vld [vmem:[#allocation3 + $0x180] sm:$0xff] }
 0x289   : > { %2343 = vst.msk [vmem:[#allocation6 + $0xc0] sm:$0xff] %vm2334_vm1, %v2303_v44  ;;  %v2379_v46 = vld [vmem:[#allocation3 + $0x168] sm:$0xff] }
 0x28a   : > { %v2957_v47 = vld [vmem:[#allocation3 + $0x182] sm:$0xff]  ;;  %v2958_v48 = vld [vmem:[#allocation3 + $0x18a] sm:$0xff] }
 0x28b   : > { %v2702_v49 = vld [vmem:[#allocation3 + $0x188] sm:$0xff]  ;;  %v2975_v51 = vpack.c.bf16 %v2958_v48, %v2957_v47  ;;  %v2956_v55 = vld [vmem:[#allocation3 + $0x172] sm:$0xff]  ;;  %v2748_v57 = vpop.permute.xlu0 %2747 }
 0x28c   : > { %v2829_v50 = vld [vmem:[#allocation3 + $0x181] sm:$0xff]  ;;  %v2955_v54 = vld [vmem:[#allocation3 + $0x16a] sm:$0xff]  ;;  %v2719_v52 = vpack.c.bf16 %v2702_v49, %v2701_v45  ;;  %2790 = vst.msk [vmem:[#allocation6 + $0x80] sm:$0xff] %vm2334_vm1, %v2748_v57  ;;  %v2428_v20 = vpop.permute.xlu1 %2427 }
 0x28d   : > { %v2380_v5 = vld [vmem:[#allocation3 + $0x170] sm:$0xff]  ;;  %v2974_v58 = vpack.c.bf16 %v2956_v55, %v2955_v54  ;;  %2991 = vst.msk [vmem:[#allocation6 + $0x160] sm:$0xff] %vm1950_vm13, %v2975_v51 }
 0x28e   : > { %v2397_v59 = vpack.c.bf16 %v2380_v5, %v2379_v46  ;;  %v2830_v53 = vld [vmem:[#allocation3 + $0x189] sm:$0xff]  ;;  %v2124_v62 = vld [vmem:[#allocation3 + $0x171] sm:$0xff]  ;;  %2470 = vst.msk [vmem:[#allocation6 + $0x90] sm:$0xff] %vm2463_vm2, %v2428_v20  ;;  %2765 = vrot.lane.b32.xlu0 %v2719_v52, %s6755_s2 }
 0x28f   : > { %v2123_v61 = vld [vmem:[#allocation3 + $0x169] sm:$0xff]  ;;  %v2847_v1 = vpack.c.bf16 %v2830_v53, %v2829_v50  ;;  %2990 = vst.msk [vmem:[#allocation6 + $0x148] sm:$0xff] %vm1950_vm13, %v2974_v58  ;;  %v2876_v4 = vpop.permute.xlu0 %2875 }
 0x290   : > { %v2140_v2 = vpack.c.bf16 %v2124_v62, %v2123_v61  ;;  %2443 = vrot.lane.b32.xlu1 %v2397_v59, %s6756_s24  ;;  %2092 = vst.msk [vmem:[#allocation6 + $0x168] sm:$0xff] %vm1950_vm13, %v2397_v59  ;;  %v2172_v6 = vpop.permute.xlu1 %2171 }
 0x291   : > { %2543 = vst.msk [vmem:[#allocation6 + $0x170] sm:$0xff] %vm1950_vm13, %v2847_v1 }
 0x292   : > { %2542 = vst.msk [vmem:[#allocation6 + $0x158] sm:$0xff] %vm1950_vm13, %v2140_v2  ;;  %2893 = vrot.lane.b32.xlu0 %v2847_v1, %s6756_s24 }
 0x293   : > { %2918 = vst.msk [vmem:[#allocation6 + $0x80] sm:$0xff] %vm2463_vm2, %v2876_v4  ;;  %v2621_v7 = vpop.permute.xlu0 %2620 }
 0x294   : > { %2213 = vst.msk [vmem:[#allocation6 + $0xa8] sm:$0xff] %vm2205_vm0, %v2172_v6  ;;  %2187 = vrot.lane.b32.xlu1 %v2140_v2, %s8802_s0  ;;  %2662 = vst.msk [vmem:[#allocation6 + $0x98] sm:$0xff] %vm2205_vm0, %v2621_v7  ;;  %v2301_v8 = vpop.permute.xlu1 %2300  ;;  %v3037_v9 = vld [vmem:[#allocation6 + $0x160] sm:$0xff] }
 0x295   : > { %2791 = vst.msk [vmem:[#allocation6 + $0x98] sm:$0xff] %vm2334_vm1, %v2750_v34  ;;  %2342 = vst.msk [vmem:[#allocation6 + $0xa8] sm:$0xff] %vm2334_vm1, %v2301_v8  ;;  %v3011_v60 = vld [vmem:[#allocation6 + $0x90] sm:$0xff] }
 0x296   : > { %2763 = vrot.lane.b32.xlu0 %v2397_v59, %s6755_s2  ;;  %v3034_v56 = vld [vmem:[#allocation6 + $0x148] sm:$0xff]  ;;  %2919 = vst.msk [vmem:[#allocation6 + $0x98] sm:$0xff] %vm2463_vm2, %v2878_v42  ;;  %2471 = vst.msk [vmem:[#allocation6 + $0xa8] sm:$0xff] %vm2463_vm2, %v7805_v37 }
 0x297   : > { %6505 = vmatmul.mubr.msk.bf16.gmra.mrb[56].mxu0 %vm1950_vm13, %v3034_v56 }
 0x298   : > { %2316 = vrot.lane.b32.xlu1 %v2974_v58, %s6755_s2  ;;  %6508 = vmatprep.mubr.msk.bf16.mxu0 %vm1950_vm13, %v3037_v9 }
 0x29a   : > { %v3009_v10 = vld [vmem:[#allocation6 + $0x80] sm:$0xff]  ;;  %2891 = vrot.lane.b32.xlu0 %v2140_v2, %s6756_s24 }
 0x29b   : > { %3312 = vmatprep.mubr.bf16.mxu1 %v3009_v10 }
 0x29c   : > { %3313 = vmatmul.mubr.bf16.gmra.mrb[20].mxu1 %v3008_v11  ;;  %2445 = vrot.lane.b32.xlu1 %v2719_v52, %s6756_s24 }
 0x29d   : > { %v3012_v14 = vld [vmem:[#allocation6 + $0x98] sm:$0xff]  ;;  %v3014_v39 = vld [vmem:[#allocation6 + $0xa8] sm:$0xff] }
 0x29e   : > { %2636 = vrot.lane.b32.xlu0 %v2974_v58, %s8802_s0  ;;  %3320 = vmatprep.mubr.bf16.mxu1 %v3012_v14 }
 0x29f   : > { %v2754_v16 = vpop.permute.xlu0 %2753  ;;  %v2434_v17 = vpop.permute.xlu1 %2433  ;;  %6509 = vmatmul.mubr.msk.bf16.gmra.mrb[60].mxu0 %vm1950_vm13, %v3040_v25  ;;  %vm4546_vm13 = vcmask 1047559  }
 0x2a2   : > { %2638 = vrot.lane.b32.xlu0 %v2975_v51, %s8802_s0 }
 0x2a3   : > { %v2882_v22 = vpop.permute.xlu0 %2881  ;;  %v2178_v24 = vpop.permute.xlu1 %2177 }
 0x2a4   : > { %3321 = vmatmul.mubr.bf16.gmra.mrb[24].mxu1 %v3011_v60  ;;  %2216 = vst.msk [vmem:[#allocation6 + $0xf0] sm:$0xff] %vm2205_vm0, %v2178_v24 }
 0x2a6   : > { %2767 = vrot.lane.b32.xlu0 %v2720_v18, %s6755_s2 }
 0x2a7   : > { %v2627_v30 = vpop.permute.xlu0 %2626  ;;  %v2307_v27 = vpop.permute.xlu1 %2306 }
 0x2a8   : > { %2665 = vst.msk [vmem:[#allocation6 + $0xe0] sm:$0xff] %vm2205_vm0, %v2627_v30 }
 0x2a9   : > { %2345 = vst.msk [vmem:[#allocation6 + $0xf0] sm:$0xff] %vm2334_vm1, %v2307_v27 }
 0x2aa   : > { %v7854_v63 = vpop.f32.mrb[32].mxu0  ;;  %2895 = vrot.lane.b32.xlu0 %v2848_v26, %s6756_s24  ;;  %s442_s24 = sand.u32 1, %s6736_s26  }
 0x2ab   : > { %v7857_v28 = vpop.f32.mrb[33].mxu0  ;;  %v2752_v31 = vpop.permute.xlu0 %2751  ;;  %s443_s16 = scalar_lea.vmem [#allocation8], %s442_s24  ;;  %s5961_s21 = scalar_lea.sflag [#allocation9], %s442_s24 }
 0x2ac   : > { %v7859_v29 = vpop.f32.mrb[34].mxu0  ;;  %2792 = vst.msk [vmem:[#allocation6 + $0xb0] sm:$0xff] %vm2334_vm1, %v2752_v31  ;;  %v2432_v32 = vpop.permute.xlu1 %2431  ;;  %s5973_s3 = sshll.u32 %s443_s16, 4  ;;  %s8720_s3 = int_to_ptr.vmem [resolvable:$true] %s5973_s3 }
 0x2ad   : > { %v7862_v33 = vpop.f32.mrb[35].mxu0  ;;  %2472 = vst.msk [vmem:[#allocation6 + $0xc0] sm:$0xff] %vm2463_vm2, %v2432_v32  ;;  %v7970_v32 = vld [vmem:[%s8765_s5] ss:$0 sm:$0xff]  ;;  %s6682_s29 = scalar_lea.vmem %s8720_s3, 16 }
 0x2ae   : > { %p6683_p11 = scmp.ne.s32.totalorder %s8720_s3, %s6682_s29 }
 0x2af   : > { %v2880_v34 = vpop.permute.xlu0 %2879 }
 0x2b0   : > { %2920 = vst.msk [vmem:[#allocation6 + $0xb0] sm:$0xff] %vm2463_vm2, %v2880_v34  ;;  %v2176_v35 = vpop.permute.xlu1 %2175  ;;  %p6684_p12 = pnand %p6683_p11, %p6868_p5 }
 0x2b1   : > { %2215 = vst.msk [vmem:[#allocation6 + $0xd8] sm:$0xff] %vm2205_vm0, %v2176_v35 }
 0x2b2   : > { %p6685_p13 = pneg %p6684_p12 }
 0x2b3   : > { %v2625_v36 = vpop.permute.xlu0 %2624 }
 0x2b4   : > { %2664 = vst.msk [vmem:[#allocation6 + $0xc8] sm:$0xff] %vm2205_vm0, %v2625_v36  ;;  %v2305_v37 = vpop.permute.xlu1 %2304  ;;  %v3017_v41 = vld [vmem:[#allocation6 + $0xc0] sm:$0xff] }
 0x2b5   : > { %2793 = vst.msk [vmem:[#allocation6 + $0xc8] sm:$0xff] %vm2334_vm1, %v2754_v16  ;;  %2344 = vst.msk [vmem:[#allocation6 + $0xd8] sm:$0xff] %vm2334_vm1, %v2305_v37 }
 0x2b6   : > { %2921 = vst.msk [vmem:[#allocation6 + $0xc8] sm:$0xff] %vm2463_vm2, %v2882_v22  ;;  %2473 = vst.msk [vmem:[#allocation6 + $0xd8] sm:$0xff] %vm2463_vm2, %v2434_v17 }
 0x2b7   : > { %v3015_v38 = vld [vmem:[#allocation6 + $0xb0] sm:$0xff] }
 0x2b8   : > { %3328 = vmatprep.mubr.bf16.mxu1 %v3015_v38 }
 0x2b9   : > { %3329 = vmatmul.mubr.bf16.gmra.mrb[28].mxu1 %v3014_v39 }
 0x2bd   : > { %v3018_v40 = vld [vmem:[#allocation6 + $0xc8] sm:$0xff]  ;;  %v3020_v59 = vld [vmem:[#allocation6 + $0xd8] sm:$0xff] }
 0x2be   : > { %3336 = vmatprep.mubr.bf16.mxu1 %v3018_v40 }
 0x2bf   : > { %v2758_v42 = vpop.permute.xlu0 %2757  ;;  %v2438_v43 = vpop.permute.xlu1 %2437 }
 0x2c1   : > { %3337 = vmatmul.mubr.bf16.gmra.mrb[32].mxu1 %v3017_v41 }
 0x2c3   : > { %v2886_v44 = vpop.permute.xlu0 %2885  ;;  %v2182_v45 = vpop.permute.xlu1 %2181 }
 0x2c4   : > { %2218 = vst.msk [vmem:[#allocation6 + $0x120] sm:$0xff] %vm2205_vm0, %v2182_v45 }
 0x2c7   : > { %v2631_v46 = vpop.permute.xlu0 %2630  ;;  %v2311_v47 = vpop.permute.xlu1 %2310 }
 0x2c8   : > { %2667 = vst.msk [vmem:[#allocation6 + $0x110] sm:$0xff] %vm2205_vm0, %v2631_v46 }
 0x2c9   : > { %2347 = vst.msk [vmem:[#allocation6 + $0x120] sm:$0xff] %vm2334_vm1, %v2311_v47 }
 0x2ca   : > { %v7879_v48 = vpop.f32.mrb[36].mxu0 }
 0x2cb   : > { %v7881_v49 = vpop.f32.mrb[37].mxu0  ;;  %v2756_v51 = vpop.permute.xlu0 %2755 }
 0x2cc   : > { %v7883_v50 = vpop.f32.mrb[38].mxu0  ;;  %2794 = vst.msk [vmem:[#allocation6 + $0xe0] sm:$0xff] %vm2334_vm1, %v2756_v51  ;;  %v2436_v54 = vpop.permute.xlu1 %2435 }
 0x2cd   : > { %v7886_v55 = vpop.f32.mrb[39].mxu0  ;;  %2474 = vst.msk [vmem:[#allocation6 + $0xf0] sm:$0xff] %vm2463_vm2, %v2436_v54 }
 0x2cf   : > { %v2884_v57 = vpop.permute.xlu0 %2883 }
 0x2d0   : > { %2922 = vst.msk [vmem:[#allocation6 + $0xe0] sm:$0xff] %vm2463_vm2, %v2884_v57  ;;  %v2180_v52 = vpop.permute.xlu1 %2179 }
 0x2d1   : > { %2217 = vst.msk [vmem:[#allocation6 + $0x108] sm:$0xff] %vm2205_vm0, %v2180_v52 }
 0x2d3   : > { %v2629_v5 = vpop.permute.xlu0 %2628 }
 0x2d4   : > { %2666 = vst.msk [vmem:[#allocation6 + $0xf8] sm:$0xff] %vm2205_vm0, %v2629_v5  ;;  %v2309_v58 = vpop.permute.xlu1 %2308  ;;  %v3023_v1 = vld [vmem:[#allocation6 + $0xf0] sm:$0xff] }
 0x2d5   : > { %2795 = vst.msk [vmem:[#allocation6 + $0xf8] sm:$0xff] %vm2334_vm1, %v2758_v42  ;;  %2346 = vst.msk [vmem:[#allocation6 + $0x108] sm:$0xff] %vm2334_vm1, %v2309_v58 }
 0x2d6   : > { %2923 = vst.msk [vmem:[#allocation6 + $0xf8] sm:$0xff] %vm2463_vm2, %v2886_v44  ;;  %2475 = vst.msk [vmem:[#allocation6 + $0x108] sm:$0xff] %vm2463_vm2, %v2438_v43 }
 0x2d7   : > { %v3021_v20 = vld [vmem:[#allocation6 + $0xe0] sm:$0xff] }
 0x2d8   : > { %3344 = vmatprep.mubr.bf16.mxu1 %v3021_v20 }
 0x2d9   : > { %3345 = vmatmul.mubr.bf16.gmra.mrb[36].mxu1 %v3020_v59 }
 0x2dd   : > { %v3024_v53 = vld [vmem:[#allocation6 + $0xf8] sm:$0xff]  ;;  %v3026_v15 = vld [vmem:[#allocation6 + $0x108] sm:$0xff] }
 0x2de   : > { %3352 = vmatprep.mubr.bf16.mxu1 %v3024_v53 }
 0x2df   : > { %v2762_v61 = vpop.permute.xlu0 %2761  ;;  %v2442_v62 = vpop.permute.xlu1 %2441 }
 0x2e1   : > { %3353 = vmatmul.mubr.bf16.gmra.mrb[40].mxu1 %v3023_v1  ;;  %v6757_v1 = vmov 1983009808  }
 0x2e3   : > { %v2890_v2 = vpop.permute.xlu0 %2889  ;;  %v2186_v4 = vpop.permute.xlu1 %2185 }
 0x2e4   : > { %2220 = vst.msk [vmem:[#allocation6 + $0x150] sm:$0xff] %vm2205_vm0, %v2186_v4  ;;  %v3663_v4 = vlaneseq }
 0x2e7   : > { %v2635_v6 = vpop.permute.xlu0 %2634  ;;  %v2440_v7 = vpop.permute.xlu1 %2439 }
 0x2e8   : > { %2669 = vst.msk [vmem:[#allocation6 + $0x140] sm:$0xff] %vm2205_vm0, %v2635_v6 }
 0x2e9   : > { %2476 = vst.msk [vmem:[#allocation6 + $0x120] sm:$0xff] %vm2463_vm2, %v2440_v7 }
 0x2ea   : > { %v7939_v8 = vpop.f32.mrb[40].mxu0 }
 0x2eb   : > { %v7941_v56 = vpop.f32.mrb[41].mxu0  ;;  %v2760_v0 = vpop.permute.xlu0 %2759 }
 0x2ec   : > { %v7943_v9 = vpop.f32.mrb[42].mxu0  ;;  %2796 = vst.msk [vmem:[#allocation6 + $0x110] sm:$0xff] %vm2334_vm1, %v2760_v0  ;;  %v2184_v10 = vpop.permute.xlu1 %2183 }
 0x2ed   : > { %v7946_v11 = vpop.f32.mrb[43].mxu0  ;;  %2219 = vst.msk [vmem:[#allocation6 + $0x138] sm:$0xff] %vm2205_vm0, %v2184_v10 }
 0x2ef   : > { %v2888_v12 = vpop.permute.xlu0 %2887 }
 0x2f0   : > { %2924 = vst.msk [vmem:[#allocation6 + $0x110] sm:$0xff] %vm2463_vm2, %v2888_v12  ;;  %v2313_v3 = vpop.permute.xlu1 %2312  ;;  %v3029_v18 = vld [vmem:[#allocation6 + $0x120] sm:$0xff] }
 0x2f1   : > { %2348 = vst.msk [vmem:[#allocation6 + $0x138] sm:$0xff] %vm2334_vm1, %v2313_v3 }
 0x2f2   : > { %2477 = vst.msk [vmem:[#allocation6 + $0x138] sm:$0xff] %vm2463_vm2, %v2442_v62 }
 0x2f3   : > { %v2633_v13 = vpop.permute.xlu0 %2632 }
 0x2f4   : > { %2668 = vst.msk [vmem:[#allocation6 + $0x128] sm:$0xff] %vm2205_vm0, %v2633_v13  ;;  %v2315_v14 = vpop.permute.xlu1 %2314  ;;  %v7994_v13 = vshrl.u32 %v3663_v4, 7 }
 0x2f5   : > { %2797 = vst.msk [vmem:[#allocation6 + $0x128] sm:$0xff] %vm2334_vm1, %v2762_v61  ;;  %2349 = vst.msk [vmem:[#allocation6 + $0x150] sm:$0xff] %vm2334_vm1, %v2315_v14 }
 0x2f6   : > { %2925 = vst.msk [vmem:[#allocation6 + $0x128] sm:$0xff] %vm2463_vm2, %v2890_v2  ;;  %v3661_v2 = vunpack.c.l.s4 %v6757_v1 }
 0x2f7   : > { %v3027_v23 = vld [vmem:[#allocation6 + $0x110] sm:$0xff] }
 0x2f8   : > { %3360 = vmatprep.mubr.bf16.mxu1 %v3027_v23  ;;  %v3662_v3 = vunpack.c.0.s8 %v3661_v2 }
 0x2f9   : > { %3361 = vmatmul.mubr.bf16.gmra.mrb[44].mxu1 %v3026_v15  ;;  %v3032_v51 = vld [vmem:[#allocation6 + $0x138] sm:$0xff] }
 0x2fd   : > { %v3030_v16 = vld [vmem:[#allocation6 + $0x128] sm:$0xff] }
 0x2fe   : > { %3368 = vmatprep.mubr.bf16.mxu1 %v3030_v16 }
 0x300   : > { %v2766_v17 = vpop.permute.xlu0 %2765 }
 0x301   : > { %3369 = vmatmul.mubr.bf16.gmra.mrb[48].mxu1 %v3029_v18 }
 0x302   : > { %v2444_v60 = vpop.permute.xlu1 %2443 }
 0x303   : > { %2478 = vst.msk [vmem:[#allocation6 + $0x150] sm:$0xff] %vm2463_vm2, %v2444_v60 }
 0x304   : > { %v2894_v19 = vpop.permute.xlu0 %2893 }
 0x306   : > { %v2188_v21 = vpop.permute.xlu1 %2187 }
 0x307   : > { %2221 = vst.msk [vmem:[#allocation6 + $0x168] sm:$0xff] %vm2205_vm0, %v2188_v21 }
 0x308   : > { %v2764_v22 = vpop.permute.xlu0 %2763 }
 0x309   : > { %2798 = vst.msk [vmem:[#allocation6 + $0x140] sm:$0xff] %vm2334_vm1, %v2764_v22 }
 0x30a   : > { %v2317_v24 = vpop.permute.xlu1 %2316  ;;  %v3035_v52 = vld [vmem:[#allocation6 + $0x150] sm:$0xff] }
 0x30b   : > { %2350 = vst.msk [vmem:[#allocation6 + $0x168] sm:$0xff] %vm2334_vm1, %v2317_v24  ;;  %v7960_v25 = vpop.f32.mrb[44].mxu0  ;;  %v6214_v26 = vpop.f32.mrb[0].mxu1 }
 0x30c   : > { %v7962_v30 = vpop.f32.mrb[45].mxu0  ;;  %v2892_v27 = vpop.permute.xlu0 %2891 }
 0x30d   : > { %v7964_v31 = vpop.f32.mrb[46].mxu0  ;;  %2926 = vst.msk [vmem:[#allocation6 + $0x140] sm:$0xff] %vm2463_vm2, %v2892_v27  ;;  %v6215_v34 = vpop.f32.mrb[1].mxu1 }
 0x30e   : > { %v6216_v35 = vadd.f32 %v6215_v34, %v6214_v26  ;;  %v6217_v36 = vpop.f32.mrb[2].mxu1  ;;  %v7972_v37 = vpop.f32.mrb[47].mxu0 }
 0x30f   : > { %v2446_v38 = vpop.permute.xlu1 %2445  ;;  %v6218_v39 = vpop.f32.mrb[3].mxu1 }
 0x310   : > { %v3275_v40 = vadd.f32 %v6216_v35, %v7970_v32  ;;  %2479 = vst.msk [vmem:[#allocation6 + $0x168] sm:$0xff] %vm2463_vm2, %v2446_v38  ;;  %v6219_v42 = vadd.f32 %v6218_v39, %v6217_v36  ;;  %v2637_v43 = vpop.permute.xlu0 %2636 }
 0x311   : > { %2670 = vst.msk [vmem:[#allocation6 + $0x158] sm:$0xff] %vm2205_vm0, %v2637_v43 }
 0x312   : > { %v3436_v41 = vadd.f32 %v7857_v28, %v3275_v40  ;;  %v3278_v44 = vadd.f32 %v6219_v42, %v7970_v32  ;;  %2799 = vst.msk [vmem:[#allocation6 + $0x158] sm:$0xff] %vm2334_vm1, %v2766_v17 }
 0x313   : > { %2927 = vst.msk [vmem:[#allocation6 + $0x158] sm:$0xff] %vm2463_vm2, %v2894_v19  ;;  %v8000_v19 = vsub.s32 %v3662_v3, %v7994_v13 }
 0x314   : > { %v3439_v45 = vadd.f32 %v7862_v33, %v3278_v44  ;;  %v2639_v46 = vpop.permute.xlu0 %2638  ;;  %v3033_v47 = vld [vmem:[#allocation6 + $0x140] sm:$0xff]  ;;  %v3562_v14 = vmax.f32 %v3436_v41, 0.0 }
 0x315   : > { %2671 = vst.msk [vmem:[#allocation6 + $0x170] sm:$0xff] %vm2205_vm0, %v2639_v46  ;;  %3376 = vmatprep.mubr.bf16.mxu1 %v3033_v47  ;;  %vm5598_vm0 = vcmask 64512  }
 0x316   : > { %3377 = vmatmul.mubr.bf16.gmra.mrb[52].mxu1 %v3032_v51  ;;  %v3563_v16 = vmax.f32 %v3439_v45, 0.0  ;;  %v3595_v22 = vsel %vm3594_vm4, %v3562_v14, -inf }
 0x317   : > { %v3038_v33 = vld [vmem:[#allocation6 + $0x168] sm:$0xff] }
 0x318   : > { %v2768_v54 = vpop.permute.xlu0 %2767  ;;  %v3598_v36 = vsel %vm3594_vm4, %v3563_v16, -inf }
 0x319   : > { %2800 = vst.msk [vmem:[#allocation6 + $0x170] sm:$0xff] %vm2334_vm1, %v2768_v54 }
 0x31a   : > { %v3036_v57 = vld [vmem:[#allocation6 + $0x158] sm:$0xff] }
 0x31b   : > { %3384 = vmatprep.mubr.bf16.mxu1 %v3036_v57 }
 0x31c   : > { %v2896_v28 = vpop.permute.xlu0 %2895 }
 0x31d   : > { %2928 = vst.msk [vmem:[#allocation6 + $0x170] sm:$0xff] %vm2463_vm2, %v2896_v28 }
 0x31e   : > { %3385 = vmatmul.mubr.bf16.gmra.mrb[56].mxu1 %v3035_v52 }
 0x324   : > { %v3039_v5 = vld [vmem:[#allocation6 + $0x170] sm:$0xff] }
 0x325   : > { %3392 = vmatprep.mubr.bf16.mxu1 %v3039_v5 }
 0x326   : > { %3393 = vmatmul.mubr.bf16.gmra.mrb[60].mxu1 %v3038_v33 }
 0x32a   : > { %v7985_v58 = vpop.f32.mrb[48].mxu0 }
 0x32b   : > { %v7987_v20 = vpop.f32.mrb[49].mxu0 }
 0x32c   : > { %v7989_v59 = vpop.f32.mrb[50].mxu0 }
 0x32d   : > { %v7991_v53 = vpop.f32.mrb[51].mxu0  ;;  %v6220_v61 = vpop.f32.mrb[4].mxu1 }
 0x32e   : > { %v6221_v62 = vpop.f32.mrb[5].mxu1 }
 0x32f   : > { %v6222_v6 = vadd.f32 %v6221_v62, %v6220_v61  ;;  %v6223_v7 = vpop.f32.mrb[6].mxu1 }
 0x330   : > { %v6224_v0 = vpop.f32.mrb[7].mxu1 }
 0x331   : > { %v3283_v10 = vadd.f32 %v6222_v6, %v7970_v32  ;;  %v6225_v12 = vadd.f32 %v6224_v0, %v6223_v7 }
 0x333   : > { %v3444_v23 = vadd.f32 %v7854_v63, %v3283_v10  ;;  %v3286_v15 = vadd.f32 %v6225_v12, %v7970_v32 }
 0x335   : > { %v3564_v17 = vmax.f32 %v3444_v23, 0.0  ;;  %v3447_v60 = vadd.f32 %v7859_v29, %v3286_v15  ;;  %v6226_v18 = vpop.f32.mrb[8].mxu1 }
 0x336   : > { %v6227_v21 = vpop.f32.mrb[9].mxu1 }
 0x337   : > { %v3596_v24 = vsel %vm3594_vm4, %v3564_v17, -inf  ;;  %v3565_v26 = vmax.f32 %v3447_v60, 0.0  ;;  %v6228_v27 = vadd.f32 %v6227_v21, %v6226_v18  ;;  %v6229_v34 = vpop.f32.mrb[10].mxu1 }
 0x338   : > { %v3597_v35 = vmax.f32 %v3595_v22, %v3596_v24  ;;  %v6230_v63 = vpop.f32.mrb[11].mxu1 }
 0x339   : > { %v3599_v38 = vsel %vm3594_vm4, %v3565_v26, -inf  ;;  %v3291_v29 = vadd.f32 %v6228_v27, %v7970_v32  ;;  %v6231_v39 = vadd.f32 %v6230_v63, %v6229_v34 }
 0x33a   : > { %v3659_v40 = vcombine.high %v3597_v35, %v3597_v35  ;;  %v3666_v42 = vrot.slane %v3597_v35, %v8000_v19  ;;  %v3600_v43 = vmax.f32 %v3598_v36, %v3599_v38 }
 0x33b   : > { %v8009_v41 = vadd.f32 %v7881_v49, %v3291_v29  ;;  %v3294_v44 = vadd.f32 %v6231_v39, %v7970_v32 }
 0x33c   : > { %v3673_v45 = vrot.slane %v3659_v40, %v8000_v19  ;;  %v3674_v46 = vcombine.high %v3666_v42, %v3666_v42  ;;  %v3996_v47 = vsel %vm3995_vm5, %v3666_v42, -inf  ;;  %v3676_v51 = vcombine.high %v3600_v43, %v3600_v43 }
 0x33d   : > { %v3997_v54 = vrot.slane %v3996_v47, 4  ;;  %v3683_v57 = vrot.slane %v3600_v43, %v8000_v19  ;;  %v8016_v28 = vadd.f32 %v7886_v55, %v3294_v44 }
 0x33e   : > { %v3675_v52 = vcombine.high %v3673_v45, %v3673_v45  ;;  %v4003_v5 = vsel %vm3995_vm5, %v3674_v46, -inf  ;;  %v4010_v49 = vsel %vm3995_vm5, %v3673_v45, -inf  ;;  %v3690_v33 = vrot.slane %v3676_v51, %v8000_v19 }
 0x33f   : > { %v3998_v61 = vmax.f32 %v3996_v47, %v3997_v54  ;;  %v4004_v62 = vrot.slane %v4003_v5, 4  ;;  %v4011_v1 = vrot.slane %v4010_v49, 4  ;;  %v3691_v2 = vcombine.high %v3683_v57, %v3683_v57 }
 0x340   : > { %v4017_v4 = vsel %vm3995_vm5, %v3675_v52, -inf  ;;  %v3692_v6 = vcombine.high %v3690_v33, %v3690_v33  ;;  %v4024_v7 = vsel %vm3995_vm5, %v3683_v57, -inf  ;;  %v4038_v55 = vsel %vm3995_vm5, %v3690_v33, -inf }
 0x341   : > { %v3999_v0 = vrot.slane %v3998_v61, 2  ;;  %v4005_v10 = vmax.f32 %v4003_v5, %v4004_v62  ;;  %v4012_v12 = vmax.f32 %v4010_v49, %v4011_v1  ;;  %v4018_v3 = vrot.slane %v4017_v4, 4 }
 0x342   : > { %v4025_v14 = vrot.slane %v4024_v7, 4  ;;  %v4031_v23 = vsel %vm3995_vm5, %v3691_v2, -inf  ;;  %v4039_v15 = vrot.slane %v4038_v55, 4  ;;  %v4045_v16 = vsel %vm3995_vm5, %v3692_v6, -inf }
 0x343   : > { %v4000_v17 = vmax.f32 %v3998_v61, %v3999_v0  ;;  %v4006_v60 = vrot.slane %v4005_v10, 2  ;;  %v4013_v18 = vrot.slane %v4012_v12, 2  ;;  %v4019_v21 = vmax.f32 %v4017_v4, %v4018_v3 }
 0x344   : > { %v4026_v22 = vmax.f32 %v4024_v7, %v4025_v14  ;;  %v4032_v24 = vrot.slane %v4031_v23, 4  ;;  %v4040_v26 = vmax.f32 %v4038_v55, %v4039_v15  ;;  %v4046_v27 = vrot.slane %v4045_v16, 4 }
 0x345   : > { %v4001_v34 = vrot.slane %v4000_v17, 1  ;;  %v4007_v35 = vmax.f32 %v4005_v10, %v4006_v60  ;;  %v4014_v63 = vmax.f32 %v4012_v12, %v4013_v18  ;;  %v4020_v36 = vrot.slane %v4019_v21, 2 }
 0x346   : > { %v4027_v38 = vrot.slane %v4026_v22, 2  ;;  %v4033_v29 = vmax.f32 %v4031_v23, %v4032_v24  ;;  %v4041_v39 = vrot.slane %v4040_v26, 2  ;;  %v4047_v40 = vmax.f32 %v4045_v16, %v4046_v27 }
 0x347   : > { %v4008_v42 = vrot.slane %v4007_v35, 1  ;;  %v4015_v43 = vrot.slane %v4014_v63, 1  ;;  %v4021_v44 = vmax.f32 %v4019_v21, %v4020_v36  ;;  %v4002_v54 = vmax.f32 %v4000_v17, %v4001_v34 }
 0x348   : > { %v4028_v45 = vmax.f32 %v4026_v22, %v4027_v38  ;;  %v4034_v46 = vrot.slane %v4033_v29, 2  ;;  %v4042_v47 = vmax.f32 %v4040_v26, %v4041_v39  ;;  %v4048_v51 = vrot.slane %v4047_v40, 2 }
 0x349   : > { %v4009_v57 = vmax.f32 %v4007_v35, %v4008_v42  ;;  %v4016_v52 = vmax.f32 %v4014_v63, %v4015_v43  ;;  %v4022_v5 = vrot.slane %v4021_v44, 1  ;;  %v3566_v36 = vmax.f32 %v8009_v41, 0.0 }
 0x34a   : > { %v8026_v49 = vpop.f32.mrb[52].mxu0  ;;  %v4029_v33 = vrot.slane %v4028_v45, 1  ;;  %v4035_v61 = vmax.f32 %v4033_v29, %v4034_v46  ;;  %v4049_v62 = vmax.f32 %v4047_v40, %v4048_v51  ;;  %v4043_v6 = vrot.slane %v4042_v47, 1 }
 0x34b   : > { %v8028_v1 = vpop.f32.mrb[53].mxu0  ;;  %v4023_v2 = vmax.f32 %v4021_v44, %v4022_v5  ;;  %v4535_v4 = vsel %vm4534_vm7, %v4009_v57, %v4002_v54  ;;  %v3567_v39 = vmax.f32 %v8016_v28, 0.0 }
 0x34c   : > { %v8031_v7 = vpop.f32.mrb[54].mxu0  ;;  %v4537_v55 = vsel %vm4536_vm8, %v4016_v52, %v4535_v4  ;;  %v4030_v0 = vmax.f32 %v4028_v45, %v4029_v33  ;;  %v4036_v10 = vrot.slane %v4035_v61, 1  ;;  %v4050_v3 = vrot.slane %v4049_v62, 1  ;;  %v4630_v52 = vld [vmem:[#allocation4 + $0x1] sm:$0xff] }
 0x34d   : > { %v8034_v12 = vpop.f32.mrb[55].mxu0  ;;  %v4539_v14 = vsel %vm4538_vm9, %v4023_v2, %v4537_v55  ;;  %v6232_v23 = vpop.f32.mrb[12].mxu1  ;;  %v4044_v60 = vmax.f32 %v4042_v47, %v4043_v6  ;;  %v3601_v45 = vsel %vm3594_vm4, %v3566_v36, -inf  ;;  %v3604_v5 = vsel %vm3594_vm4, %v3567_v39, -inf }
 0x34e   : > { %v4037_v15 = vmax.f32 %v4035_v61, %v4036_v10  ;;  %v4541_v16 = vsel %vm4540_vm10, %v4030_v0, %v4539_v14  ;;  %v6233_v17 = vpop.f32.mrb[13].mxu1  ;;  %v4051_v22 = vmax.f32 %v4049_v62, %v4050_v3 }
 0x34f   : > { %v6234_v18 = vadd.f32 %v6233_v17, %v6232_v23  ;;  %v6235_v21 = vpop.f32.mrb[14].mxu1 }
 0x350   : > { %v4543_v24 = vsel %vm4542_vm11, %v4037_v15, %v4541_v16  ;;  %v6236_v26 = vpop.f32.mrb[15].mxu1 }
 0x351   : > { %v4545_v27 = vsel %vm4544_vm12, %v4044_v60, %v4543_v24  ;;  %v3299_v34 = vadd.f32 %v6234_v18, %v7970_v32  ;;  %v6237_v35 = vadd.f32 %v6236_v26, %v6235_v21 }
 0x352   : > { %v4547_v63 = vsel %vm4546_vm13, %v4051_v22, %v4545_v27 }
 0x353   : > { %4606 = vst.msk [vmem:[#allocation4 + $0x11] sm:$0xff] %vm3594_vm4, %v4547_v63  ;;  %v3460_v38 = vadd.f32 %v7879_v48, %v3299_v34  ;;  %v3302_v29 = vadd.f32 %v6237_v35, %v7970_v32  ;;  %v4614_v48 = vld [vmem:[#allocation4] sm:$0xff] }
 0x355   : > { %v3568_v40 = vmax.f32 %v3460_v38, 0.0  ;;  %v3463_v42 = vadd.f32 %v7883_v50, %v3302_v29  ;;  %v6238_v43 = vpop.f32.mrb[16].mxu1 }
 0x356   : > { %v6239_v44 = vpop.f32.mrb[17].mxu1 }
 0x357   : > { %v3602_v46 = vsel %vm3594_vm4, %v3568_v40, -inf  ;;  %v3569_v47 = vmax.f32 %v3463_v42, 0.0  ;;  %v6240_v51 = vadd.f32 %v6239_v44, %v6238_v43  ;;  %v6241_v54 = vpop.f32.mrb[18].mxu1 }
 0x358   : > { %v3603_v57 = vmax.f32 %v3601_v45, %v3602_v46  ;;  %v6242_v41 = vpop.f32.mrb[19].mxu1 }
 0x359   : > { %v3605_v28 = vsel %vm3594_vm4, %v3569_v47, -inf  ;;  %v3307_v33 = vadd.f32 %v6240_v51, %v7970_v32  ;;  %v6243_v50 = vadd.f32 %v6242_v41, %v6241_v54 }
 0x35a   : > { %v3693_v61 = vcombine.high %v3603_v57, %v3603_v57  ;;  %v3700_v62 = vrot.slane %v3603_v57, %v8000_v19  ;;  %v3606_v2 = vmax.f32 %v3604_v5, %v3605_v28  ;;  %v4631_v4 = vld [vmem:[#allocation4 + $0x11] sm:$0xff] }
 0x35b   : > { %v8054_v6 = vld [vmem:[#allocation4 + $0x10] sm:$0xff]  ;;  %v8057_v55 = vadd.f32 %v7941_v56, %v3307_v33  ;;  %v3310_v0 = vadd.f32 %v6243_v50, %v7970_v32  ;;  %v4638_v10 = vpack.c.bf16 %v4631_v4, %v4630_v52 }
 0x35c   : > { %v4622_v3 = vpack.c.bf16 %v8054_v6, %v4614_v48  ;;  %v3707_v14 = vrot.slane %v3693_v61, %v8000_v19  ;;  %v3708_v23 = vcombine.high %v3700_v62, %v3700_v62  ;;  %v4052_v15 = vsel %vm3995_vm5, %v3700_v62, -inf }
 0x35d   : > { %v3710_v16 = vcombine.high %v3606_v2, %v3606_v2  ;;  %v4053_v17 = vrot.slane %v4052_v15, 4  ;;  %v3717_v60 = vrot.slane %v3606_v2, %v8000_v19  ;;  %v8065_v18 = vadd.f32 %v7946_v11, %v3310_v0  ;;  %4646 = vrot.lane.b32.xlu1 %v4638_v10, %s6755_s2 }
 0x35e   : > { %4626 = vst.msk [vmem:[#allocation7] sm:$0xff] %vm3594_vm4, %v4622_v3  ;;  %v3709_v56 = vcombine.high %v3707_v14, %v3707_v14  ;;  %v4059_v21 = vsel %vm3995_vm5, %v3708_v23, -inf  ;;  %v4066_v22 = vsel %vm3995_vm5, %v3707_v14, -inf }
 0x35f   : > { %v3724_v24 = vrot.slane %v3710_v16, %v8000_v19  ;;  %v4054_v26 = vmax.f32 %v4052_v15, %v4053_v17  ;;  %v4060_v27 = vrot.slane %v4059_v21, 4  ;;  %v4067_v34 = vrot.slane %v4066_v22, 4 }
 0x360   : > { %v3725_v35 = vcombine.high %v3717_v60, %v3717_v60  ;;  %v4073_v63 = vsel %vm3995_vm5, %v3709_v56, -inf  ;;  %v4080_v11 = vsel %vm3995_vm5, %v3717_v60, -inf  ;;  %v6602_v60 = vld [vmem:[%s8766_s6 + $0x40] sm:$0xff]  }
 0x361   : > { %v3726_v36 = vcombine.high %v3724_v24, %v3724_v24  ;;  %v4094_v38 = vsel %vm3995_vm5, %v3724_v24, -inf  ;;  %v4055_v29 = vrot.slane %v4054_v26, 2  ;;  %v4061_v39 = vmax.f32 %v4059_v21, %v4060_v27  ;;  %v6603_v27 = vld [vmem:[%s8766_s6] sm:$0xff]   ;;  %6328 = vmatprep.subr.bf16.mxu0 %v6602_v60 }
 0x362   : > { %v4068_v40 = vmax.f32 %v4066_v22, %v4067_v34  ;;  %v4074_v42 = vrot.slane %v4073_v63, 4  ;;  %v4081_v43 = vrot.slane %v4080_v11, 4  ;;  %v4087_v44 = vsel %vm3995_vm5, %v3725_v35, -inf  ;;  %6329 = vmatpush3.bf16.msra.mxu0 %v6603_v27  ;;  %v6610_v27 = vld [vmem:[%s8766_s6 + $0x60] sm:$0xff]  }
 0x363   : > { %v4095_v45 = vrot.slane %v4094_v38, 4  ;;  %v4101_v46 = vsel %vm3995_vm5, %v3726_v36, -inf  ;;  %v4056_v47 = vmax.f32 %v4054_v26, %v4055_v29  ;;  %v4062_v51 = vrot.slane %v4061_v39, 2 }
 0x364   : > { %v4069_v54 = vrot.slane %v4068_v40, 2  ;;  %v4075_v57 = vmax.f32 %v4073_v63, %v4074_v42  ;;  %v4082_v41 = vmax.f32 %v4080_v11, %v4081_v43  ;;  %v4088_v52 = vrot.slane %v4087_v44, 4  ;;  %v8087_v11 = vld [vmem:[#allocation4 + $0x12] sm:$0xff] }
 0x365   : > { %v4096_v48 = vmax.f32 %v4094_v38, %v4095_v45  ;;  %v4102_v5 = vrot.slane %v4101_v46, 4  ;;  %v4057_v28 = vrot.slane %v4056_v47, 1  ;;  %v4063_v33 = vmax.f32 %v4061_v39, %v4062_v51  ;;  %v4663_v38 = vld [vmem:[#allocation4 + $0x2] sm:$0xff] }
 0x366   : > { %v4070_v50 = vmax.f32 %v4068_v40, %v4069_v54  ;;  %v4076_v61 = vrot.slane %v4075_v57, 2  ;;  %v4083_v62 = vrot.slane %v4082_v41, 2  ;;  %v4089_v2 = vmax.f32 %v4087_v44, %v4088_v52  ;;  %v6604_v51 = vld [vmem:[%s8766_s6 + $0x48] sm:$0xff]  }
 0x367   : > { %v4097_v4 = vrot.slane %v4096_v48, 2  ;;  %v4103_v0 = vmax.f32 %v4101_v46, %v4102_v5  ;;  %v4064_v10 = vrot.slane %v4063_v33, 1  ;;  %v4058_v56 = vmax.f32 %v4056_v47, %v4057_v28  ;;  %v6605_v52 = vld [vmem:[%s8766_s6 + $0x8] sm:$0xff]   ;;  %6330 = vmatprep.subr.bf16.mxu0 %v6604_v51 }
 0x368   : > { %v4071_v3 = vrot.slane %v4070_v50, 1  ;;  %v4077_v14 = vmax.f32 %v4075_v57, %v4076_v61  ;;  %v4084_v23 = vmax.f32 %v4082_v41, %v4083_v62  ;;  %v4090_v15 = vrot.slane %v4089_v2, 2  ;;  %6331 = vmatpush3.bf16.msra.mxu0 %v6605_v52 }
 0x369   : > { %v4098_v16 = vmax.f32 %v4096_v48, %v4097_v4  ;;  %v4104_v17 = vrot.slane %v4103_v0, 2  ;;  %v4065_v21 = vmax.f32 %v4063_v33, %v4064_v10  ;;  %v4671_v48 = vpack.c.bf16 %v8087_v11, %v4663_v38 }
 0x36a   : > { %v4072_v22 = vmax.f32 %v4070_v50, %v4071_v3  ;;  %v4078_v24 = vrot.slane %v4077_v14, 1  ;;  %v8080_v26 = vpop.f32.mrb[56].mxu0  ;;  %v4085_v34 = vrot.slane %v4084_v23, 1  ;;  %v4091_v35 = vmax.f32 %v4089_v2, %v4090_v15  ;;  %v6606_v3 = vld [vmem:[%s8766_s6 + $0x50] sm:$0xff]  }
 0x36b   : > { %v4105_v63 = vmax.f32 %v4103_v0, %v4104_v17  ;;  %v8085_v36 = vpop.f32.mrb[57].mxu0  ;;  %v4548_v39 = vsel %vm4534_vm7, %v4065_v21, %v4058_v56  ;;  %v4099_v40 = vrot.slane %v4098_v16, 1  ;;  %4675 = vst.msk [vmem:[#allocation7 + $0x8] sm:$0xff] %vm3594_vm4, %v4671_v48  ;;  %6332 = vmatprep.subr.bf16.mxu0 %v6606_v3  ;;  %v6608_v56 = vld [vmem:[%s8766_s6 + $0x58] sm:$0xff]   ;;  %v6613_v3 = vld [vmem:[%s8766_s6 + $0x28] sm:$0xff]  }
 0x36c   : > { %v4079_v29 = vmax.f32 %v4077_v14, %v4078_v24  ;;  %v8090_v42 = vpop.f32.mrb[58].mxu0  ;;  %v4549_v43 = vsel %vm4536_vm8, %v4072_v22, %v4548_v39  ;;  %v4086_v44 = vmax.f32 %v4084_v23, %v4085_v34  ;;  %v4092_v45 = vrot.slane %v4091_v35, 1  ;;  %v6607_v23 = vld [vmem:[%s8766_s6 + $0x10] sm:$0xff]   ;;  %v6609_v21 = vld [vmem:[%s8766_s6 + $0x18] sm:$0xff]  }
 0x36d   : > { %v8093_v47 = vpop.f32.mrb[59].mxu0  ;;  %v4106_v54 = vrot.slane %v4105_v63, 1  ;;  %v4100_v61 = vmax.f32 %v4098_v16, %v4099_v40  ;;  %v3570_v16 = vmax.f32 %v8057_v55, 0.0  ;;  %6333 = vmatpush3.bf16.msra.mxu0 %v6607_v23  ;;  %v3571_v22 = vmax.f32 %v8065_v18, 0.0 }
 0x36e   : > { %v4550_v57 = vsel %vm4538_vm9, %v4079_v29, %v4549_v43  ;;  %v4093_v5 = vmax.f32 %v4091_v35, %v4092_v45  ;;  %6334 = vmatprep.subr.bf16.mxu0 %v6608_v56 }
 0x36f   : > { %v6244_v46 = vpop.f32.mrb[20].mxu1  ;;  %v4551_v28 = vsel %vm4540_vm10, %v4086_v44, %v4550_v57  ;;  %v4107_v2 = vmax.f32 %v4105_v63, %v4106_v54  ;;  %v3607_v35 = vsel %vm3594_vm4, %v3570_v16, -inf  ;;  %v3610_v18 = vsel %vm3594_vm4, %v3571_v22, -inf }
 0x370   : > { %v6245_v41 = vpop.f32.mrb[21].mxu1  ;;  %v4552_v4 = vsel %vm4542_vm11, %v4093_v5, %v4551_v28 }
 0x371   : > { %v6246_v33 = vadd.f32 %v6245_v41, %v6244_v46  ;;  %v6247_v50 = vpop.f32.mrb[22].mxu1  ;;  %v4553_v14 = vsel %vm4544_vm12, %v4100_v61, %v4552_v4  ;;  %6335 = vmatpush3.bf16.msra.mxu0 %v6609_v21 }
 0x372   : > { %v6248_v62 = vpop.f32.mrb[23].mxu1  ;;  %v4554_v15 = vsel %vm4546_vm13, %v4107_v2, %v4553_v14  ;;  %6336 = vmatprep.subr.bf16.mxu0 %v6610_v27 }
 0x373   : > { %v3315_v0 = vadd.f32 %v6246_v33, %v7970_v32  ;;  %v6249_v10 = vadd.f32 %v6248_v62, %v6247_v50  ;;  %4607 = vst.msk [vmem:[#allocation4 + $0x21] sm:$0xff] %vm3594_vm4, %v4554_v15 }
 0x375   : > { %v3476_v17 = vadd.f32 %v7939_v8, %v3315_v0  ;;  %v3318_v60 = vadd.f32 %v6249_v10, %v7970_v32 }
 0x377   : > { %v3572_v24 = vmax.f32 %v3476_v17, 0.0  ;;  %v3479_v55 = vadd.f32 %v7943_v9, %v3318_v60  ;;  %v6250_v8 = vpop.f32.mrb[24].mxu1  ;;  %v6611_v9 = vld [vmem:[%s8766_s6 + $0x20] sm:$0xff]  }
 0x378   : > { %v6251_v34 = vpop.f32.mrb[25].mxu1  ;;  %6337 = vmatpush3.bf16.msra.mxu0 %v6611_v9 }
 0x379   : > { %v3608_v63 = vsel %vm3594_vm4, %v3572_v24, -inf  ;;  %v3573_v38 = vmax.f32 %v3479_v55, 0.0  ;;  %v6252_v29 = vadd.f32 %v6251_v34, %v6250_v8  ;;  %v6253_v39 = vpop.f32.mrb[26].mxu1 }
 0x37a   : > { %v3609_v40 = vmax.f32 %v3607_v35, %v3608_v63  ;;  %v6254_v43 = vpop.f32.mrb[27].mxu1  ;;  %v6614_v63 = vld [vmem:[%s8766_s6 + $0x70] sm:$0xff]  }
 0x37b   : > { %v3611_v44 = vsel %vm3594_vm4, %v3573_v38, -inf  ;;  %v3323_v45 = vadd.f32 %v6252_v29, %v7970_v32  ;;  %v6255_v46 = vadd.f32 %v6254_v43, %v6253_v39  ;;  %v6615_v43 = vld [vmem:[%s8766_s6 + $0x30] sm:$0xff]  }
 0x37c   : > { %v3727_v51 = vcombine.high %v3609_v40, %v3609_v40  ;;  %v3734_v54 = vrot.slane %v3609_v40, %v8000_v19  ;;  %v3612_v57 = vmax.f32 %v3610_v18, %v3611_v44 }
 0x37d   : > { %v8140_v41 = vadd.f32 %v7962_v30, %v3323_v45  ;;  %v3326_v52 = vadd.f32 %v6255_v46, %v7970_v32  ;;  %v6612_v30 = vld [vmem:[%s8766_s6 + $0x68] sm:$0xff]  }
 0x37e   : > { %v3741_v48 = vrot.slane %v3727_v51, %v8000_v19  ;;  %v3742_v5 = vcombine.high %v3734_v54, %v3734_v54  ;;  %v4108_v28 = vsel %vm3995_vm5, %v3734_v54, -inf  ;;  %v3744_v33 = vcombine.high %v3612_v57, %v3612_v57  ;;  %6338 = vmatprep.subr.bf16.mxu0 %v6612_v30 }
 0x37f   : > { %v4109_v50 = vrot.slane %v4108_v28, 4  ;;  %v3751_v61 = vrot.slane %v3612_v57, %v8000_v19  ;;  %v8147_v62 = vadd.f32 %v7972_v37, %v3326_v52  ;;  %6339 = vmatpush3.bf16.msra.mxu0 %v6613_v3 }
 0x380   : > { %v3743_v2 = vcombine.high %v3741_v48, %v3741_v48  ;;  %v4115_v4 = vsel %vm3995_vm5, %v3742_v5, -inf  ;;  %v4122_v0 = vsel %vm3995_vm5, %v3741_v48, -inf  ;;  %v3758_v10 = vrot.slane %v3744_v33, %v8000_v19  ;;  %6340 = vmatprep.subr.bf16.mxu0 %v6614_v63  ;;  %v6616_v33 = vld [vmem:[%s8766_s6 + $0x78] sm:$0xff]  }
 0x381   : > { %v4110_v14 = vmax.f32 %v4108_v28, %v4109_v50  ;;  %v4116_v23 = vrot.slane %v4115_v4, 4  ;;  %v4123_v15 = vrot.slane %v4122_v0, 4  ;;  %v3759_v37 = vcombine.high %v3751_v61, %v3751_v61 }
 0x382   : > { %v4129_v16 = vsel %vm3995_vm5, %v3743_v2, -inf  ;;  %v3760_v17 = vcombine.high %v3758_v10, %v3758_v10  ;;  %v4136_v60 = vsel %vm3995_vm5, %v3751_v61, -inf  ;;  %v4150_v56 = vsel %vm3995_vm5, %v3758_v10, -inf  ;;  %v6617_v2 = vld [vmem:[%s8766_s6 + $0x38] sm:$0xff]  }
 0x383   : > { %v4111_v21 = vrot.slane %v4110_v14, 2  ;;  %v4117_v22 = vmax.f32 %v4115_v4, %v4116_v23  ;;  %v4124_v24 = vmax.f32 %v4122_v0, %v4123_v15  ;;  %v4130_v55 = vrot.slane %v4129_v16, 4  ;;  %6341 = vmatpush3.bf16.msra.mxu0 %v6615_v43 }
 0x384   : > { %v4137_v8 = vrot.slane %v4136_v60, 4  ;;  %v4143_v27 = vsel %vm3995_vm5, %v3759_v37, -inf  ;;  %v4151_v34 = vrot.slane %v4150_v56, 4  ;;  %v4157_v35 = vsel %vm3995_vm5, %v3760_v17, -inf  ;;  %6342 = vmatprep.subr.bf16.mxu0 %v6616_v33  ;;  %v8175_v17 = vpop.f32.mrb[60].mxu0 }
 0x385   : > { %v4112_v38 = vmax.f32 %v4110_v14, %v4111_v21  ;;  %v4118_v29 = vrot.slane %v4117_v22, 2  ;;  %v4125_v39 = vrot.slane %v4124_v24, 2  ;;  %v4131_v40 = vmax.f32 %v4129_v16, %v4130_v55  ;;  %v4680_v14 = vld [vmem:[#allocation4 + $0x20] sm:$0xff] }
 0x386   : > { %v4138_v9 = vmax.f32 %v4136_v60, %v4137_v8  ;;  %v4144_v18 = vrot.slane %v4143_v27, 4  ;;  %v4152_v44 = vmax.f32 %v4150_v56, %v4151_v34  ;;  %v4158_v45 = vrot.slane %v4157_v35, 4 }
 0x387   : > { %v4113_v46 = vrot.slane %v4112_v38, 1  ;;  %v4119_v51 = vmax.f32 %v4117_v22, %v4118_v29  ;;  %v4126_v54 = vmax.f32 %v4124_v24, %v4125_v39  ;;  %v4132_v57 = vrot.slane %v4131_v40, 2  ;;  %6343 = vmatpush3.bf16.msra.mxu0 %v6617_v2  ;;  %v8177_v22 = vpop.f32.mrb[61].mxu0 }
 0x388   : > { %v4139_v52 = vrot.slane %v4138_v9, 2  ;;  %v4145_v48 = vmax.f32 %v4143_v27, %v4144_v18  ;;  %v4153_v5 = vrot.slane %v4152_v44, 2  ;;  %v4159_v28 = vmax.f32 %v4157_v35, %v4158_v45  ;;  %v8181_v34 = vpop.f32.mrb[62].mxu0  ;;  %v4712_v35 = vld [vmem:[#allocation4 + $0x21] sm:$0xff]  ;;  %v4711_v18 = vld [vmem:[#allocation4 + $0x11] sm:$0xff] }
 0x389   : > { %v4120_v50 = vrot.slane %v4119_v51, 1  ;;  %v4127_v61 = vrot.slane %v4126_v54, 1  ;;  %v4133_v30 = vmax.f32 %v4131_v40, %v4132_v57  ;;  %v4114_v23 = vmax.f32 %v4112_v38, %v4113_v46  ;;  %v8184_v39 = vpop.f32.mrb[63].mxu0 }
 0x38a   : > { %v4140_v4 = vmax.f32 %v4138_v9, %v4139_v52  ;;  %v4146_v0 = vrot.slane %v4145_v48, 2  ;;  %v4154_v10 = vmax.f32 %v4152_v44, %v4153_v5  ;;  %v4160_v3 = vrot.slane %v4159_v28, 2 }
 0x38b   : > { %v4121_v15 = vmax.f32 %v4119_v51, %v4120_v50  ;;  %v4128_v37 = vmax.f32 %v4126_v54, %v4127_v61  ;;  %v4134_v16 = vrot.slane %v4133_v30, 1  ;;  %v4687_v27 = vpack.c.bf16 %v4680_v14, %v8054_v6 }
 0x38c   : > { %v4141_v60 = vrot.slane %v4140_v4, 1  ;;  %v4147_v56 = vmax.f32 %v4145_v48, %v4146_v0  ;;  %v4161_v21 = vmax.f32 %v4159_v28, %v4160_v3  ;;  %v4155_v8 = vrot.slane %v4154_v10, 1  ;;  %v6256_v9 = vpop.f32.mrb[28].mxu1 }
 0x38d   : > { %v4135_v24 = vmax.f32 %v4133_v30, %v4134_v16  ;;  %v4555_v55 = vsel %vm4534_vm7, %v4121_v15, %v4114_v23  ;;  %4695 = vrot.lane.b32.xlu0 %v4687_v27, %s6755_s2  ;;  %v6257_v6 = vpop.f32.mrb[29].mxu1  ;;  %v4719_v46 = vpack.c.bf16 %v4712_v35, %v4711_v18  ;;  %v3574_v30 = vmax.f32 %v8140_v41, 0.0 }
 0x38e   : > { %v4556_v63 = vsel %vm4536_vm8, %v4128_v37, %v4555_v55  ;;  %v4142_v38 = vmax.f32 %v4140_v4, %v4141_v60  ;;  %v4148_v29 = vrot.slane %v4147_v56, 1  ;;  %v4162_v40 = vrot.slane %v4161_v21, 1  ;;  %v6259_v57 = vpop.f32.mrb[30].mxu1 }
 0x38f   : > { %v4557_v43 = vsel %vm4538_vm9, %v4135_v24, %v4556_v63  ;;  %v4156_v51 = vmax.f32 %v4154_v10, %v4155_v8  ;;  %v6258_v54 = vadd.f32 %v6257_v6, %v6256_v9  ;;  %v6260_v5 = vpop.f32.mrb[31].mxu1  ;;  %4723 = vst.msk [vmem:[#allocation7 + $0x10] sm:$0xff] %vm3594_vm4, %v4719_v46  ;;  %v3575_v0 = vmax.f32 %v8147_v62, 0.0  ;;  %v4632_v8 = vld [vmem:[#allocation4 + $0x21] sm:$0xff] }
 0x390   : > { %v4149_v44 = vmax.f32 %v4147_v56, %v4148_v29  ;;  %v4558_v45 = vsel %vm4540_vm10, %v4142_v38, %v4557_v43  ;;  %v4163_v52 = vmax.f32 %v4161_v21, %v4162_v40  ;;  %v6261_v50 = vadd.f32 %v6260_v5, %v6259_v57  ;;  %v4616_v40 = vld [vmem:[#allocation4 + $0x20] sm:$0xff] }
 0x391   : > { %v3331_v33 = vadd.f32 %v6258_v54, %v7970_v32  ;;  %v3613_v15 = vsel %vm3594_vm4, %v3574_v30, -inf }
 0x392   : > { %v4559_v48 = vsel %vm4542_vm11, %v4149_v44, %v4558_v45  ;;  %v3334_v4 = vadd.f32 %v6261_v50, %v7970_v32 }
 0x393   : > { %v4560_v28 = vsel %vm4544_vm12, %v4156_v51, %v4559_v48  ;;  %v3492_v2 = vadd.f32 %v7960_v25, %v3331_v33  ;;  %v3616_v25 = vsel %vm3594_vm4, %v3575_v0, -inf }
 0x394   : > { %v4561_v61 = vsel %vm4546_vm13, %v4163_v52, %v4560_v28  ;;  %v3495_v3 = vadd.f32 %v7964_v31, %v3334_v4  ;;  %v6262_v14 = vpop.f32.mrb[32].mxu1  ;;  %v4728_v31 = vld [vmem:[#allocation4 + $0x22] sm:$0xff] }
 0x395   : > { %4608 = vst.msk [vmem:[#allocation4 + $0x31] sm:$0xff] %vm3594_vm4, %v4561_v61  ;;  %v3576_v10 = vmax.f32 %v3492_v2, 0.0  ;;  %v6263_v23 = vpop.f32.mrb[33].mxu1 }
 0x396   : > { %v3577_v16 = vmax.f32 %v3495_v3, 0.0  ;;  %v6264_v60 = vadd.f32 %v6263_v23, %v6262_v14  ;;  %v6265_v56 = vpop.f32.mrb[34].mxu1 }
 0x397   : > { %v3614_v37 = vsel %vm3594_vm4, %v3576_v10, -inf  ;;  %v6266_v41 = vpop.f32.mrb[35].mxu1 }
 0x398   : > { %v3615_v21 = vmax.f32 %v3613_v15, %v3614_v37  ;;  %v3617_v24 = vsel %vm3594_vm4, %v3577_v16, -inf  ;;  %v3339_v62 = vadd.f32 %v6264_v60, %v7970_v32  ;;  %v6267_v55 = vadd.f32 %v6266_v41, %v6265_v56 }
 0x399   : > { %v3618_v63 = vmax.f32 %v3616_v25, %v3617_v24 }
 0x39a   : > { %v3761_v27 = vcombine.high %v3615_v21, %v3615_v21  ;;  %v3768_v35 = vrot.slane %v3615_v21, %v8000_v19  ;;  %v8209_v43 = vadd.f32 %v7987_v20, %v3339_v62  ;;  %v3342_v9 = vadd.f32 %v6267_v55, %v7970_v32 }
 0x39b   : > { %v3778_v51 = vcombine.high %v3618_v63, %v3618_v63  ;;  %v3785_v57 = vrot.slane %v3618_v63, %v8000_v19  ;;  %v4735_v32 = vpack.c.bf16 %v4728_v31, %v8087_v11 }
 0x39c   : > { %v4633_v38 = vld [vmem:[#allocation4 + $0x31] sm:$0xff]  ;;  %v3775_v45 = vrot.slane %v3761_v27, %v8000_v19  ;;  %v3776_v6 = vcombine.high %v3768_v35, %v3768_v35  ;;  %v4164_v46 = vsel %vm3995_vm5, %v3768_v35, -inf  ;;  %v8219_v52 = vadd.f32 %v7991_v53, %v3342_v9 }
 0x39d   : > { %v8206_v29 = vld [vmem:[#allocation4 + $0x30] sm:$0xff]  ;;  %v8212_v18 = vpack.c.bf16 %v4633_v38, %v4632_v8  ;;  %v4165_v54 = vrot.slane %v4164_v46, 4  ;;  %v3792_v28 = vrot.slane %v3778_v51, %v8000_v19  ;;  %v3793_v61 = vcombine.high %v3785_v57, %v3785_v57 }
 0x39e   : > { %v4623_v44 = vpack.c.bf16 %v8206_v29, %v4616_v40  ;;  %v3777_v20 = vcombine.high %v3775_v45, %v3775_v45  ;;  %v4171_v48 = vsel %vm3995_vm5, %v3776_v6, -inf  ;;  %v4178_v5 = vsel %vm3995_vm5, %v3775_v45, -inf }
 0x39f   : > { %4648 = vrot.lane.b32.xlu1 %v8212_v18, %s6755_s2  ;;  %v4166_v33 = vmax.f32 %v4164_v46, %v4165_v54  ;;  %v4172_v50 = vrot.slane %v4171_v48, 4  ;;  %v4179_v53 = vrot.slane %v4178_v5, 4  ;;  %v3794_v2 = vcombine.high %v3792_v28, %v3792_v28 }
 0x3a0   : > { %4627 = vst.msk [vmem:[#allocation7 + $0x28] sm:$0xff] %vm3594_vm4, %v4623_v44  ;;  %4772 = vst.msk [vmem:[#allocation7 + $0x18] sm:$0xff] %vm3594_vm4, %v4623_v44  ;;  %v4185_v30 = vsel %vm3995_vm5, %v3777_v20, -inf  ;;  %v4192_v11 = vsel %vm3995_vm5, %v3785_v57, -inf  ;;  %v4206_v4 = vsel %vm3995_vm5, %v3792_v28, -inf  ;;  %v4199_v15 = vsel %vm3995_vm5, %v3793_v61, -inf }
 0x3a1   : > { %v4167_v0 = vrot.slane %v4166_v33, 2  ;;  %v4173_v10 = vmax.f32 %v4171_v48, %v4172_v50  ;;  %v4180_v3 = vmax.f32 %v4178_v5, %v4179_v53  ;;  %v4186_v14 = vrot.slane %v4185_v30, 4  ;;  %v4665_v61 = vld [vmem:[#allocation4 + $0x22] sm:$0xff] }
 0x3a2   : > { %v4193_v23 = vrot.slane %v4192_v11, 4  ;;  %v4207_v37 = vrot.slane %v4206_v4, 4  ;;  %v4213_v16 = vsel %vm3995_vm5, %v3794_v2, -inf  ;;  %v4200_v24 = vrot.slane %v4199_v15, 4 }
 0x3a3   : > { %4743 = vrot.lane.b32.xlu1 %v4735_v32, %s6755_s2  ;;  %v4168_v60 = vmax.f32 %v4166_v33, %v4167_v0  ;;  %v4174_v56 = vrot.slane %v4173_v10, 2  ;;  %v4181_v21 = vrot.slane %v4180_v3, 2  ;;  %v4187_v41 = vmax.f32 %v4185_v30, %v4186_v14  ;;  %v8235_v32 = vld [vmem:[#allocation4 + $0x32] sm:$0xff]  ;;  %v6619_v0 = vld [vmem:[%s8766_s6 + $0x80] sm:$0xff]  }
 0x3a4   : > { %v4194_v25 = vmax.f32 %v4192_v11, %v4193_v23  ;;  %v4208_v62 = vmax.f32 %v4206_v4, %v4207_v37  ;;  %v4214_v55 = vrot.slane %v4213_v16, 4  ;;  %v4201_v38 = vmax.f32 %v4199_v15, %v4200_v24  ;;  %v6618_v4 = vld [vmem:[%s8766_s6 + $0xc0] sm:$0xff]  }
 0x3a5   : > { %v4169_v8 = vrot.slane %v4168_v60, 1  ;;  %v4175_v31 = vmax.f32 %v4173_v10, %v4174_v56  ;;  %v4182_v27 = vmax.f32 %v4180_v3, %v4181_v21  ;;  %v4188_v35 = vrot.slane %v4187_v41, 2  ;;  %v6620_v10 = vld [vmem:[%s8766_s6 + $0xc8] sm:$0xff]   ;;  %6368 = vmatprep.subr.bf16.mxu1 %v6618_v4 }
 0x3a6   : > { %v4195_v63 = vrot.slane %v4194_v25, 2  ;;  %v4209_v40 = vrot.slane %v4208_v62, 2  ;;  %v4215_v9 = vmax.f32 %v4213_v16, %v4214_v55  ;;  %v4202_v51 = vrot.slane %v4201_v38, 2  ;;  %6369 = vmatpush3.bf16.msra.mxu1 %v6619_v0 }
 0x3a7   : > { %v4176_v44 = vrot.slane %v4175_v31, 1  ;;  %v4183_v45 = vrot.slane %v4182_v27, 1  ;;  %v4189_v6 = vmax.f32 %v4187_v41, %v4188_v35  ;;  %v4170_v20 = vmax.f32 %v4168_v60, %v4169_v8  ;;  %6370 = vmatprep.subr.bf16.mxu1 %v6620_v10  ;;  %v6622_v8 = vld [vmem:[%s8766_s6 + $0xd0] sm:$0xff]  }
 0x3a8   : > { %v4196_v46 = vmax.f32 %v4194_v25, %v4195_v63  ;;  %v4210_v54 = vmax.f32 %v4208_v62, %v4209_v40  ;;  %v4216_v57 = vrot.slane %v4215_v9, 2  ;;  %v4203_v50 = vmax.f32 %v4201_v38, %v4202_v51  ;;  %v6621_v25 = vld [vmem:[%s8766_s6 + $0x88] sm:$0xff]   ;;  %v8264_v38 = vld [vmem:[%s8765_s5] ss:$0 sm:$0xff] }
 0x3a9   : > { %v4177_v48 = vmax.f32 %v4175_v31, %v4176_v44  ;;  %v4184_v5 = vmax.f32 %v4182_v27, %v4183_v45  ;;  %v4190_v28 = vrot.slane %v4189_v6, 1  ;;  %v4672_v3 = vpack.c.bf16 %v8235_v32, %v4665_v61  ;;  %v6623_v45 = vld [vmem:[%s8766_s6 + $0x90] sm:$0xff]  }
 0x3aa   : > { %v4197_v33 = vrot.slane %v4196_v46, 1  ;;  %v4217_v53 = vmax.f32 %v4215_v9, %v4216_v57  ;;  %v4211_v11 = vrot.slane %v4210_v54, 1  ;;  %v4204_v15 = vrot.slane %v4203_v50, 1  ;;  %6371 = vmatpush3.bf16.msra.mxu1 %v6621_v25 }
 0x3ab   : > { %v4191_v30 = vmax.f32 %v4189_v6, %v4190_v28  ;;  %v4562_v2 = vsel %vm4534_vm7, %v4177_v48, %v4170_v20  ;;  %4676 = vst.msk [vmem:[#allocation7 + $0x30] sm:$0xff] %vm3594_vm4, %v4672_v3  ;;  %4820 = vst.msk [vmem:[#allocation7 + $0x20] sm:$0xff] %vm3594_vm4, %v4672_v3  ;;  %v3578_v6 = vmax.f32 %v8209_v43, 0.0  ;;  %6372 = vmatprep.subr.bf16.mxu1 %v6622_v8  ;;  %v3579_v57 = vmax.f32 %v8219_v52, 0.0  ;;  %v6625_v43 = vld [vmem:[%s8766_s6 + $0x98] sm:$0xff]   ;;  %v6626_v52 = vld [vmem:[%s8766_s6 + $0xe0] sm:$0xff]  }
 0x3ac   : > { %v4563_v14 = vsel %vm4536_vm8, %v4184_v5, %v4562_v2  ;;  %v4198_v23 = vmax.f32 %v4196_v46, %v4197_v33  ;;  %v4218_v37 = vrot.slane %v4217_v53, 1  ;;  %v6268_v60 = vpop.f32.mrb[36].mxu1  ;;  %v4205_v56 = vmax.f32 %v4203_v50, %v4204_v15  ;;  %v6627_v15 = vld [vmem:[%s8766_s6 + $0xa0] sm:$0xff]  }
 0x3ad   : > { %v4564_v16 = vsel %vm4538_vm9, %v4191_v30, %v4563_v14  ;;  %v6269_v41 = vpop.f32.mrb[37].mxu1  ;;  %v4212_v24 = vmax.f32 %v4210_v54, %v4211_v11  ;;  %v6624_v54 = vld [vmem:[%s8766_s6 + $0xd8] sm:$0xff]   ;;  %v3622_v2 = vsel %vm3594_vm4, %v3579_v57, -inf }
 0x3ae   : > { %v4565_v21 = vsel %vm4540_vm10, %v4198_v23, %v4564_v16  ;;  %v6270_v62 = vadd.f32 %v6269_v41, %v6268_v60  ;;  %v6271_v55 = vpop.f32.mrb[38].mxu1  ;;  %v4219_v31 = vmax.f32 %v4217_v53, %v4218_v37  ;;  %6373 = vmatpush3.bf16.msra.mxu1 %v6623_v45 }
 0x3af   : > { %v4566_v27 = vsel %vm4542_vm11, %v4205_v56, %v4565_v21  ;;  %v6272_v35 = vpop.f32.mrb[39].mxu1  ;;  %6374 = vmatprep.subr.bf16.mxu1 %v6624_v54  ;;  %v6628_v56 = vld [vmem:[%s8766_s6 + $0xe8] sm:$0xff]  }
 0x3b0   : > { %v4567_v63 = vsel %vm4544_vm12, %v4212_v24, %v4566_v27  ;;  %v3347_v40 = vadd.f32 %v8264_v38, %v6270_v62  ;;  %v6273_v9 = vadd.f32 %v6272_v35, %v6271_v55  ;;  %v6629_v35 = vld [vmem:[%s8766_s6 + $0xa8] sm:$0xff]  }
 0x3b1   : > { %v4568_v44 = vsel %vm4546_vm13, %v4219_v31, %v4567_v63 }
 0x3b2   : > { %4609 = vst.msk [vmem:[#allocation4 + $0x41] sm:$0xff] %vm3594_vm4, %v4568_v44  ;;  %v3508_v46 = vadd.f32 %v7985_v58, %v3347_v40  ;;  %v3350_v51 = vadd.f32 %v8264_v38, %v6273_v9  ;;  %v3619_v58 = vsel %vm3594_vm4, %v3578_v6, -inf  ;;  %6375 = vmatpush3.bf16.msra.mxu1 %v6625_v43 }
 0x3b3   : > { %6376 = vmatprep.subr.bf16.mxu1 %v6626_v52 }
 0x3b4   : > { %v3580_v20 = vmax.f32 %v3508_v46, 0.0  ;;  %v3511_v48 = vadd.f32 %v7989_v59, %v3350_v51  ;;  %v6274_v5 = vpop.f32.mrb[40].mxu1 }
 0x3b5   : > { %v6275_v28 = vpop.f32.mrb[41].mxu1 }
 0x3b6   : > { %v3620_v33 = vsel %vm3594_vm4, %v3580_v20, -inf  ;;  %v3581_v50 = vmax.f32 %v3511_v48, 0.0  ;;  %v6276_v53 = vadd.f32 %v6275_v28, %v6274_v5  ;;  %v6277_v61 = vpop.f32.mrb[42].mxu1  ;;  %6377 = vmatpush3.bf16.msra.mxu1 %v6627_v15 }
 0x3b7   : > { %v3621_v59 = vmax.f32 %v3619_v58, %v3620_v33  ;;  %v6278_v30 = vpop.f32.mrb[43].mxu1  ;;  %6378 = vmatprep.subr.bf16.mxu1 %v6628_v56  ;;  %v6631_v33 = vld [vmem:[%s8766_s6 + $0xb0] sm:$0xff]  }
 0x3b8   : > { %v3623_v11 = vsel %vm3594_vm4, %v3581_v50, -inf  ;;  %v3355_v4 = vadd.f32 %v8264_v38, %v6276_v53  ;;  %v6279_v0 = vadd.f32 %v6278_v30, %v6277_v61 }
 0x3b9   : > { %v3795_v10 = vcombine.high %v3621_v59, %v3621_v59  ;;  %v3802_v3 = vrot.slane %v3621_v59, %v8000_v19  ;;  %v3624_v14 = vmax.f32 %v3622_v2, %v3623_v11  ;;  %v4682_v23 = vld [vmem:[#allocation4 + $0x40] sm:$0xff] }
 0x3ba   : > { %v8296_v37 = vadd.f32 %v8028_v1, %v3355_v4  ;;  %v3358_v16 = vadd.f32 %v8264_v38, %v6279_v0  ;;  %v4688_v60 = vpack.c.bf16 %v4682_v23, %v8206_v29  ;;  %6379 = vmatpush3.bf16.msra.mxu1 %v6629_v35 }
 0x3bb   : > { %v3809_v21 = vrot.slane %v3795_v10, %v8000_v19  ;;  %v3810_v41 = vcombine.high %v3802_v3, %v3802_v3  ;;  %v4220_v25 = vsel %vm3995_vm5, %v3802_v3, -inf  ;;  %v3812_v24 = vcombine.high %v3624_v14, %v3624_v14 }
 0x3bc   : > { %v4221_v62 = vrot.slane %v4220_v25, 4  ;;  %v3819_v55 = vrot.slane %v3624_v14, %v8000_v19  ;;  %v8307_v1 = vadd.f32 %v8034_v12, %v3358_v16  ;;  %4697 = vrot.lane.b32.xlu0 %v4688_v60, %s6755_s2  ;;  %v6630_v12 = vld [vmem:[%s8766_s6 + $0xf0] sm:$0xff]   ;;  %v6633_v60 = vld [vmem:[%s8766_s6 + $0xb8] sm:$0xff]  }
 0x3bd   : > { %v3811_v29 = vcombine.high %v3809_v21, %v3809_v21  ;;  %v4227_v8 = vsel %vm3995_vm5, %v3810_v41, -inf  ;;  %v4234_v31 = vsel %vm3995_vm5, %v3809_v21, -inf  ;;  %v3826_v27 = vrot.slane %v3812_v24, %v8000_v19  ;;  %6380 = vmatprep.subr.bf16.mxu1 %v6630_v12 }
 0x3be   : > { %v4222_v63 = vmax.f32 %v4220_v25, %v4221_v62  ;;  %v4228_v40 = vrot.slane %v4227_v8, 4  ;;  %v4235_v9 = vrot.slane %v4234_v31, 4  ;;  %v3827_v44 = vcombine.high %v3819_v55, %v3819_v55  ;;  %6381 = vmatpush3.bf16.msra.mxu1 %v6631_v33 }
 0x3bf   : > { %v4241_v45 = vsel %vm3995_vm5, %v3811_v29, -inf  ;;  %v3828_v6 = vcombine.high %v3826_v27, %v3826_v27  ;;  %v4248_v46 = vsel %vm3995_vm5, %v3819_v55, -inf  ;;  %v4262_v51 = vsel %vm3995_vm5, %v3826_v27, -inf  ;;  %v8335_v29 = vld [vmem:[#allocation4 + $0x41] sm:$0xff] }
 0x3c0   : > { %v4223_v54 = vrot.slane %v4222_v63, 2  ;;  %v4229_v57 = vmax.f32 %v4227_v8, %v4228_v40  ;;  %v4236_v20 = vmax.f32 %v4234_v31, %v4235_v9  ;;  %v4242_v48 = vrot.slane %v4241_v45, 4  ;;  %4792 = vrot.lane.b32.xlu0 %v8212_v18, %s6755_s2  ;;  %v6632_v18 = vld [vmem:[%s8766_s6 + $0xf8] sm:$0xff]  }
 0x3c1   : > { %v4249_v5 = vrot.slane %v4248_v46, 4  ;;  %v4255_v28 = vsel %vm3995_vm5, %v3827_v44, -inf  ;;  %v4263_v43 = vrot.slane %v4262_v51, 4  ;;  %v4269_v58 = vsel %vm3995_vm5, %v3828_v6, -inf  ;;  %6382 = vmatprep.subr.bf16.mxu1 %v6632_v18  ;;  %v4713_v44 = vld [vmem:[#allocation4 + $0x31] sm:$0xff] }
 0x3c2   : > { %v4224_v50 = vmax.f32 %v4222_v63, %v4223_v54  ;;  %v4230_v53 = vrot.slane %v4229_v57, 2  ;;  %v4237_v61 = vrot.slane %v4236_v20, 2  ;;  %v4243_v52 = vmax.f32 %v4241_v45, %v4242_v48  ;;  %6383 = vmatpush3.bf16.msra.mxu1 %v6633_v60 }
 0x3c3   : > { %v4250_v59 = vmax.f32 %v4248_v46, %v4249_v5  ;;  %v4256_v30 = vrot.slane %v4255_v28, 4  ;;  %v4264_v2 = vmax.f32 %v4262_v51, %v4263_v43  ;;  %v4270_v11 = vrot.slane %v4269_v58, 4 }
 0x3c4   : > { %v4225_v4 = vrot.slane %v4224_v50, 1  ;;  %v4231_v0 = vmax.f32 %v4229_v57, %v4230_v53  ;;  %v4238_v10 = vmax.f32 %v4236_v20, %v4237_v61  ;;  %v4244_v3 = vrot.slane %v4243_v52, 2 }
 0x3c5   : > { %v4251_v14 = vrot.slane %v4250_v59, 2  ;;  %v4257_v23 = vmax.f32 %v4255_v28, %v4256_v30  ;;  %v4265_v15 = vrot.slane %v4264_v2, 2  ;;  %v4271_v16 = vmax.f32 %v4269_v58, %v4270_v11 }
 0x3c6   : > { %v4232_v56 = vrot.slane %v4231_v0, 1  ;;  %v4239_v21 = vrot.slane %v4238_v10, 1  ;;  %v4245_v41 = vmax.f32 %v4243_v52, %v4244_v3  ;;  %v4226_v8 = vmax.f32 %v4224_v50, %v4225_v4 }
 0x3c7   : > { %v4252_v25 = vmax.f32 %v4250_v59, %v4251_v14  ;;  %v4258_v24 = vrot.slane %v4257_v23, 2  ;;  %v4266_v62 = vmax.f32 %v4264_v2, %v4265_v15  ;;  %v4272_v55 = vrot.slane %v4271_v16, 2 }
 0x3c8   : > { %v4233_v31 = vmax.f32 %v4231_v0, %v4232_v56  ;;  %v4240_v27 = vmax.f32 %v4238_v10, %v4239_v21  ;;  %v4246_v35 = vrot.slane %v4245_v41, 1  ;;  %v4720_v46 = vpack.c.bf16 %v8335_v29, %v4713_v44 }
 0x3c9   : > { %v4253_v63 = vrot.slane %v4252_v25, 1  ;;  %v4259_v40 = vmax.f32 %v4257_v23, %v4258_v24  ;;  %v4273_v9 = vmax.f32 %v4271_v16, %v4272_v55  ;;  %v4267_v6 = vrot.slane %v4266_v62, 1 }
 0x3ca   : > { %v4247_v12 = vmax.f32 %v4245_v41, %v4246_v35  ;;  %v4569_v45 = vsel %vm4534_vm7, %v4233_v31, %v4226_v8  ;;  %4724 = vst.msk [vmem:[#allocation7 + $0x38] sm:$0xff] %vm3594_vm4, %v4720_v46  ;;  %v3582_v0 = vmax.f32 %v8296_v37, 0.0  ;;  %v3583_v14 = vmax.f32 %v8307_v1, 0.0  ;;  %v8359_v31 = vld [vmem:[#allocation4 + $0x42] sm:$0xff] }
 0x3cb   : > { %v4570_v51 = vsel %vm4536_vm8, %v4240_v27, %v4569_v45  ;;  %v4254_v54 = vmax.f32 %v4252_v25, %v4253_v63  ;;  %v4260_v57 = vrot.slane %v4259_v40, 1  ;;  %v4274_v20 = vrot.slane %v4273_v9, 1 }
 0x3cc   : > { %v4571_v48 = vsel %vm4538_vm9, %v4247_v12, %v4570_v51  ;;  %v6280_v5 = vpop.f32.mrb[44].mxu1  ;;  %v4268_v33 = vmax.f32 %v4266_v62, %v4267_v6  ;;  %v3625_v56 = vsel %vm3594_vm4, %v3582_v0, -inf }
 0x3cd   : > { %v4261_v28 = vmax.f32 %v4259_v40, %v4260_v57  ;;  %v4572_v43 = vsel %vm4540_vm10, %v4254_v54, %v4571_v48  ;;  %v6281_v58 = vpop.f32.mrb[45].mxu1  ;;  %v4275_v61 = vmax.f32 %v4273_v9, %v4274_v20  ;;  %v4618_v9 = vld [vmem:[#allocation4 + $0x40] sm:$0xff] }
 0x3ce   : > { %v6282_v50 = vadd.f32 %v6281_v58, %v6280_v5  ;;  %v6283_v53 = vpop.f32.mrb[46].mxu1 }
 0x3cf   : > { %v4573_v52 = vsel %vm4542_vm11, %v4261_v28, %v4572_v43  ;;  %v4647_v18 = vpop.permute.xlu1 %4646  ;;  %v6284_v59 = vpop.f32.mrb[47].mxu1 }
 0x3d0   : > { %v4574_v30 = vsel %vm4544_vm12, %v4268_v33, %v4573_v52  ;;  %v3363_v2 = vadd.f32 %v8264_v38, %v6282_v50  ;;  %4659 = vst.msk [vmem:[#allocation7] sm:$0xff] %vm4658_vm14, %v4647_v18  ;;  %v6285_v11 = vadd.f32 %v6284_v59, %v6283_v53 }
 0x3d1   : > { %v4575_v4 = vsel %vm4546_vm13, %v4275_v61, %v4574_v30 }
 0x3d2   : > { %4610 = vst.msk [vmem:[#allocation4 + $0x51] sm:$0xff] %vm3594_vm4, %v4575_v4  ;;  %v3524_v10 = vadd.f32 %v8026_v49, %v3363_v2  ;;  %v3366_v3 = vadd.f32 %v8264_v38, %v6285_v11  ;;  %v3628_v49 = vsel %vm3594_vm4, %v3583_v14, -inf }
 0x3d4   : > { %v3584_v23 = vmax.f32 %v3524_v10, 0.0  ;;  %v3527_v15 = vadd.f32 %v8031_v7, %v3366_v3  ;;  %v6286_v16 = vpop.f32.mrb[48].mxu1 }
 0x3d5   : > { %v6287_v60 = vpop.f32.mrb[49].mxu1 }
 0x3d6   : > { %v3626_v21 = vsel %vm3594_vm4, %v3584_v23, -inf  ;;  %v3585_v41 = vmax.f32 %v3527_v15, 0.0  ;;  %v6288_v25 = vadd.f32 %v6287_v60, %v6286_v16  ;;  %v6289_v24 = vpop.f32.mrb[50].mxu1 }
 0x3d7   : > { %v3627_v62 = vmax.f32 %v3625_v56, %v3626_v21  ;;  %v6290_v37 = vpop.f32.mrb[51].mxu1 }
 0x3d8   : > { %v3629_v55 = vsel %vm3594_vm4, %v3585_v41, -inf  ;;  %v3371_v1 = vadd.f32 %v8264_v38, %v6288_v25  ;;  %v6291_v8 = vadd.f32 %v6290_v37, %v6289_v24 }
 0x3d9   : > { %v3829_v7 = vcombine.high %v3627_v62, %v3627_v62  ;;  %v3836_v27 = vrot.slane %v3627_v62, %v8000_v19  ;;  %v3630_v35 = vmax.f32 %v3628_v49, %v3629_v55  ;;  %v8362_v63 = vld [vmem:[#allocation4 + $0x51] sm:$0xff] }
 0x3da   : > { %v8364_v40 = vld [vmem:[#allocation4 + $0x50] sm:$0xff]  ;;  %v8367_v44 = vadd.f32 %v8085_v36, %v3371_v1  ;;  %v3374_v12 = vadd.f32 %v8264_v38, %v6291_v8  ;;  %v8372_v45 = vpack.c.bf16 %v8362_v63, %v8335_v29  ;;  %v4736_v29 = vpack.c.bf16 %v8359_v31, %v8235_v32 }
 0x3db   : > { %v4624_v6 = vpack.c.bf16 %v8364_v40, %v4618_v9  ;;  %v3843_v46 = vrot.slane %v3829_v7, %v8000_v19  ;;  %v3844_v51 = vcombine.high %v3836_v27, %v3836_v27  ;;  %v4276_v54 = vsel %vm3995_vm5, %v3836_v27, -inf }
 0x3dc   : > { %v3846_v57 = vcombine.high %v3630_v35, %v3630_v35  ;;  %v4277_v20 = vrot.slane %v4276_v54, 4  ;;  %v3853_v48 = vrot.slane %v3630_v35, %v8000_v19  ;;  %v8379_v36 = vadd.f32 %v8093_v47, %v3374_v12  ;;  %4650 = vrot.lane.b32.xlu1 %v8372_v45, %s6755_s2 }
 0x3dd   : > { %4628 = vst.msk [vmem:[#allocation7 + $0x50] sm:$0xff] %vm3594_vm4, %v4624_v6  ;;  %4773 = vst.msk [vmem:[#allocation7 + $0x40] sm:$0xff] %vm3594_vm4, %v4624_v6  ;;  %v3845_v5 = vcombine.high %v3843_v46, %v3843_v46  ;;  %v4283_v28 = vsel %vm3995_vm5, %v3844_v51, -inf  ;;  %v4290_v43 = vsel %vm3995_vm5, %v3843_v46, -inf }
 0x3de   : > { %v3860_v58 = vrot.slane %v3846_v57, %v8000_v19  ;;  %v4278_v33 = vmax.f32 %v4276_v54, %v4277_v20  ;;  %v4284_v47 = vrot.slane %v4283_v28, 4  ;;  %v4291_v50 = vrot.slane %v4290_v43, 4 }
 0x3df   : > { %v3861_v53 = vcombine.high %v3853_v48, %v3853_v48  ;;  %v4297_v61 = vsel %vm3995_vm5, %v3845_v5, -inf  ;;  %v4304_v32 = vsel %vm3995_vm5, %v3853_v48, -inf }
 0x3e0   : > { %v3862_v52 = vcombine.high %v3860_v58, %v3860_v58  ;;  %v4318_v18 = vsel %vm3995_vm5, %v3860_v58, -inf  ;;  %v4279_v59 = vrot.slane %v4278_v33, 2  ;;  %v4285_v30 = vmax.f32 %v4283_v28, %v4284_v47  ;;  %4745 = vrot.lane.b32.xlu1 %v4736_v29, %s6755_s2 }
 0x3e1   : > { %v4292_v2 = vmax.f32 %v4290_v43, %v4291_v50  ;;  %v4298_v11 = vrot.slane %v4297_v61, 4  ;;  %v4305_v4 = vrot.slane %v4304_v32, 4  ;;  %v4311_v0 = vsel %vm3995_vm5, %v3861_v53, -inf }
 0x3e2   : > { %v4319_v10 = vrot.slane %v4318_v18, 4  ;;  %v4325_v3 = vsel %vm3995_vm5, %v3862_v52, -inf  ;;  %v4280_v14 = vmax.f32 %v4278_v33, %v4279_v59  ;;  %v4286_v23 = vrot.slane %v4285_v30, 2 }
 0x3e3   : > { %v4293_v15 = vrot.slane %v4292_v2, 2  ;;  %v4299_v16 = vmax.f32 %v4297_v61, %v4298_v11  ;;  %v4306_v60 = vmax.f32 %v4304_v32, %v4305_v4  ;;  %v4312_v56 = vrot.slane %v4311_v0, 4  ;;  %v8397_v61 = vld [vmem:[#allocation4 + $0x52] sm:$0xff] }
 0x3e4   : > { %v4320_v21 = vmax.f32 %v4318_v18, %v4319_v10  ;;  %v4326_v41 = vrot.slane %v4325_v3, 4  ;;  %v4281_v25 = vrot.slane %v4280_v14, 1  ;;  %v4287_v24 = vmax.f32 %v4285_v30, %v4286_v23 }
 0x3e5   : > { %v4294_v62 = vmax.f32 %v4292_v2, %v4293_v15  ;;  %v4300_v37 = vrot.slane %v4299_v16, 2  ;;  %v4307_v49 = vrot.slane %v4306_v60, 2  ;;  %v4313_v55 = vmax.f32 %v4311_v0, %v4312_v56 }
 0x3e6   : > { %v4321_v1 = vrot.slane %v4320_v21, 2  ;;  %v4327_v8 = vmax.f32 %v4325_v3, %v4326_v41  ;;  %v4288_v7 = vrot.slane %v4287_v24, 1  ;;  %v4282_v51 = vmax.f32 %v4280_v14, %v4281_v25 }
 0x3e7   : > { %v4295_v27 = vrot.slane %v4294_v62, 1  ;;  %v4301_v35 = vmax.f32 %v4299_v16, %v4300_v37  ;;  %v4308_v9 = vmax.f32 %v4306_v60, %v4307_v49  ;;  %v4314_v12 = vrot.slane %v4313_v55, 2 }
 0x3e8   : > { %v4322_v6 = vmax.f32 %v4320_v21, %v4321_v1  ;;  %v4328_v46 = vrot.slane %v4327_v8, 2  ;;  %v4289_v54 = vmax.f32 %v4287_v24, %v4288_v7  ;;  %v4673_v3 = vpack.c.bf16 %v8397_v61, %v8359_v31 }
 0x3e9   : > { %v4296_v57 = vmax.f32 %v4294_v62, %v4295_v27  ;;  %v4302_v20 = vrot.slane %v4301_v35, 1  ;;  %v6292_v48 = vpop.f32.mrb[52].mxu1  ;;  %v4309_v29 = vrot.slane %v4308_v9, 1  ;;  %v4315_v5 = vmax.f32 %v4313_v55, %v4314_v12 }
 0x3ea   : > { %v4329_v28 = vmax.f32 %v4327_v8, %v4328_v46  ;;  %v6293_v43 = vpop.f32.mrb[53].mxu1  ;;  %v4576_v33 = vsel %vm4534_vm7, %v4289_v54, %v4282_v51  ;;  %v4323_v47 = vrot.slane %v4322_v6, 1  ;;  %v3586_v23 = vmax.f32 %v8367_v44, 0.0  ;;  %4677 = vst.msk [vmem:[#allocation7 + $0x58] sm:$0xff] %vm3594_vm4, %v4673_v3  ;;  %4821 = vst.msk [vmem:[#allocation7 + $0x48] sm:$0xff] %vm3594_vm4, %v4673_v3 }
 0x3eb   : > { %v4303_v58 = vmax.f32 %v4301_v35, %v4302_v20  ;;  %v6294_v50 = vadd.f32 %v6293_v43, %v6292_v48  ;;  %v6295_v53 = vpop.f32.mrb[54].mxu1  ;;  %v4577_v52 = vsel %vm4536_vm8, %v4296_v57, %v4576_v33  ;;  %v4310_v32 = vmax.f32 %v4308_v9, %v4309_v29 }
 0x3ec   : > { %v4316_v18 = vrot.slane %v4315_v5, 1  ;;  %v6296_v59 = vpop.f32.mrb[55].mxu1  ;;  %v4330_v30 = vrot.slane %v4329_v28, 1  ;;  %v4324_v14 = vmax.f32 %v4322_v6, %v4323_v47  ;;  %v3587_v24 = vmax.f32 %v8379_v36, 0.0 }
 0x3ed   : > { %v4578_v2 = vsel %vm4538_vm9, %v4303_v58, %v4577_v52  ;;  %v3379_v11 = vadd.f32 %v8264_v38, %v6294_v50  ;;  %v6297_v10 = vadd.f32 %v6296_v59, %v6295_v53  ;;  %v3631_v62 = vsel %vm3594_vm4, %v3586_v23, -inf }
 0x3ee   : > { %v4317_v4 = vmax.f32 %v4315_v5, %v4316_v18  ;;  %v4579_v0 = vsel %vm4540_vm10, %v4310_v32, %v4578_v2  ;;  %v4331_v16 = vmax.f32 %v4329_v28, %v4330_v30  ;;  %v3634_v9 = vsel %vm3594_vm4, %v3587_v24, -inf }
 0x3ef   : > { %v3540_v15 = vadd.f32 %v8080_v26, %v3379_v11  ;;  %v3382_v56 = vadd.f32 %v8264_v38, %v6297_v10 }
 0x3f0   : > { %v4580_v60 = vsel %vm4542_vm11, %v4317_v4, %v4579_v0 }
 0x3f1   : > { %v4581_v21 = vsel %vm4544_vm12, %v4324_v14, %v4580_v60  ;;  %v3588_v41 = vmax.f32 %v3540_v15, 0.0  ;;  %v6298_v25 = vpop.f32.mrb[56].mxu1  ;;  %v3543_v44 = vadd.f32 %v8090_v42, %v3382_v56 }
 0x3f2   : > { %v4582_v31 = vsel %vm4546_vm13, %v4331_v16, %v4581_v21  ;;  %v6299_v26 = vpop.f32.mrb[57].mxu1 }
 0x3f3   : > { %4611 = vst.msk [vmem:[#allocation4 + $0x61] sm:$0xff] %vm3594_vm4, %v4582_v31  ;;  %v3632_v37 = vsel %vm3594_vm4, %v3588_v41, -inf  ;;  %v6300_v49 = vadd.f32 %v6299_v26, %v6298_v25  ;;  %v6301_v55 = vpop.f32.mrb[58].mxu1  ;;  %v3589_v8 = vmax.f32 %v3543_v44, 0.0 }
 0x3f4   : > { %v3633_v1 = vmax.f32 %v3631_v62, %v3632_v37  ;;  %v6302_v7 = vpop.f32.mrb[59].mxu1 }
 0x3f5   : > { %v6303_v27 = vadd.f32 %v6302_v7, %v6301_v55  ;;  %v3387_v35 = vadd.f32 %v8264_v38, %v6300_v49  ;;  %v3635_v12 = vsel %vm3594_vm4, %v3589_v8, -inf }
 0x3f6   : > { %v3863_v36 = vcombine.high %v3633_v1, %v3633_v1  ;;  %v3870_v42 = vrot.slane %v3633_v1, %v8000_v19  ;;  %v3636_v6 = vmax.f32 %v3634_v9, %v3635_v12 }
 0x3f7   : > { %v8423_v46 = vadd.f32 %v8177_v22, %v3387_v35  ;;  %v3390_v51 = vadd.f32 %v8264_v38, %v6303_v27 }
 0x3f8   : > { %v3877_v54 = vrot.slane %v3863_v36, %v8000_v19  ;;  %v3878_v57 = vcombine.high %v3870_v42, %v3870_v42  ;;  %v4332_v20 = vsel %vm3995_vm5, %v3870_v42, -inf  ;;  %v3880_v29 = vcombine.high %v3636_v6, %v3636_v6 }
 0x3f9   : > { %v4333_v48 = vrot.slane %v4332_v20, 4  ;;  %v3887_v5 = vrot.slane %v3636_v6, %v8000_v19  ;;  %v6304_v28 = vpop.f32.mrb[60].mxu1  ;;  %v8432_v22 = vadd.f32 %v8184_v39, %v3390_v51 }
 0x3fa   : > { %v3879_v43 = vcombine.high %v3877_v54, %v3877_v54  ;;  %v4339_v58 = vsel %vm3995_vm5, %v3878_v57, -inf  ;;  %v4346_v33 = vsel %vm3995_vm5, %v3877_v54, -inf  ;;  %v6305_v47 = vpop.f32.mrb[61].mxu1  ;;  %v3894_v32 = vrot.slane %v3880_v29, %v8000_v19 }
 0x3fb   : > { %v4334_v50 = vmax.f32 %v4332_v20, %v4333_v48  ;;  %v4340_v53 = vrot.slane %v4339_v58, 4  ;;  %v4347_v52 = vrot.slane %v4346_v33, 4  ;;  %v6307_v18 = vpop.f32.mrb[62].mxu1  ;;  %v3895_v30 = vcombine.high %v3887_v5, %v3887_v5 }
 0x3fc   : > { %v4353_v59 = vsel %vm3995_vm5, %v3879_v43, -inf  ;;  %v4360_v2 = vsel %vm3995_vm5, %v3887_v5, -inf  ;;  %v6308_v11 = vpop.f32.mrb[63].mxu1  ;;  %v3896_v14 = vcombine.high %v3894_v32, %v3894_v32  ;;  %v4374_v15 = vsel %vm3995_vm5, %v3894_v32, -inf }
 0x3fd   : > { %v4335_v4 = vrot.slane %v4334_v50, 2  ;;  %v4341_v0 = vmax.f32 %v4339_v58, %v4340_v53  ;;  %v4348_v10 = vmax.f32 %v4346_v33, %v4347_v52  ;;  %v4354_v3 = vrot.slane %v4353_v59, 4  ;;  %v8442_v52 = vld [vmem:[#allocation4 + $0x60] sm:$0xff] }
 0x3fe   : > { %v4361_v39 = vrot.slane %v4360_v2, 4  ;;  %v4367_v23 = vsel %vm3995_vm5, %v3895_v30, -inf  ;;  %v4375_v24 = vrot.slane %v4374_v15, 4  ;;  %v4381_v44 = vsel %vm3995_vm5, %v3896_v14, -inf }
 0x3ff   : > { %v4336_v16 = vmax.f32 %v4334_v50, %v4335_v4  ;;  %v4342_v60 = vrot.slane %v4341_v0, 2  ;;  %v4349_v56 = vrot.slane %v4348_v10, 2  ;;  %v4355_v21 = vmax.f32 %v4353_v59, %v4354_v3  ;;  %v4696_v41 = vpop.permute.xlu0 %4695  ;;  %v4824_v4 = vld [vmem:[#allocation7] sm:$0xff] }
 0x400   : > { %v4362_v25 = vmax.f32 %v4360_v2, %v4361_v39  ;;  %v4368_v31 = vrot.slane %v4367_v23, 4  ;;  %4707 = vst.msk [vmem:[#allocation7 + $0x8] sm:$0xff] %vm4658_vm14, %v4696_v41  ;;  %v4376_v8 = vmax.f32 %v4374_v15, %v4375_v24  ;;  %v4382_v7 = vrot.slane %v4381_v44, 4  ;;  %v8447_v39 = vld [vmem:[#allocation4 + $0x61] sm:$0xff] }
 0x401   : > { %v4337_v26 = vrot.slane %v4336_v16, 1  ;;  %v4343_v62 = vmax.f32 %v4341_v0, %v4342_v60  ;;  %v4350_v37 = vmax.f32 %v4348_v10, %v4349_v56  ;;  %v4356_v49 = vrot.slane %v4355_v21, 2 }
 0x402   : > { %v4363_v55 = vrot.slane %v4362_v25, 2  ;;  %v4369_v1 = vmax.f32 %v4367_v23, %v4368_v31  ;;  %v4377_v12 = vrot.slane %v4376_v8, 2  ;;  %v4383_v6 = vmax.f32 %v4381_v44, %v4382_v7 }
 0x403   : > { %v4344_v27 = vrot.slane %v4343_v62, 1  ;;  %v4351_v35 = vrot.slane %v4350_v37, 1  ;;  %v4357_v9 = vmax.f32 %v4355_v21, %v4356_v49  ;;  %v4338_v51 = vmax.f32 %v4336_v16, %v4337_v26 }
 0x404   : > { %v4364_v36 = vmax.f32 %v4362_v25, %v4363_v55  ;;  %v4370_v42 = vrot.slane %v4369_v1, 2  ;;  %v4378_v5 = vmax.f32 %v4376_v8, %v4377_v12  ;;  %v4384_v43 = vrot.slane %v4383_v6, 2 }
 0x405   : > { %v4345_v54 = vmax.f32 %v4343_v62, %v4344_v27  ;;  %v4352_v57 = vmax.f32 %v4350_v37, %v4351_v35  ;;  %v4358_v20 = vrot.slane %v4357_v9, 1  ;;  %v6306_v53 = vadd.f32 %v6305_v47, %v6304_v28 }
 0x406   : > { %v4365_v48 = vrot.slane %v4364_v36, 1  ;;  %v4371_v29 = vmax.f32 %v4369_v1, %v4370_v42  ;;  %v4379_v2 = vrot.slane %v4378_v5, 1  ;;  %v4385_v0 = vmax.f32 %v4383_v6, %v4384_v43  ;;  %v6634_v6 = vld [vmem:[%s8766_s6 + $0x100] sm:$0xff]  }
 0x407   : > { %v4359_v58 = vmax.f32 %v4357_v9, %v4358_v20  ;;  %v4583_v33 = vsel %vm4534_vm7, %v4345_v54, %v4338_v51  ;;  %v4825_v50 = vld [vmem:[#allocation7 + $0x8] sm:$0xff]  ;;  %v3395_v3 = vadd.f32 %v8264_v38, %v6306_v53  ;;  %v6309_v14 = vadd.f32 %v6308_v11, %v6307_v18  ;;  %6512 = vmatprep.subr.bf16.mxu0 %v6634_v6 }
 0x408   : > { %v4584_v32 = vsel %vm4536_vm8, %v4352_v57, %v4583_v33  ;;  %v4366_v59 = vmax.f32 %v4364_v36, %v4365_v48  ;;  %v4372_v30 = vrot.slane %v4371_v29, 1  ;;  %5183 = vmatprep.mubr.bf16.mxu0 %v4825_v50  ;;  %v3590_v47 = vmax.f32 %v8423_v46, 0.0 }
 0x409   : > { %v4585_v10 = vsel %vm4538_vm9, %v4359_v58, %v4584_v32  ;;  %5184 = vmatmul.mubr.bf16.vlgmr.msra.gmra.mrb[64].mxu0 %v4824_v4  ;;  %v4689_v15 = vpack.c.bf16 %v8442_v52, %v8364_v40  ;;  %v4380_v16 = vmax.f32 %v4378_v5, %v4379_v2  ;;  %v4386_v60 = vrot.slane %v4385_v0, 1  ;;  %v6635_v4 = vld [vmem:[%s8766_s6 + $0x108] sm:$0xff]  }
 0x40a   : > { %v4373_v23 = vmax.f32 %v4371_v29, %v4372_v30  ;;  %v4586_v28 = vsel %vm4540_vm10, %v4366_v59, %v4585_v10  ;;  %v3556_v56 = vadd.f32 %v8175_v17, %v3395_v3  ;;  %v3398_v21 = vadd.f32 %v8264_v38, %v6309_v14  ;;  %6513 = vmatpush3.bf16.msra.mxu0 %v6634_v6 }
 0x40b   : > { %v3591_v18 = vmax.f32 %v8432_v22, 0.0  ;;  %4699 = vrot.lane.b32.xlu0 %v4689_v15, %s6755_s2  ;;  %v4721_v11 = vpack.c.bf16 %v8447_v39, %v8362_v63  ;;  %v4387_v25 = vmax.f32 %v4385_v0, %v4386_v60  ;;  %v3637_v38 = vsel %vm3594_vm4, %v3590_v47, -inf  ;;  %6514 = vmatprep.subr.bf16.mxu0 %v6635_v4 }
 0x40c   : > { %v4587_v41 = vsel %vm4542_vm11, %v4373_v23, %v4586_v28  ;;  %v3592_v31 = vmax.f32 %v3556_v56, 0.0  ;;  %v3559_v40 = vadd.f32 %v8181_v34, %v3398_v21 }
 0x40d   : > { %v4588_v46 = vsel %vm4544_vm12, %v4380_v16, %v4587_v41  ;;  %4725 = vst.msk [vmem:[#allocation7 + $0x60] sm:$0xff] %vm3594_vm4, %v4721_v11  ;;  %v3640_v34 = vsel %vm3594_vm4, %v3591_v18, -inf }
 0x40e   : > { %v4589_v17 = vsel %vm4546_vm13, %v4387_v25, %v4588_v46  ;;  %v3638_v24 = vsel %vm3594_vm4, %v3592_v31, -inf  ;;  %v3593_v22 = vmax.f32 %v3559_v40, 0.0  ;;  %6515 = vmatpush3.bf16.msra.mxu0 %v6635_v4 }
 0x40f   : > { %4612 = vst.msk [vmem:[#allocation4 + $0x71] sm:$0xff] %vm3594_vm4, %v4589_v17  ;;  %v3639_v26 = vmax.f32 %v3637_v38, %v3638_v24  ;;  %4794 = vrot.lane.b32.xlu0 %v8372_v45, %s6755_s2 }
 0x410   : > { %v3641_v63 = vsel %vm3594_vm4, %v3593_v22, -inf }
 0x411   : > { %v4649_v44 = vpop.permute.xlu1 %4648  ;;  %v3897_v62 = vcombine.high %v3639_v26, %v3639_v26  ;;  %v3904_v37 = vrot.slane %v3639_v26, %v8000_v19  ;;  %v3642_v49 = vmax.f32 %v3640_v34, %v3641_v63 }
 0x412   : > { %4660 = vst.msk [vmem:[#allocation7 + $0x28] sm:$0xff] %vm4658_vm14, %v4649_v44 }
 0x413   : > { %v3911_v1 = vrot.slane %v3897_v62, %v8000_v19  ;;  %v3912_v8 = vcombine.high %v3904_v37, %v3904_v37  ;;  %v4388_v7 = vsel %vm3995_vm5, %v3904_v37, -inf  ;;  %v3914_v27 = vcombine.high %v3642_v49, %v3642_v49 }
 0x414   : > { %v4389_v45 = vrot.slane %v4388_v7, 4  ;;  %v3921_v35 = vrot.slane %v3642_v49, %v8000_v19 }
 0x415   : > { %v4744_v55 = vpop.permute.xlu1 %4743  ;;  %v3913_v9 = vcombine.high %v3911_v1, %v3911_v1  ;;  %v4395_v36 = vsel %vm3995_vm5, %v3912_v8, -inf  ;;  %v4402_v42 = vsel %vm3995_vm5, %v3911_v1, -inf  ;;  %v3928_v12 = vrot.slane %v3914_v27, %v8000_v19 }
 0x416   : > { %4755 = vst.msk [vmem:[#allocation7 + $0x10] sm:$0xff] %vm4658_vm14, %v4744_v55  ;;  %v4390_v51 = vmax.f32 %v4388_v7, %v4389_v45  ;;  %v4396_v54 = vrot.slane %v4395_v36, 4  ;;  %v4403_v57 = vrot.slane %v4402_v42, 4  ;;  %v3929_v20 = vcombine.high %v3921_v35, %v3921_v35  ;;  %v8491_v46 = vld [vmem:[#allocation4 + $0x71] sm:$0xff]  ;;  %v4732_v45 = vld [vmem:[#allocation4 + $0x62] sm:$0xff] }
 0x417   : > { %v4409_v48 = vsel %vm3995_vm5, %v3913_v9, -inf  ;;  %v3930_v29 = vcombine.high %v3928_v12, %v3928_v12  ;;  %v4416_v5 = vsel %vm3995_vm5, %v3921_v35, -inf  ;;  %v4430_v43 = vsel %vm3995_vm5, %v3928_v12, -inf  ;;  %v4685_v34 = vld [vmem:[#allocation4 + $0x70] sm:$0xff] }
 0x418   : > { %v4391_v58 = vrot.slane %v4390_v51, 2  ;;  %v4397_v33 = vmax.f32 %v4395_v36, %v4396_v54  ;;  %v4404_v50 = vmax.f32 %v4402_v42, %v4403_v57  ;;  %v4410_v53 = vrot.slane %v4409_v48, 4  ;;  %v4733_v63 = vld [vmem:[#allocation4 + $0x72] sm:$0xff] }
 0x419   : > { %v4417_v32 = vrot.slane %v4416_v5, 4  ;;  %v4423_v59 = vsel %vm3995_vm5, %v3929_v20, -inf  ;;  %v4431_v30 = vrot.slane %v4430_v43, 4  ;;  %v4437_v2 = vsel %vm3995_vm5, %v3930_v29, -inf }
 0x41a   : > { %v4392_v0 = vmax.f32 %v4390_v51, %v4391_v58  ;;  %v4398_v10 = vrot.slane %v4397_v33, 2  ;;  %v4405_v3 = vrot.slane %v4404_v50, 2  ;;  %v4411_v14 = vmax.f32 %v4409_v48, %v4410_v53  ;;  %v4767_v53 = vld [vmem:[#allocation4 + $0x90] sm:$0xff] }
 0x41b   : > { %v4418_v23 = vmax.f32 %v4416_v5, %v4417_v32  ;;  %v4424_v28 = vrot.slane %v4423_v59, 4  ;;  %v4432_v47 = vmax.f32 %v4430_v43, %v4431_v30  ;;  %v4438_v15 = vrot.slane %v4437_v2, 4  ;;  %v4815_v32 = vld [vmem:[#allocation4 + $0x92] sm:$0xff] }
 0x41c   : > { %v4393_v16 = vrot.slane %v4392_v0, 1  ;;  %v4399_v60 = vmax.f32 %v4397_v33, %v4398_v10  ;;  %v4406_v56 = vmax.f32 %v4404_v50, %v4405_v3  ;;  %v4412_v21 = vrot.slane %v4411_v14, 2  ;;  %v6637_v50 = vld [vmem:[%s8766_s6 + $0x118] sm:$0xff]  }
 0x41d   : > { %v4419_v41 = vrot.slane %v4418_v23, 2  ;;  %v4425_v18 = vmax.f32 %v4423_v59, %v4424_v28  ;;  %v4433_v11 = vrot.slane %v4432_v47, 2  ;;  %v4439_v25 = vmax.f32 %v4437_v2, %v4438_v15  ;;  %v4829_v15 = vld [vmem:[#allocation7 + $0x28] sm:$0xff] }
 0x41e   : > { %v4394_v31 = vmax.f32 %v4392_v0, %v4393_v16  ;;  %v4400_v40 = vrot.slane %v4399_v60, 1  ;;  %v4407_v17 = vrot.slane %v4406_v56, 1  ;;  %v4413_v38 = vmax.f32 %v4411_v14, %v4412_v21 }
 0x41f   : > { %v4420_v24 = vmax.f32 %v4418_v23, %v4419_v41  ;;  %v4426_v22 = vrot.slane %v4425_v18, 2  ;;  %v4434_v44 = vmax.f32 %v4432_v47, %v4433_v11  ;;  %v4440_v26 = vrot.slane %v4439_v25, 2  ;;  %v4783_v47 = vld [vmem:[#allocation4 + $0x91] sm:$0xff] }
 0x420   : > { %v4401_v62 = vmax.f32 %v4399_v60, %v4400_v40  ;;  %v4408_v37 = vmax.f32 %v4406_v56, %v4407_v17  ;;  %v4414_v49 = vrot.slane %v4413_v38, 1  ;;  %v4641_v55 = vpack.c.bf16 %v8491_v46, %v8447_v39  ;;  %v4826_v56 = vld [vmem:[#allocation7 + $0x10] sm:$0xff] }
 0x421   : > { %v4421_v1 = vrot.slane %v4420_v24, 1  ;;  %v4427_v8 = vmax.f32 %v4425_v18, %v4426_v22  ;;  %v4435_v7 = vrot.slane %v4434_v44, 1  ;;  %v4441_v27 = vmax.f32 %v4439_v25, %v4440_v26 }
 0x422   : > { %v4415_v35 = vmax.f32 %v4413_v38, %v4414_v49  ;;  %v4590_v9 = vsel %vm4534_vm7, %v4401_v62, %v4394_v31  ;;  %4652 = vrot.lane.b32.xlu1 %v4641_v55, %s6755_s2  ;;  %v4625_v36 = vpack.c.bf16 %v4685_v34, %v8442_v52  ;;  %v4674_v42 = vpack.c.bf16 %v4733_v63, %v4732_v45  ;;  %v4828_v62 = vld [vmem:[#allocation7 + $0x20] sm:$0xff] }
 0x423   : > { %v4591_v12 = vsel %vm4536_vm8, %v4408_v37, %v4590_v9  ;;  %v4422_v6 = vmax.f32 %v4420_v24, %v4421_v1  ;;  %v4428_v51 = vrot.slane %v4427_v8, 1  ;;  %v4442_v54 = vrot.slane %v4441_v27, 1  ;;  %v4833_v1 = vld [vmem:[#allocation7 + $0x48] sm:$0xff] }
 0x424   : > { %v4592_v39 = vsel %vm4538_vm9, %v4415_v35, %v4591_v12  ;;  %v4737_v57 = vpack.c.bf16 %v4732_v45, %v8397_v61  ;;  %4629 = vst.msk [vmem:[#allocation7 + $0x78] sm:$0xff] %vm3594_vm4, %v4625_v36  ;;  %4678 = vst.msk [vmem:[#allocation7 + $0x80] sm:$0xff] %vm3594_vm4, %v4674_v42  ;;  %v4436_v48 = vmax.f32 %v4434_v44, %v4435_v7  ;;  %v6636_v61 = vld [vmem:[%s8766_s6 + $0x110] sm:$0xff]  }
 0x425   : > { %4774 = vst.msk [vmem:[#allocation7 + $0x68] sm:$0xff] %vm3594_vm4, %v4625_v36  ;;  %4822 = vst.msk [vmem:[#allocation7 + $0x70] sm:$0xff] %vm3594_vm4, %v4674_v42  ;;  %v4429_v20 = vmax.f32 %v4427_v8, %v4428_v51  ;;  %v4593_v52 = vsel %vm4540_vm10, %v4422_v6, %v4592_v39  ;;  %v4443_v29 = vmax.f32 %v4441_v27, %v4442_v54  ;;  %6516 = vmatprep.subr.bf16.mxu0 %v6636_v61 }
 0x426   : > { %4747 = vrot.lane.b32.xlu1 %v4737_v57, %s6755_s2  ;;  %6517 = vmatpush3.bf16.msra.mxu0 %v6636_v61  ;;  %v8546_v57 = vld [vmem:[%s8767_s7] ss:$0 sm:$0xff] }
 0x427   : > { %v4594_v5 = vsel %vm4542_vm11, %v4429_v20, %v4593_v52  ;;  %6518 = vmatprep.subr.bf16.mxu0 %v6637_v50 }
 0x428   : > { %v4595_v43 = vsel %vm4544_vm12, %v4436_v48, %v4594_v5 }
 0x429   : > { %v4596_v58 = vsel %vm4546_vm13, %v4443_v29, %v4595_v43 }
 0x42a   : > { %4613 = vst.msk [vmem:[#allocation4 + $0x81] sm:$0xff] %vm3594_vm4, %v4596_v58  ;;  %6519 = vmatpush3.bf16.msra.mxu0 %v6637_v50 }
 0x42c   : > { %v4838_v8 = vld [vmem:[#allocation7 + $0x70] sm:$0xff] }
 0x42e   : > { %v4698_v33 = vpop.permute.xlu0 %4697 }
 0x42f   : > { %4708 = vst.msk [vmem:[#allocation7 + $0x30] sm:$0xff] %vm4658_vm14, %v4698_v33 }
 0x431   : > { %v4686_v59 = vld [vmem:[#allocation4 + $0x80] sm:$0xff] }
 0x432   : > { %v4734_v30 = vld [vmem:[#allocation4 + $0x82] sm:$0xff]  ;;  %v4690_v4 = vpack.c.bf16 %v4686_v59, %v4685_v34  ;;  %v4793_v10 = vpop.permute.xlu0 %4792  ;;  %v4771_v14 = vpack.c.bf16 %v4767_v53, %v4686_v59 }
 0x433   : > { %v4782_v2 = vld [vmem:[#allocation4 + $0x81] sm:$0xff]  ;;  %v4738_v0 = vpack.c.bf16 %v4734_v30, %v4733_v63  ;;  %4804 = vst.msk [vmem:[#allocation7 + $0x18] sm:$0xff] %vm4658_vm14, %v4793_v10  ;;  %v4819_v23 = vpack.c.bf16 %v4815_v32, %v4734_v30 }
 0x434   : > { %v4722_v3 = vpack.c.bf16 %v4782_v2, %v8491_v46  ;;  %4701 = vrot.lane.b32.xlu0 %v4690_v4, %s6755_s2  ;;  %4775 = vst.msk [vmem:[#allocation7 + $0x90] sm:$0xff] %vm3594_vm4, %v4771_v14  ;;  %v4787_v16 = vpack.c.bf16 %v4783_v47, %v4782_v2  ;;  %v6640_v59 = vld [vmem:[%s8768_s8 + $0x4] ss:$8 sps:$4 sm:$0xff]   ;;  %v6638_v30 = vld [vmem:[%s8768_s8] ss:$8 sps:$4 sm:$0xff]  }
 0x435   : > { %4749 = vrot.lane.b32.xlu1 %v4738_v0, %s6755_s2  ;;  %4823 = vst.msk [vmem:[#allocation7 + $0x98] sm:$0xff] %vm3594_vm4, %v4819_v23  ;;  %5730 = vmatprep.subr.bf16.mxu1 %v6640_v59  ;;  %v6643_v2 = vld [vmem:[%s8768_s8 + $0x14] ss:$8 sps:$4 sm:$0xff]   ;;  %v6641_v4 = vld [vmem:[%s8768_s8 + $0x10] ss:$8 sps:$4 sm:$0xff]  }
 0x436   : > { %4726 = vst.msk [vmem:[#allocation7 + $0x88] sm:$0xff] %vm3594_vm4, %v4722_v3  ;;  %v4830_v28 = vld [vmem:[#allocation7 + $0x30] sm:$0xff]  ;;  %v6646_v0 = vld [vmem:[%s8768_s8 + $0x24] ss:$8 sps:$4 sm:$0xff]   ;;  %v6644_v10 = vld [vmem:[%s8768_s8 + $0x20] ss:$8 sps:$4 sm:$0xff]  }
 0x437   : > { %5191 = vmatprep.mubr.bf16.mxu0 %v4830_v28  ;;  %v6649_v3 = vld [vmem:[%s8768_s8 + $0x34] ss:$8 sps:$4 sm:$0xff]   ;;  %v6647_v14 = vld [vmem:[%s8768_s8 + $0x30] ss:$8 sps:$4 sm:$0xff]   ;;  %v6653_v23 = vld [vmem:[%s8768_s8 + $0x44] ss:$8 sps:$4 sm:$0xff]  }
 0x438   : > { %4796 = vrot.lane.b32.xlu0 %v4641_v55, %s6755_s2  ;;  %5192 = vmatmul.mubr.bf16.gmra.mrb[68].mxu0 %v4829_v15  ;;  %v6651_v28 = vld [vmem:[%s8768_s8 + $0x40] ss:$8 sps:$4 sm:$0xff]   ;;  %v6657_v47 = vld [vmem:[%s8768_s8 + $0x54] ss:$8 sps:$4 sm:$0xff]   ;;  %v6655_v15 = vld [vmem:[%s8768_s8 + $0x50] ss:$8 sps:$4 sm:$0xff]  }
 0x43a   : > { %v4827_v60 = vld [vmem:[#allocation7 + $0x18] sm:$0xff] }
 0x43b   : > { %5248 = vmatprep.mubr.bf16.mxu1 %v4827_v60  ;;  %v6658_v60 = vld [vmem:[%s8768_s8 + $0x60] ss:$8 sps:$4 sm:$0xff]  }
 0x43c   : > { %4798 = vrot.lane.b32.xlu0 %v4787_v16, %s6755_s2  ;;  %5249 = vmatmul.mubr.bf16.vlgmr.msra.gmra.mrb[64].mxu1 %v4826_v56  ;;  %v4843_v27 = vld [vmem:[#allocation7 + $0x98] sm:$0xff]  ;;  %v5592_v16 = vld [vmem:[%s8769_s9] sm:$0xff] }
 0x43d   : > { %5731 = vmatpush1.bf16.msra.mxu1 %v6638_v30  ;;  %v6660_v56 = vld [vmem:[%s8768_s8 + $0x64] ss:$8 sps:$4 sm:$0xff]  }
 0x43e   : > { %5732 = vmatprep.subr.bf16.mxu1 %v6643_v2 }
 0x441   : > { %5733 = vmatpush1.bf16.msra.mxu1 %v6641_v4 }
 0x442   : > { %5734 = vmatprep.subr.bf16.mxu1 %v6646_v0 }
 0x445   : > { %5735 = vmatpush1.bf16.msra.mxu1 %v6644_v10 }
 0x446   : > { %5736 = vmatprep.subr.bf16.mxu1 %v6649_v3 }
 0x449   : > { %5737 = vmatpush1.bf16.msra.mxu1 %v6647_v14 }
 0x44a   : > { %5738 = vmatprep.subr.bf16.mxu1 %v6653_v23 }
 0x44d   : > { %5739 = vmatpush1.bf16.msra.mxu1 %v6651_v28 }
 0x44e   : > { %v4651_v21 = vpop.permute.xlu1 %4650  ;;  %5740 = vmatprep.subr.bf16.mxu1 %v6657_v47 }
 0x44f   : > { %4661 = vst.msk [vmem:[#allocation7 + $0x50] sm:$0xff] %vm4658_vm14, %v4651_v21  ;;  %v6140_v21 = vcombine.high %v5592_v16, %v5592_v16 }
 0x451   : > { %5741 = vmatpush1.bf16.msra.mxu1 %v6655_v15  ;;  %6141 = vmatprep.subr.msk.bf16.mxu0 %vm5602_vm15, %v6140_v21 }
 0x452   : > { %v4746_v41 = vpop.permute.xlu1 %4745  ;;  %5742 = vmatprep.subr.bf16.mxu1 %v6660_v56 }
 0x453   : > { %4756 = vst.msk [vmem:[#allocation7 + $0x38] sm:$0xff] %vm4658_vm14, %v4746_v41  ;;  %v6139_v41 = vcombine.low %v5592_v16, %v5592_v16 }
 0x455   : > { %5743 = vmatpush1.bf16.msra.mxu1 %v6658_v60 }
 0x456   : > { %v4834_v46 = vld [vmem:[#allocation7 + $0x50] sm:$0xff] }
 0x45a   : > { %v4831_v40 = vld [vmem:[#allocation7 + $0x38] sm:$0xff] }
 0x47d   : > { %v4700_v18 = vpop.permute.xlu0 %4699 }
 0x47e   : > { %4709 = vst.msk [vmem:[#allocation7 + $0x58] sm:$0xff] %vm4658_vm14, %v4700_v18  ;;  %v6663_v18 = vld [vmem:[%s8768_s8 + $0x74] ss:$8 sps:$4 sm:$0xff]  }
 0x47f   : > { %5744 = vmatprep.subr.bf16.mxu1 %v6663_v18 }
 0x481   : > { %v4795_v11 = vpop.permute.xlu0 %4794 }
 0x482   : > { %4805 = vst.msk [vmem:[#allocation7 + $0x40] sm:$0xff] %vm4658_vm14, %v4795_v11  ;;  %v6758_v11 = vmov 0  }
 0x485   : > { %v4835_v25 = vld [vmem:[#allocation7 + $0x58] sm:$0xff] }
 0x486   : > { %5199 = vmatprep.mubr.bf16.mxu0 %v4835_v25  ;;  %v5573_v25 = vld [vmem:[%s451_s23] sm:$0x1]  ;;  %s6759_s23 = smov [#allocation8]  }
 0x487   : > { %5200 = vmatmul.mubr.bf16.gmra.mrb[72].mxu0 %v4834_v46  ;;  %v5604_v46 = vsel %vm5602_vm15, %v6139_v41, 0  ;;  %s6686_s0 = sshll.u32 %s6759_s23, 4  ;;  %s6687_s0 = int_to_ptr.vmem [resolvable:$false] %s6686_s0 }
 0x488   : > { %s6688_s30 = scalar_lea.vmem %s6687_s0, 32  ;;  %p6689_p0 = scmp.lt.s32.totalorder %s8720_s3, %s6687_s0 }
 0x489   : > { %v4832_v31 = vld [vmem:[#allocation7 + $0x40] sm:$0xff]  ;;  %p6690_p1 = scmp.lt.s32.totalorder %s6688_s30, %s6682_s29 }
 0x48a   : > { %5256 = vmatprep.mubr.bf16.mxu1 %v4832_v31  ;;  %v6661_v31 = vld [vmem:[%s8768_s8 + $0x70] ss:$8 sps:$4 sm:$0xff]  }
 0x48b   : > { %5257 = vmatmul.mubr.bf16.gmra.mrb[68].mxu1 %v4831_v40  ;;  %v5591_v40 = vpack.c.bf16 %v5573_v25, %v5573_v25  ;;  %p6691_p2 = por %p6690_p1, %p6689_p0 }
 0x48c   : > { %5745 = vmatpush1.bf16.msra.mxu1 %v6661_v31 }
 0x48d   : > { %p6692_p3 = pnand %p6691_p2, %p6685_p13 }
 0x494   : > { %v4653_v17 = vpop.permute.xlu1 %4652 }
 0x495   : > { %4662 = vst.msk [vmem:[#allocation7 + $0x78] sm:$0xff] %vm4658_vm14, %v4653_v17  ;;  %v6664_v17 = vld [vmem:[%s8771_s11 + $0x40] sm:$0xff]  }
 0x498   : > { %v4748_v38 = vpop.permute.xlu1 %4747 }
 0x499   : > { %4757 = vst.msk [vmem:[#allocation7 + $0x60] sm:$0xff] %vm4658_vm14, %v4748_v38  ;;  %v6665_v38 = vld [vmem:[%s8771_s11] sm:$0xff]  }
 0x49c   : > { %v4839_v63 = vld [vmem:[#allocation7 + $0x78] sm:$0xff] }
 0x4a0   : > { %v4836_v49 = vld [vmem:[#allocation7 + $0x60] sm:$0xff] }
 0x4a6   : > { %v4702_v24 = vpop.permute.xlu0 %4701 }
 0x4a7   : > { %v4750_v22 = vpop.permute.xlu1 %4749  ;;  %4710 = vst.msk [vmem:[#allocation7 + $0x80] sm:$0xff] %vm4658_vm14, %v4702_v24  ;;  %v6666_v24 = vld [vmem:[%s8771_s11 + $0x48] sm:$0xff]  }
 0x4a8   : > { %4758 = vst.msk [vmem:[#allocation7 + $0x88] sm:$0xff] %vm4658_vm14, %v4750_v22  ;;  %v6667_v22 = vld [vmem:[%s8771_s11 + $0x8] sm:$0xff]  }
 0x4aa   : > { %v4797_v44 = vpop.permute.xlu0 %4796 }
 0x4ab   : > { %4806 = vst.msk [vmem:[#allocation7 + $0x68] sm:$0xff] %vm4658_vm14, %v4797_v44  ;;  %v6668_v44 = vld [vmem:[%s8771_s11 + $0x50] sm:$0xff]  }
 0x4ae   : > { %v4799_v26 = vpop.permute.xlu0 %4798  ;;  %v4840_v34 = vld [vmem:[#allocation7 + $0x80] sm:$0xff] }
 0x4af   : > { %4807 = vst.msk [vmem:[#allocation7 + $0x90] sm:$0xff] %vm4658_vm14, %v4799_v26  ;;  %5207 = vmatprep.mubr.bf16.mxu0 %v4840_v34  ;;  %v4841_v7 = vld [vmem:[#allocation7 + $0x88] sm:$0xff]  ;;  %v6669_v26 = vld [vmem:[%s8771_s11 + $0x10] sm:$0xff]   ;;  %v6670_v34 = vld [vmem:[%s8771_s11 + $0x58] sm:$0xff]  }
 0x4b0   : > { %5208 = vmatmul.mubr.bf16.gmra.mrb[76].mxu0 %v4839_v63  ;;  %v6671_v63 = vld [vmem:[%s8771_s11 + $0x18] sm:$0xff]  }
 0x4b1   : > { %6520 = vmatprep.mubr.msk.bf16.mxu0 %vm3594_vm4, %v4828_v62  ;;  %v6672_v62 = vld [vmem:[%s8771_s11 + $0x60] sm:$0xff]  }
 0x4b2   : > { %v4837_v37 = vld [vmem:[#allocation7 + $0x68] sm:$0xff] }
 0x4b3   : > { %5264 = vmatprep.mubr.bf16.mxu1 %v4837_v37 }
 0x4b4   : > { %5265 = vmatmul.mubr.bf16.gmra.mrb[72].mxu1 %v4836_v49  ;;  %v6673_v49 = vld [vmem:[%s8771_s11 + $0x20] sm:$0xff]  }
 0x4b6   : > { %v4842_v55 = vld [vmem:[#allocation7 + $0x90] sm:$0xff] }
 0x4b7   : > { %5272 = vmatprep.mubr.bf16.mxu1 %v4842_v55 }
 0x4b8   : > { %6521 = vmatmul.mubr.msk.bf16.vlgmr.msra.gmra.mrb[80].mxu0 %vm3594_vm4, %v4833_v1 }
 0x4b9   : > { %6524 = vmatprep.mubr.msk.bf16.mxu0 %vm3594_vm4, %v4838_v8  ;;  %5610 = vmatpush1.bf16.msra.mxu0 %v5604_v46 }
 0x4ba   : > { %6416 = vmatprep.subr.bf16.mxu0 %v6664_v17 }
 0x4bc   : > { %5273 = vmatmul.mubr.bf16.gmra.mrb[76].mxu1 %v4841_v7 }
 0x4bd   : > { %5762 = vmatprep.mubr.bf16.mxu1 %v6758_v11 }
 0x4c0   : > { %6525 = vmatmul.mubr.msk.bf16.gmra.mrb[84].mxu0 %vm3594_vm4, %v4843_v27 }
 0x4c1   : > { %5641 = vmatprep.mubr.bf16.mxu0 %v6758_v11 }
 0x4c8   : > { %6142 = vmatmul.mubr.msk.bf16.vlgmr.msra.gmra.mrb[88].mxu0 %vm5598_vm0, %v5591_v40 }
 0x4c9   : > { %6417 = vmatpush3.bf16.msra.mxu0 %v6665_v38 }
 0x4ca   : > { %6418 = vmatprep.subr.bf16.mxu0 %v6666_v24 }
 0x4cd   : > { %6419 = vmatpush3.bf16.msra.mxu0 %v6667_v22 }
 0x4ce   : > { %6420 = vmatprep.subr.bf16.mxu0 %v6668_v44 }
 0x4d1   : > { %6421 = vmatpush3.bf16.msra.mxu0 %v6669_v26 }
 0x4d2   : > { %6422 = vmatprep.subr.bf16.mxu0 %v6670_v34 }
 0x4d5   : > { %6423 = vmatpush3.bf16.msra.mxu0 %v6671_v63 }
 0x4d6   : > { %6424 = vmatprep.subr.bf16.mxu0 %v6672_v62 }
 0x4d9   : > { %6425 = vmatpush3.bf16.msra.mxu0 %v6673_v49 }
 0x4dc   : > { %v6344_v45 = vpop.f32.mrb[64].mxu0 }
 0x4dd   : > { %v6345_v35 = vpop.f32.mrb[65].mxu0 }
 0x4de   : > { %v6346_v9 = vadd.f32 %v6345_v35, %v6344_v45  ;;  %v6347_v36 = vpop.f32.mrb[66].mxu0 }
 0x4df   : > { %v6348_v42 = vpop.f32.mrb[67].mxu0 }
 0x4e0   : > { %v6349_v12 = vadd.f32 %v6348_v42, %v6347_v36  ;;  %v5186_v5 = vadd.f32 %v6346_v9, %v8546_v57 }
 0x4e2   : > { %v5189_v33 = vadd.f32 %v6349_v12, %v8546_v57 }
 0x50b   : > { %v6350_v6 = vpop.f32.mrb[68].mxu0 }
 0x50c   : > { %v6351_v51 = vpop.f32.mrb[69].mxu0 }
 0x50d   : > { %v8541_v54 = vadd.f32 %v6351_v51, %v6350_v6  ;;  %v6353_v39 = vpop.f32.mrb[70].mxu0 }
 0x50e   : > { %v6354_v20 = vpop.f32.mrb[71].mxu0 }
 0x50f   : > { %v8548_v52 = vadd.f32 %v6354_v20, %v6353_v39  ;;  %v6384_v48 = vpop.f32.mrb[64].mxu1  ;;  %v5194_v9 = vadd.f32 %v8541_v54, %v8546_v57 }
 0x510   : > { %v6385_v29 = vpop.f32.mrb[65].mxu1 }
 0x511   : > { %v6386_v61 = vadd.f32 %v6385_v29, %v6384_v48  ;;  %v6387_v43 = vpop.f32.mrb[66].mxu1  ;;  %v5197_v6 = vadd.f32 %v8548_v52, %v8546_v57 }
 0x512   : > { %v6388_v58 = vpop.f32.mrb[67].mxu1 }
 0x513   : > { %v6389_v50 = vadd.f32 %v6388_v58, %v6387_v43  ;;  %v8552_v53 = vadd.f32 %v6386_v61, %v5186_v5 }
 0x515   : > { %v8554_v32 = vadd.f32 %v6389_v50, %v5189_v33 }
 0x55a   : > { %v6356_v37 = vpop.f32.mrb[72].mxu0 }
 0x55b   : > { %v6357_v55 = vpop.f32.mrb[73].mxu0 }
 0x55c   : > { %v6358_v1 = vadd.f32 %v6357_v55, %v6356_v37  ;;  %v6359_v8 = vpop.f32.mrb[74].mxu0 }
 0x55d   : > { %v6360_v7 = vpop.f32.mrb[75].mxu0 }
 0x55e   : > { %v6361_v27 = vadd.f32 %v6360_v7, %v6359_v8  ;;  %v6390_v45 = vpop.f32.mrb[68].mxu1  ;;  %v5202_v59 = vadd.f32 %v6358_v1, %v8546_v57 }
 0x55f   : > { %v6391_v35 = vpop.f32.mrb[69].mxu1 }
 0x560   : > { %v6392_v36 = vadd.f32 %v6391_v35, %v6390_v45  ;;  %v6393_v42 = vpop.f32.mrb[70].mxu1  ;;  %v5205_v4 = vadd.f32 %v6361_v27, %v8546_v57 }
 0x561   : > { %v6394_v12 = vpop.f32.mrb[71].mxu1 }
 0x562   : > { %v6395_v51 = vadd.f32 %v6394_v12, %v6393_v42  ;;  %v5259_v39 = vadd.f32 %v6392_v36, %v5194_v9 }
 0x564   : > { %v5262_v20 = vadd.f32 %v6395_v51, %v5197_v6 }
 0x583   : > { %v6362_v48 = vpop.f32.mrb[76].mxu0 }
 0x584   : > { %v6363_v29 = vpop.f32.mrb[77].mxu0 }
 0x585   : > { %v6364_v5 = vadd.f32 %v6363_v29, %v6362_v48  ;;  %v6365_v61 = vpop.f32.mrb[78].mxu0 }
 0x586   : > { %v6366_v43 = vpop.f32.mrb[79].mxu0 }
 0x587   : > { %v6367_v58 = vadd.f32 %v6366_v43, %v6365_v61  ;;  %v6396_v33 = vpop.f32.mrb[72].mxu1  ;;  %v5210_v11 = vadd.f32 %v6364_v5, %v8546_v57 }
 0x588   : > { %v6397_v50 = vpop.f32.mrb[73].mxu1 }
 0x589   : > { %v6398_v54 = vadd.f32 %v6397_v50, %v6396_v33  ;;  %v6399_v30 = vpop.f32.mrb[74].mxu1  ;;  %v5213_v26 = vadd.f32 %v6367_v58, %v8546_v57 }
 0x58a   : > { %v6400_v2 = vpop.f32.mrb[75].mxu1 }
 0x58b   : > { %v6401_v0 = vadd.f32 %v6400_v2, %v6399_v30  ;;  %v6522_v52 = vpop.f32.mrb[80].mxu0  ;;  %v5267_v10 = vadd.f32 %v6398_v54, %v5202_v59 }
 0x58c   : > { %v5324_v3 = vadd.f32 %v6522_v52, %v5259_v39  ;;  %v5315_v14 = vpop.f32.mrb[81].mxu0 }
 0x58d   : > { %v5316_v23 = vadd.f32 %v5315_v14, %v8552_v53  ;;  %v6523_v28 = vpop.f32.mrb[82].mxu0  ;;  %v8648_v47 = vadd.f32 %v6401_v0, %v5205_v4 }
 0x58e   : > { %v5327_v15 = vadd.f32 %v6523_v28, %v5262_v20  ;;  %v5318_v16 = vpop.f32.mrb[83].mxu0  ;;  %v5348_v21 = vmax.f32 %v5324_v3, 0.0  ;;  %v6674_v28 = vld [vmem:[%s8771_s11 + $0x68] sm:$0xff]  }
 0x58f   : > { %v5319_v60 = vadd.f32 %v5318_v16, %v8554_v32  ;;  %v6402_v56 = vpop.f32.mrb[76].mxu1  ;;  %v5346_v25 = vmax.f32 %v5316_v23, 0.0  ;;  %6426 = vmatprep.subr.bf16.mxu0 %v6674_v28 }
 0x590   : > { %v5349_v41 = vmax.f32 %v5327_v15, 0.0  ;;  %v6403_v18 = vpop.f32.mrb[77].mxu1 }
 0x591   : > { %v5347_v46 = vmax.f32 %v5319_v60, 0.0  ;;  %v6404_v31 = vadd.f32 %v6403_v18, %v6402_v56  ;;  %v6405_v40 = vpop.f32.mrb[78].mxu1 }
 0x592   : > { %v5355_v17 = vmax.f32 %v5348_v21, %v5349_v41  ;;  %v6406_v38 = vpop.f32.mrb[79].mxu1 }
 0x593   : > { %v5354_v53 = vmax.f32 %v5346_v25, %v5347_v46  ;;  %v6407_v24 = vadd.f32 %v6406_v38, %v6405_v40  ;;  %v5275_v22 = vadd.f32 %v6404_v31, %v5210_v11  ;;  %v6526_v44 = vpop.f32.mrb[84].mxu0 }
 0x594   : > { %v5379_v34 = vcombine.high %v5355_v17, %v5355_v17  ;;  %v5386_v32 = vrot.slane %v5355_v17, %v8000_v19  ;;  %v5331_v63 = vpop.f32.mrb[85].mxu0 }
 0x595   : > { %v5362_v62 = vcombine.high %v5354_v53, %v5354_v53  ;;  %v5369_v37 = vrot.slane %v5354_v53, %v8000_v19  ;;  %v8655_v49 = vadd.f32 %v6526_v44, %v5275_v22  ;;  %v8657_v55 = vadd.f32 %v5331_v63, %v5267_v10  ;;  %v6527_v1 = vpop.f32.mrb[86].mxu0 }
 0x596   : > { %v5393_v8 = vrot.slane %v5379_v34, %v8000_v19  ;;  %v5394_v7 = vcombine.high %v5386_v32, %v5386_v32  ;;  %v5474_v27 = vsel %vm1753_vm3, %v5386_v32, -inf  ;;  %v5278_v45 = vadd.f32 %v6407_v24, %v5213_v26  ;;  %v5334_v35 = vpop.f32.mrb[87].mxu0 }
 0x597   : > { %v5475_v57 = vrot.slane %v5474_v27, 4  ;;  %v5376_v9 = vrot.slane %v5362_v62, %v8000_v19  ;;  %v5377_v36 = vcombine.high %v5369_v37, %v5369_v37  ;;  %v5446_v42 = vsel %vm1753_vm3, %v5369_v37, -inf }
 0x598   : > { %v5395_v12 = vcombine.high %v5393_v8, %v5393_v8  ;;  %v5481_v6 = vsel %vm1753_vm3, %v5394_v7, -inf  ;;  %v5488_v51 = vsel %vm1753_vm3, %v5393_v8, -inf  ;;  %v5447_v39 = vrot.slane %v5446_v42, 4 }
 0x599   : > { %v5476_v20 = vmax.f32 %v5474_v27, %v5475_v57  ;;  %v5482_v48 = vrot.slane %v5481_v6, 4  ;;  %v5489_v29 = vrot.slane %v5488_v51, 4  ;;  %v5378_v5 = vcombine.high %v5376_v9, %v5376_v9 }
 0x59a   : > { %v5495_v61 = vsel %vm1753_vm3, %v5395_v12, -inf  ;;  %v5448_v43 = vmax.f32 %v5446_v42, %v5447_v39  ;;  %v5453_v58 = vsel %vm1753_vm3, %v5377_v36, -inf  ;;  %v5460_v33 = vsel %vm1753_vm3, %v5376_v9, -inf }
 0x59b   : > { %v5477_v50 = vrot.slane %v5476_v20, 2  ;;  %v5483_v59 = vmax.f32 %v5481_v6, %v5482_v48  ;;  %v5490_v54 = vmax.f32 %v5488_v51, %v5489_v29  ;;  %v5496_v30 = vrot.slane %v5495_v61, 4 }
 0x59c   : > { %v5449_v2 = vrot.slane %v5448_v43, 2  ;;  %v5454_v4 = vrot.slane %v5453_v58, 4  ;;  %v5461_v0 = vrot.slane %v5460_v33, 4  ;;  %v5467_v52 = vsel %vm1753_vm3, %v5378_v5, -inf }
 0x59d   : > { %v5478_v10 = vmax.f32 %v5476_v20, %v5477_v50  ;;  %v5484_v3 = vrot.slane %v5483_v59, 2  ;;  %v5491_v14 = vrot.slane %v5490_v54, 2  ;;  %v5497_v23 = vmax.f32 %v5495_v61, %v5496_v30 }
 0x59e   : > { %v5450_v15 = vmax.f32 %v5448_v43, %v5449_v2  ;;  %v5455_v16 = vmax.f32 %v5453_v58, %v5454_v4  ;;  %v5462_v60 = vmax.f32 %v5460_v33, %v5461_v0  ;;  %v5468_v56 = vrot.slane %v5467_v52, 4 }
 0x59f   : > { %v5479_v21 = vrot.slane %v5478_v10, 1  ;;  %v5485_v41 = vmax.f32 %v5483_v59, %v5484_v3  ;;  %v5492_v18 = vmax.f32 %v5490_v54, %v5491_v14  ;;  %v5498_v11 = vrot.slane %v5497_v23, 2 }
 0x5a0   : > { %v5456_v25 = vrot.slane %v5455_v16, 2  ;;  %v5463_v46 = vrot.slane %v5462_v60, 2  ;;  %v5469_v31 = vmax.f32 %v5467_v52, %v5468_v56  ;;  %v5451_v53 = vrot.slane %v5450_v15, 1 }
 0x5a1   : > { %v5486_v40 = vrot.slane %v5485_v41, 1  ;;  %v5493_v17 = vrot.slane %v5492_v18, 1  ;;  %v5499_v38 = vmax.f32 %v5497_v23, %v5498_v11  ;;  %v5480_v26 = vmax.f32 %v5478_v10, %v5479_v21 }
 0x5a2   : > { %v5457_v24 = vmax.f32 %v5455_v16, %v5456_v25  ;;  %v5464_v22 = vmax.f32 %v5462_v60, %v5463_v46  ;;  %v5470_v44 = vrot.slane %v5469_v31, 2  ;;  %v5343_v27 = vadd.f32 %v6527_v1, %v5278_v45 }
 0x5a3   : > { %v5487_v34 = vmax.f32 %v5485_v41, %v5486_v40  ;;  %v5500_v32 = vrot.slane %v5499_v38, 1  ;;  %v5494_v8 = vmax.f32 %v5492_v18, %v5493_v17  ;;  %v5335_v57 = vadd.f32 %v5334_v35, %v8648_v47 }
 0x5a4   : > { %v5458_v63 = vrot.slane %v5457_v24, 1  ;;  %v5465_v62 = vrot.slane %v5464_v22, 1  ;;  %v5471_v37 = vmax.f32 %v5469_v31, %v5470_v44  ;;  %v5452_v9 = vmax.f32 %v5450_v15, %v5451_v53 }
 0x5a5   : > { %v5561_v7 = vmax.f32 %v5480_v26, %v5487_v34  ;;  %v5352_v12 = vmax.f32 %v8655_v49, 0.0  ;;  %v5350_v51 = vmax.f32 %v8657_v55, 0.0  ;;  %v5353_v39 = vmax.f32 %v5343_v27, 0.0 }
 0x5a6   : > { %v5459_v36 = vmax.f32 %v5457_v24, %v5458_v63  ;;  %v5472_v42 = vrot.slane %v5471_v37, 1  ;;  %v5351_v20 = vmax.f32 %v5335_v57, 0.0  ;;  %v5501_v48 = vmax.f32 %v5499_v38, %v5500_v32 }
 0x5a7   : > { %v5562_v6 = vmax.f32 %v5561_v7, %v5494_v8  ;;  %v5466_v29 = vmax.f32 %v5464_v22, %v5465_v62  ;;  %v5357_v61 = vmax.f32 %v5352_v12, %v5353_v39 }
 0x5a8   : > { %v5558_v5 = vmax.f32 %v5452_v9, %v5459_v36  ;;  %v5356_v43 = vmax.f32 %v5350_v51, %v5351_v20  ;;  %v5473_v58 = vmax.f32 %v5471_v37, %v5472_v42 }
 0x5a9   : > { %v5563_v1 = vmax.f32 %v5562_v6, %v5501_v48  ;;  %v5413_v45 = vcombine.high %v5357_v61, %v5357_v61  ;;  %v5420_v47 = vrot.slane %v5357_v61, %v8000_v19 }
 0x5aa   : > { %v5559_v33 = vmax.f32 %v5558_v5, %v5466_v29  ;;  %v5396_v35 = vcombine.high %v5356_v43, %v5356_v43  ;;  %v5403_v50 = vrot.slane %v5356_v43, %v8000_v19 }
 0x5ab   : > { %v5427_v59 = vrot.slane %v5413_v45, %v8000_v19  ;;  %v5428_v55 = vcombine.high %v5420_v47, %v5420_v47  ;;  %v5530_v54 = vsel %vm1753_vm3, %v5420_v47, -inf }
 0x5ac   : > { %v5560_v49 = vmax.f32 %v5559_v33, %v5473_v58  ;;  %v5410_v30 = vrot.slane %v5396_v35, %v8000_v19  ;;  %v5531_v2 = vrot.slane %v5530_v54, 4  ;;  %v5411_v4 = vcombine.high %v5403_v50, %v5403_v50 }
 0x5ad   : > { %v5502_v0 = vsel %vm1753_vm3, %v5403_v50, -inf  ;;  %v5429_v10 = vcombine.high %v5427_v59, %v5427_v59  ;;  %v5537_v3 = vsel %vm1753_vm3, %v5428_v55, -inf  ;;  %v5544_v14 = vsel %vm1753_vm3, %v5427_v59, -inf }
 0x5ae   : > { %v8681_v52 = vmax.f32 %v5560_v49, %v5563_v1  ;;  %v5412_v23 = vcombine.high %v5410_v30, %v5410_v30  ;;  %v5532_v28 = vmax.f32 %v5530_v54, %v5531_v2  ;;  %v5538_v15 = vrot.slane %v5537_v3, 4 }
 0x5af   : > { %v5545_v16 = vrot.slane %v5544_v14, 4  ;;  %v5503_v60 = vrot.slane %v5502_v0, 4  ;;  %v5551_v56 = vsel %vm1753_vm3, %v5429_v10, -inf  ;;  %v5509_v19 = vsel %vm1753_vm3, %v5411_v4, -inf }
 0x5b0   : > { %v5516_v21 = vsel %vm1753_vm3, %v5410_v30, -inf  ;;  %v5523_v41 = vsel %vm1753_vm3, %v5412_v23, -inf  ;;  %v5533_v18 = vrot.slane %v5532_v28, 2  ;;  %v5539_v11 = vmax.f32 %v5537_v3, %v5538_v15 }
 0x5b1   : > { %v5546_v25 = vmax.f32 %v5544_v14, %v5545_v16  ;;  %v5552_v46 = vrot.slane %v5551_v56, 4  ;;  %v5504_v31 = vmax.f32 %v5502_v0, %v5503_v60  ;;  %v5510_v40 = vrot.slane %v5509_v19, 4  ;;  %v5643_v14 = vpop.f32.mrb[88].mxu0  ;;  %v6676_v60 = vld [vmem:[%s8771_s11 + $0x70] sm:$0xff]  }
 0x5b2   : > { %v5517_v17 = vrot.slane %v5516_v21, 4  ;;  %v5524_v38 = vrot.slane %v5523_v41, 4  ;;  %v5534_v53 = vmax.f32 %v5532_v28, %v5533_v18  ;;  %v5540_v24 = vrot.slane %v5539_v11, 2  ;;  %v5645_v23 = vpop.f32.mrb[89].mxu0  ;;  %v6675_v28 = vld [vmem:[%s8771_s11 + $0x28] sm:$0xff]  }
 0x5b3   : > { %v5547_v22 = vrot.slane %v5546_v25, 2  ;;  %v5553_v44 = vmax.f32 %v5551_v56, %v5552_v46  ;;  %v5505_v26 = vrot.slane %v5504_v31, 2  ;;  %v5511_v34 = vmax.f32 %v5509_v19, %v5510_v40  ;;  %v5647_v15 = vpop.f32.mrb[90].mxu0  ;;  %6427 = vmatpush3.bf16.msra.mxu0 %v6675_v28  ;;  %v6677_v56 = vld [vmem:[%s8771_s11 + $0x30] sm:$0xff]   ;;  %v6679_v19 = vld [vmem:[%s8771_s11 + $0x38] sm:$0xff]  }
 0x5b4   : > { %v5518_v32 = vmax.f32 %v5516_v21, %v5517_v17  ;;  %v5525_v63 = vmax.f32 %v5523_v41, %v5524_v38  ;;  %v5535_v62 = vrot.slane %v5534_v53, 1  ;;  %v5541_v37 = vmax.f32 %v5539_v11, %v5540_v24  ;;  %v5648_v16 = vpop.f32.mrb[91].mxu0  ;;  %6428 = vmatprep.subr.bf16.mxu0 %v6676_v60  ;;  %v5771_v41 = vld [vmem:[%s8770_s10] sm:$0x3] }
 0x5b5   : > { %v5548_v8 = vmax.f32 %v5546_v25, %v5547_v22  ;;  %v5554_v7 = vrot.slane %v5553_v44, 2  ;;  %v5506_v27 = vmax.f32 %v5504_v31, %v5505_v26  ;;  %v5512_v57 = vrot.slane %v5511_v34, 2 }
 0x5b6   : > { %v5519_v9 = vrot.slane %v5518_v32, 2  ;;  %v5526_v36 = vrot.slane %v5525_v63, 2  ;;  %v5542_v42 = vrot.slane %v5541_v37, 1  ;;  %v5536_v29 = vmax.f32 %v5534_v53, %v5535_v62 }
 0x5b7   : > { %v5549_v12 = vrot.slane %v5548_v8, 1  ;;  %v5555_v6 = vmax.f32 %v5553_v44, %v5554_v7  ;;  %v5507_v51 = vrot.slane %v5506_v27, 1  ;;  %v5513_v39 = vmax.f32 %v5511_v34, %v5512_v57  ;;  %6429 = vmatpush3.bf16.msra.mxu0 %v6677_v56 }
 0x5b8   : > { %v5520_v20 = vmax.f32 %v5518_v32, %v5519_v9  ;;  %v5527_v48 = vmax.f32 %v5525_v63, %v5526_v36  ;;  %v5543_v5 = vmax.f32 %v5541_v37, %v5542_v42  ;;  %v5775_v21 = vsub.s32 0, %v7994_v13  ;;  %v5821_v63 = vld [vmem:[%s8772_s12] sm:$0x1] }
 0x5b9   : > { %v5556_v61 = vrot.slane %v5555_v6, 1  ;;  %v5514_v43 = vrot.slane %v5513_v39, 1  ;;  %v5550_v33 = vmax.f32 %v5548_v8, %v5549_v12  ;;  %v5508_v45 = vmax.f32 %v5506_v27, %v5507_v51 }
 0x5ba   : > { %v5521_v58 = vrot.slane %v5520_v20, 1  ;;  %v5567_v1 = vmax.f32 %v5536_v29, %v5543_v5  ;;  %v5528_v35 = vrot.slane %v5527_v48, 1  ;;  %v5779_v18 = vsub.s32 1, %v7994_v13 }
 0x5bb   : > { %v5515_v47 = vmax.f32 %v5513_v39, %v5514_v43  ;;  %v5557_v49 = vmax.f32 %v5555_v6, %v5556_v61  ;;  %v5776_v11 = vrot.slane %v5771_v41, %v5775_v21  ;;  %vm5958_vm3 = vcmask 40960  }
 0x5bc   : > { %v5568_v50 = vmax.f32 %v5567_v1, %v5550_v33  ;;  %v5522_v59 = vmax.f32 %v5520_v20, %v5521_v58  ;;  %v5529_v54 = vmax.f32 %v5527_v48, %v5528_v35  ;;  %v5780_v46 = vrot.slane %v5771_v41, %v5779_v18 }
 0x5bd   : > { %v5564_v55 = vmax.f32 %v5508_v45, %v5515_v47 }
 0x5be   : > { %v5569_v2 = vmax.f32 %v5568_v50, %v5557_v49 }
 0x5bf   : > { %v5565_v30 = vmax.f32 %v5564_v55, %v5522_v59 }
 0x5c1   : > { %v5566_v4 = vmax.f32 %v5565_v30, %v5529_v54 }
 0x5c3   : > { %v5571_v0 = vmax.f32 %v5566_v4, %v5569_v2 }
 0x5c5   : > { %v5572_v10 = vmax.f32 %v8681_v52, %v5571_v0  ;;  %v6678_v52 = vld [vmem:[%s8771_s11 + $0x78] sm:$0xff]  }
 0x5c6   : > { %6430 = vmatprep.subr.bf16.mxu0 %v6678_v52 }
 0x5c7   : > { %v5574_v3 = vpack.c.bf16 %v5572_v10, %v5572_v10  ;;  %6431 = vmatpush3.bf16.msra.mxu0 %v6679_v19 }
 0x5c9   : > { %5763 = vmatmul.mubr.bf16.vlgmr.msra.gmra.mrb[80].mxu1 %v5574_v3 }
 0x69c   : > { %v5764_v25 = vpop.f32.mrb[80].mxu1 }
 0x69d   : > { %v5765_v31 = vadd.f32 %v5764_v25, %v5643_v14  ;;  %v5766_v40 = vpop.f32.mrb[81].mxu1 }
 0x69e   : > { %v5767_v17 = vadd.f32 %v5766_v40, %v5645_v23  ;;  %v5768_v38 = vpop.f32.mrb[82].mxu1 }
 0x69f   : > { %v5783_v53 = vadd.f32 %v5776_v11, %v5765_v31  ;;  %v5769_v24 = vpop.f32.mrb[83].mxu1 }
 0x6a0   : > { %v5784_v22 = vadd.f32 %v5780_v46, %v5767_v17 }
 0x6a1   : > { %v5785_v44 = vmax.f32 %v5783_v53, 0.0 }
 0x6a2   : > { %v5786_v26 = vmax.f32 %v5784_v22, 0.0 }
 0x6a3   : > { %v5787_v32 = vpack.c.bf16 %v5785_v44, %v5785_v44 }
 0x6a4   : > { %v5788_v34 = vpack.c.bf16 %v5786_v26, %v5786_v26 }
 0x6a6   : > { %5950 = vmatprep.mubr.bf16.mxu0 %v5788_v34 }
 0x6a7   : > { %5951 = vmatmul.mubr.bf16.vlgmr.msra.gmra.mrb[92].mxu0 %v5787_v32 }
 0x77a   : > { %v6432_v13 = vpop.f32.mrb[92].mxu0 }
 0x77b   : > { %v6433_v62 = vpop.f32.mrb[93].mxu0 }
 0x77c   : > { %v6434_v37 = vadd.f32 %v6433_v62, %v6432_v13  ;;  %v6435_v8 = vpop.f32.mrb[94].mxu0 }
 0x77d   : > { %v6436_v7 = vpop.f32.mrb[95].mxu0 }
 0x77e   : > { %v5953_v27 = vadd.f32 %v6434_v37, %v5821_v63 }
 0x780   : > { %5959 = vst.msk [vmem:[%s443_s16] sm:$0x1] %vm5958_vm3, %v5953_v27 }
 0x781   : > { %6695 = shalt.err (!%p6692_p3)
}
 0x782   : > { %s6696_s24 = scalar_lea.hbm %s8718_s22, 16  ;;  %s6700_s16 = scalar_lea.hbm %s8773_s13, 32 }
 0x783   : > { %p6697_p4 = scmp.ne.s32.totalorder %s8718_s22, %s6696_s24  ;;  %p6701_p9 = scmp.lt.u32.totalorder %s8718_s22, %s8773_s13 }
 0x784   : > { %p6702_p10 = scmp.lt.u32.totalorder %s6700_s16, %s6696_s24  ;;  %p6704_p12 = scmp.lt.u32.totalorder %s6696_s24, %s8718_s22 }
 0x785   : > { %p6698_p7 = pnand %p6697_p4, %p6868_p5 }
 0x786   : > { %p6703_p11 = por %p6702_p10, %p6701_p9 }
 0x787   : > { %p6699_p8 = pneg %p6698_p7 }
 0x788   : > { %p6705_p13 = por %p6704_p12, %p6703_p11 }
 0x78a   : > { %p6706_p0 = pnand %p6705_p13, %p6699_p8 }
 0x78c   : > { %6709 = shalt.err (!%p6706_p0)
}
 0x78d   : > { %6529 = dma.vmem_to_hbm [thread:$0]  (%p6868_p5), %s8720_s3, 16, %s8718_s22, %s5961_s21  }
 0x78e PF: > { %p6535_p1 = scmp.ge.s32.totalorder %s6744_s28, 2  ;;  %s5985_s29 = sand.u32 1, %s6732_s25  }
 0x78f   : > { %s5986_s23 = scalar_lea.sflag [#allocation9], %s5985_s29 }
 0x790   : > { %p6532_p2 = pnand %p6535_p1, %p6872_p6 }
 0x792   : > { %6727 = dma.done.wait (!%p6532_p2), %s5986_s23, 16  }
 0x793   : > { %6729 = vsyncadd (!%p6532_p2), %s5986_s23, 4294967280  ;;  %p23_p3 = scmp.ge.s32.totalorder %s6855_s14, 4   ;;  %s8808_s25 = smov %s6736_s26 }
 0x794   : > { %s8809_s26 = smov %s6740_s27  ;;  %s8810_s27 = smov %s6866_s17 }
 0x795   : > { %s8811_s28 = smov %s6855_s14  ;;  %25 = sbr.rel (!%p23_p3) target bundleno = 8 (0x8), region = 119 }
 0x79c   :  { %5990 = vsyncpa [#allocation9], 1 }
 0x79d   :  { %5992 = vsyncpa [#allocation9 + $0x1], 1 }

</bundles_post_ra>
